<compile_context>
chip_gen: v5e
topology: v5e:2x2
jax: 0.10.0
libtpu: 0.0.40
codegen_flags: <defaults>
</compile_context>

<pallas_src>
import functools

import jax
import jax.numpy as jnp
from jax.experimental import pallas as pl
from jax.experimental.pallas import tpu as pltpu

LANE = 128


def _round_up(n, m):
    return ((n + m - 1) // m) * m


# ---------------------------------------------------------------------------
# Pallas kernels
# ---------------------------------------------------------------------------
def _mm_kernel(x_ref, w_ref, scale_ref, shift_ref, o_ref, *, relu):
    """(tm, K) @ (K, O) GEMM + per-channel scale/shift (+ ReLU)."""
    acc = jnp.dot(x_ref[...], w_ref[...], preferred_element_type=jnp.float32)
    y = acc * scale_ref[...] + shift_ref[...]
    if relu:
        y = jnp.maximum(y, 0.0)
    o_ref[...] = y.astype(o_ref.dtype)


def _mm_res_kernel(x_ref, w_ref, scale_ref, shift_ref, res_ref, o_ref, *, relu):
    """Same as _mm_kernel with the bottleneck residual add fused before ReLU."""
    acc = jnp.dot(x_ref[...], w_ref[...], preferred_element_type=jnp.float32)
    y = acc * scale_ref[...] + shift_ref[...] + res_ref[...].astype(jnp.float32)
    if relu:
        y = jnp.maximum(y, 0.0)
    o_ref[...] = y.astype(o_ref.dtype)


def _conv3x3_kernel(x_ref, w_ref, scale_ref, shift_ref, o_ref, *,
                    stride, oh, wq, relu):
    """Implicit-GEMM 3x3 conv (padding=1) for one image.

    x_ref  : (stride*stride, 1, L, Cp) per-phase spatially flattened padded
             input (L = (oh+q)*wq + q); each tap is a contiguous 2D slice.
    w_ref  : (9, Cp, Op) tap weights.
    o_ref  : (1, oh*wq, Op) "wide" output rows; columns ow >= OW are wrap
             over-compute and are discarded by the wrapper.
    """
    op = o_ref.shape[-1]
    rows = oh * wq
    acc = jnp.zeros((rows, op), jnp.float32)
    for kh in range(3):
        for kw in range(3):
            p = (kh % stride) * stride + (kw % stride)
            off = (kh // stride) * wq + (kw // stride)
            xs = x_ref[p, 0, off:off + rows, :]               # (rows, Cp) bf16
            acc = acc + jnp.dot(xs, w_ref[kh * 3 + kw],
                                preferred_element_type=jnp.float32)
    y = acc * scale_ref[...] + shift_ref[...]
    if relu:
        y = jnp.maximum(y, 0.0)
    o_ref[0] = y.astype(o_ref.dtype)


# ---------------------------------------------------------------------------
# pallas_call wrappers
# ---------------------------------------------------------------------------
def _pick_tm(m):
    """Largest multiple-of-8 row tile dividing M: <=512 rows, and >=2 grid
    steps for small M (keeps both TensorCores busy on v7x)."""
    target = 512 if m >= 1024 else max(8, m // 2)
    t = max(8, (target // 8) * 8)
    while t >= 8:
        if m % t == 0:
            return t
        t -= 8
    return min(512, _round_up(m, 8))


def conv1x1_fused(x2d, w, scale, shift, *, residual=None, relu):
    """1x1 conv as a fused GEMM.  x2d: (M, Cin_p) bf16, w: (Cin_p, O_p) bf16."""
    m, kp = x2d.shape
    op = w.shape[1]
    tm = _pick_tm(m)
    mp = _round_up(m, tm)
    x2d = x2d.astype(jnp.bfloat16)
    if mp != m:                                   # not hit for the demo shapes
        x2d = jnp.pad(x2d, ((0, mp - m), (0, 0)))
        if residual is not None:
            residual = jnp.pad(residual, ((0, mp - m), (0, 0)))

    in_specs = [
        pl.BlockSpec((tm, kp), lambda i: (i, 0)),
        pl.BlockSpec((kp, op), lambda i: (0, 0)),
        pl.BlockSpec((1, op), lambda i: (0, 0)),
        pl.BlockSpec((1, op), lambda i: (0, 0)),
    ]
    args = [x2d, w, scale, shift]
    if residual is None:
        kernel = functools.partial(_mm_kernel, relu=relu)
    else:
        in_specs.append(pl.BlockSpec((tm, op), lambda i: (i, 0)))
        args.append(residual.astype(jnp.bfloat16))
        kernel = functools.partial(_mm_res_kernel, relu=relu)

    out = pl.pallas_call(
        kernel,
        out_shape=jax.ShapeDtypeStruct((mp, op), jnp.bfloat16),
        grid_spec=pltpu.PrefetchScalarGridSpec(
            num_scalar_prefetch=0,
            grid=(mp // tm,),
            in_specs=in_specs,
            out_specs=pl.BlockSpec((tm, op), lambda i: (i, 0)),
        ),
        compiler_params=pltpu.CompilerParams(
            dimension_semantics=("parallel",)),
    )(*args)
    return out if mp == m else out[:m]


def conv3x3_fused(x_nhwc, w9, scale, shift, *, stride, relu):
    """3x3 conv (padding=1) as an implicit GEMM.  Returns ((N*OH*OW, O_p), OH, OW)."""
    n, h, w, cp = x_nhwc.shape
    op = w9.shape[-1]
    pad = 1
    oh = (h + 2 * pad - 3) // stride + 1
    ow = (w + 2 * pad - 3) // stride + 1
    q = 2 // stride                       # max in-phase window offset
    hq, wq = oh + q, ow + q

    # conv zero-padding + alignment, then split into stride^2 phases so the
    # kernel only ever needs contiguous static slices (stride is absorbed),
    # then flatten the per-phase spatial dims and add a q-row tail pad.
    xp = jnp.pad(x_nhwc.astype(jnp.bfloat16),
                 ((0, 0), (pad, stride * hq - h - pad),
                  (pad, stride * wq - w - pad), (0, 0)))
    xph = xp.reshape(n, hq, stride, wq, stride, cp)
    xph = xph.transpose(2, 4, 0, 1, 3, 5).reshape(stride * stride, n, hq * wq, cp)
    xph = jnp.pad(xph, ((0, 0), (0, 0), (0, q), (0, 0)))
    ell = hq * wq + q
    rows = oh * wq

    kernel = functools.partial(_conv3x3_kernel, stride=stride, oh=oh, wq=wq,
                               relu=relu)
    # TODO(synk): for large spatial extents, additionally tile OH over the grid
    # instead of holding one whole image block in VMEM per grid step.
    out = pl.pallas_call(
        kernel,
        out_shape=jax.ShapeDtypeStruct((n, rows, op), jnp.bfloat16),
        grid_spec=pltpu.PrefetchScalarGridSpec(
            num_scalar_prefetch=0,
            grid=(n,),
            in_specs=[
                pl.BlockSpec((stride * stride, 1, ell, cp),
                             lambda i: (0, i, 0, 0)),
                pl.BlockSpec((9, cp, op), lambda i: (0, 0, 0)),
                pl.BlockSpec((1, op), lambda i: (0, 0)),
                pl.BlockSpec((1, op), lambda i: (0, 0)),
            ],
            out_specs=pl.BlockSpec((1, rows, op), lambda i: (i, 0, 0)),
        ),
        compiler_params=pltpu.CompilerParams(
            dimension_semantics=("parallel",)),
    )(xph, w9, scale, shift)
    # drop the (wq - OW) over-computed wrap columns
    out = out.reshape(n, oh, wq, op)[:, :, :ow, :].reshape(n * oh * ow, op)
    return out, oh, ow


# ---------------------------------------------------------------------------
# Parameter packing (PyTorch layouts -> kernel layouts) and the forward pass
# ---------------------------------------------------------------------------
def _fold_bn(gamma, beta, mean, var, eps=1e-5):
    """Inference-mode BatchNorm folded into per-channel scale/shift."""
    s = gamma / jnp.sqrt(var + eps)
    return s, beta - mean * s


def _prep_vec(v, op, fill=0.0):
    o = v.shape[0]
    return jnp.pad(v, (0, op - o),
                   constant_values=fill).reshape(1, op).astype(jnp.float32)


def _prep_w1x1(w, cin_p, o_p):                  # (O, Cin, 1, 1) -> (Cin_p, O_p)
    o, cin = w.shape[0], w.shape[1]
    wm = w.reshape(o, cin).T
    return jnp.pad(wm, ((0, cin_p - cin), (0, o_p - o))).astype(jnp.bfloat16)


def _prep_w3x3(w, cin_p, o_p):                  # (O, Cin, 3, 3) -> (9, Cin_p, O_p)
    o, cin = w.shape[0], w.shape[1]
    w9 = w.transpose(2, 3, 1, 0).reshape(9, cin, o)
    return jnp.pad(w9, ((0, 0), (0, cin_p - cin), (0, o_p - o))).astype(jnp.bfloat16)


def res_down_forward(x_nchw, prep, *, change_channel=True):
    """Forward pass of res_down (inference).  x_nchw: (N, C, H, W) float32."""
    # TODO(synk): BatchNorm is inference-mode (running stats folded); training-
    # mode batch statistics are out of scope for this kernel.
    n, c, h, w = x_nchw.shape
    cp = _round_up(c, LANE)
    x = jnp.transpose(x_nchw, (0, 2, 3, 1))                       # NHWC
    x = jnp.pad(x, ((0, 0), (0, 0), (0, 0), (0, cp - c))).astype(jnp.bfloat16)

    # self.down: Conv2d(C, C, 3, stride=2, padding=1) with bias, no activation
    cur, oh, ow = conv3x3_fused(x, prep["down_w"], prep["down_scale"],
                                prep["down_shift"], stride=2, relu=False)

    # triple_bottleneck: 3x Bottleneck(C, planes) with folded inference BN
    for blk in prep["blocks"]:
        res = cur
        t = conv1x1_fused(cur, blk["w1"], blk["s1"], blk["b1"], relu=True)
        t = t.reshape(n, oh, ow, t.shape[-1])
        t, _, _ = conv3x3_fused(t, blk["w2"], blk["s2"], blk["b2"],
                                stride=1, relu=True)
        cur = conv1x1_fused(t, blk["w3"], blk["s3"], blk["b3"],
                            residual=res, relu=True)

    # self.conv: Conv2d(C, 2C, 1) with bias (only if change_channel)
    if change_channel:
        cur = conv1x1_fused(cur, prep["conv_w"], prep["conv_scale"],
                            prep["conv_shift"], relu=False)
        c_out = 2 * c
    else:
        c_out = c

    y = cur.reshape(n, oh, ow, -1)[..., :c_out]
    return jnp.transpose(y, (0, 3, 1, 2)).astype(jnp.float32)


# ---------------------------------------------------------------------------
if __name__ == "__main__":
    # res_down(inChannels=16, outChannels=4): Bottleneck expansion=4 requires
    # outChannels * 4 == inChannels for the residual add to be shape-valid.
    N, C_IN, H, W = 2, 16, 16, 16
    PLANES, EXP = 4, 4
    assert PLANES * EXP == C_IN

    key = jax.random.PRNGKey(0)
    keys = iter(jax.random.split(key, 64))

    def nrm(shape, s=0.1):
        return s * jax.random.normal(next(keys), shape, jnp.float32)

    # ---- raw parameters (PyTorch layouts) --------------------------------
    raw = {
        "down_w": nrm((C_IN, C_IN, 3, 3)),
        "down_b": nrm((C_IN,)),
        "conv_w": nrm((2 * C_IN, C_IN, 1, 1)),
        "conv_b": nrm((2 * C_IN,)),
        "blocks": [],
    }
    for _ in range(3):
        b = {
            "w1": nrm((PLANES, C_IN, 1, 1)),
            "w2": nrm((PLANES, PLANES, 3, 3)),
            "w3": nrm((PLANES * EXP, PLANES, 1, 1)),
        }
        for i, ch in ((1, PLANES), (2, PLANES), (3, PLANES * EXP)):
            b[f"g{i}"] = 1.0 + 0.1 * jax.random.normal(next(keys), (ch,), jnp.float32)
            b[f"beta{i}"] = nrm((ch,), 0.05)
            b[f"mu{i}"] = nrm((ch,), 0.05)
            b[f"var{i}"] = 0.9 + 0.2 * jax.random.uniform(next(keys), (ch,), jnp.float32)
        raw["blocks"].append(b)

    x = jax.random.normal(next(keys), (N, C_IN, H, W), jnp.float32)

    # ---- packed parameters for the Pallas kernels ------------------------
    CP = _round_up(C_IN, LANE)
    PP = _round_up(PLANES, LANE)
    EP = _round_up(PLANES * EXP, LANE)
    C2P = _round_up(2 * C_IN, LANE)

    prep = {
        "down_w": _prep_w3x3(raw["down_w"], CP, CP),
        "down_scale": _prep_vec(jnp.ones((C_IN,), jnp.float32), CP, fill=1.0),
        "down_shift": _prep_vec(raw["down_b"], CP),
        "conv_w": _prep_w1x1(raw["conv_w"], CP, C2P),
        "conv_scale": _prep_vec(jnp.ones((2 * C_IN,), jnp.float32), C2P, fill=1.0),
        "conv_shift": _prep_vec(raw["conv_b"], C2P),
        "blocks": [],
    }
    for b in raw["blocks"]:
        s1, sh1 = _fold_bn(b["g1"], b["beta1"], b["mu1"], b["var1"])
        s2, sh2 = _fold_bn(b["g2"], b["beta2"], b["mu2"], b["var2"])
        s3, sh3 = _fold_bn(b["g3"], b["beta3"], b["mu3"], b["var3"])
        prep["blocks"].append({
            "w1": _prep_w1x1(b["w1"], CP, PP),
            "s1": _prep_vec(s1, PP, fill=1.0), "b1": _prep_vec(sh1, PP),
            "w2": _prep_w3x3(b["w2"], PP, PP),
            "s2": _prep_vec(s2, PP, fill=1.0), "b2": _prep_vec(sh2, PP),
            "w3": _prep_w1x1(b["w3"], PP, EP),
            "s3": _prep_vec(s3, EP, fill=1.0), "b3": _prep_vec(sh3, EP),
        })

    fwd = jax.jit(functools.partial(res_down_forward, change_channel=True))
    y = jax.block_until_ready(fwd(x, prep))

    # ---- f32 XLA reference ------------------------------------------------
    def conv_ref(a, w, stride=1, padding=0):
        return jax.lax.conv_general_dilated(
            a, w, (stride, stride), [(padding, padding), (padding, padding)],
            dimension_numbers=("NCHW", "OIHW", "NCHW"),
            precision=jax.lax.Precision.HIGHEST)

    def bc(v):
        return v.reshape(1, -1, 1, 1)

    yr = conv_ref(x, raw["down_w"], 2, 1) + bc(raw["down_b"])
    for b in raw["blocks"]:
        s1, sh1 = _fold_bn(b["g1"], b["beta1"], b["mu1"], b["var1"])
        s2, sh2 = _fold_bn(b["g2"], b["beta2"], b["mu2"], b["var2"])
        s3, sh3 = _fold_bn(b["g3"], b["beta3"], b["mu3"], b["var3"])
        r = yr
        t = jnp.maximum(conv_ref(yr, b["w1"]) * bc(s1) + bc(sh1), 0.0)
        t = jnp.maximum(conv_ref(t, b["w2"], 1, 1) * bc(s2) + bc(sh2), 0.0)
        t = conv_ref(t, b["w3"]) * bc(s3) + bc(sh3)
        yr = jnp.maximum(t + r, 0.0)
    yr = conv_ref(yr, raw["conv_w"]) + bc(raw["conv_b"])

    assert y.shape == (N, 2 * C_IN, H // 2, W // 2), y.shape
    max_err = float(jnp.max(jnp.abs(y - yr)))
    # tolerance sized for bf16 matmul operands across an 11-conv chain
    # (accumulation is f32 via preferred_element_type)
    assert jnp.allclose(y, yr, rtol=5e-2, atol=1e-1), max_err
    print("KERNEL_OK")
</pallas_src>

<mosaic_0001>
module attributes {stable_mosaic.version = 11 : i64} {
  func.func @_conv3x3_kernel(%arg0: i32, %arg1: memref<4x1x82x128xbf16, #tpu.memory_space<vmem>>, %arg2: memref<9x128x128xbf16, #tpu.memory_space<vmem>>, %arg3: memref<1x128xf32, #tpu.memory_space<vmem>>, %arg4: memref<1x128xf32, #tpu.memory_space<vmem>>, %arg5: memref<1x72x128xbf16, #tpu.memory_space<vmem>>) attributes {dimension_semantics = [#tpu.dimension_semantics<parallel>], iteration_bounds = array<i64: 2>, scalar_prefetch = 0 : i64, scratch_operands = 0 : i64, tpu.core_type = #tpu.core_type<tc>, window_params = [{transform_indices = @transform_0, window_bounds = array<i64: 4, 1, 82, 128>}, {pipeline_mode = #tpu.pipeline_mode<synchronous>, transform_indices = @transform_1, window_bounds = array<i64: 9, 128, 128>}, {pipeline_mode = #tpu.pipeline_mode<synchronous>, transform_indices = @transform_2, window_bounds = array<i64: 1, 128>}, {pipeline_mode = #tpu.pipeline_mode<synchronous>, transform_indices = @transform_3, window_bounds = array<i64: 1, 128>}, {transform_indices = @transform_4, window_bounds = array<i64: 1, 72, 128>}]} {
    %cst = arith.constant 0.000000e+00 : f32
    %0 = vector.broadcast %cst : f32 to vector<72x128xf32>
    %c0 = arith.constant 0 : index
    %c0_0 = arith.constant 0 : index
    %c0_1 = arith.constant 0 : index
    %c0_2 = arith.constant 0 : index
    %1 = vector.load %arg1[%c0, %c0_0, %c0_1, %c0_2] : memref<4x1x82x128xbf16, #tpu.memory_space<vmem>>, vector<1x1x72x128xbf16>
    %2 = vector.shape_cast %1 : vector<1x1x72x128xbf16> to vector<72x128xbf16>
    %c0_3 = arith.constant 0 : index
    %c0_4 = arith.constant 0 : index
    %c0_5 = arith.constant 0 : index
    %3 = vector.load %arg2[%c0_3, %c0_4, %c0_5] : memref<9x128x128xbf16, #tpu.memory_space<vmem>>, vector<1x128x128xbf16>
    %4 = vector.shape_cast %3 : vector<1x128x128xbf16> to vector<128x128xbf16>
    %cst_6 = arith.constant dense<0.000000e+00> : vector<72x128xf32>
    %5 = tpu.matmul %2, %4, %cst_6 {dimension_numbers = #tpu.dot_dimension_numbers<[1], [0], [0], [1], [0, 0, 1, 1], [], []>} : vector<72x128xbf16>, vector<128x128xbf16>, vector<72x128xf32> -> vector<72x128xf32>
    %6 = arith.addf %0, %5 : vector<72x128xf32>
    %c1 = arith.constant 1 : index
    %c0_7 = arith.constant 0 : index
    %c0_8 = arith.constant 0 : index
    %c0_9 = arith.constant 0 : index
    %7 = vector.load %arg1[%c1, %c0_7, %c0_8, %c0_9] : memref<4x1x82x128xbf16, #tpu.memory_space<vmem>>, vector<1x1x72x128xbf16>
    %8 = vector.shape_cast %7 : vector<1x1x72x128xbf16> to vector<72x128xbf16>
    %c1_10 = arith.constant 1 : index
    %c0_11 = arith.constant 0 : index
    %c0_12 = arith.constant 0 : index
    %9 = vector.load %arg2[%c1_10, %c0_11, %c0_12] : memref<9x128x128xbf16, #tpu.memory_space<vmem>>, vector<1x128x128xbf16>
    %10 = vector.shape_cast %9 : vector<1x128x128xbf16> to vector<128x128xbf16>
    %cst_13 = arith.constant dense<0.000000e+00> : vector<72x128xf32>
    %11 = tpu.matmul %8, %10, %cst_13 {dimension_numbers = #tpu.dot_dimension_numbers<[1], [0], [0], [1], [0, 0, 1, 1], [], []>} : vector<72x128xbf16>, vector<128x128xbf16>, vector<72x128xf32> -> vector<72x128xf32>
    %12 = arith.addf %6, %11 : vector<72x128xf32>
    %c0_14 = arith.constant 0 : index
    %c0_15 = arith.constant 0 : index
    %c1_16 = arith.constant 1 : index
    %c0_17 = arith.constant 0 : index
    %13 = vector.load %arg1[%c0_14, %c0_15, %c1_16, %c0_17] : memref<4x1x82x128xbf16, #tpu.memory_space<vmem>>, vector<1x1x72x128xbf16>
    %14 = vector.shape_cast %13 : vector<1x1x72x128xbf16> to vector<72x128xbf16>
    %c2 = arith.constant 2 : index
    %c0_18 = arith.constant 0 : index
    %c0_19 = arith.constant 0 : index
    %15 = vector.load %arg2[%c2, %c0_18, %c0_19] : memref<9x128x128xbf16, #tpu.memory_space<vmem>>, vector<1x128x128xbf16>
    %16 = vector.shape_cast %15 : vector<1x128x128xbf16> to vector<128x128xbf16>
    %cst_20 = arith.constant dense<0.000000e+00> : vector<72x128xf32>
    %17 = tpu.matmul %14, %16, %cst_20 {dimension_numbers = #tpu.dot_dimension_numbers<[1], [0], [0], [1], [0, 0, 1, 1], [], []>} : vector<72x128xbf16>, vector<128x128xbf16>, vector<72x128xf32> -> vector<72x128xf32>
    %18 = arith.addf %12, %17 : vector<72x128xf32>
    %c2_21 = arith.constant 2 : index
    %c0_22 = arith.constant 0 : index
    %c0_23 = arith.constant 0 : index
    %c0_24 = arith.constant 0 : index
    %19 = vector.load %arg1[%c2_21, %c0_22, %c0_23, %c0_24] : memref<4x1x82x128xbf16, #tpu.memory_space<vmem>>, vector<1x1x72x128xbf16>
    %20 = vector.shape_cast %19 : vector<1x1x72x128xbf16> to vector<72x128xbf16>
    %c3 = arith.constant 3 : index
    %c0_25 = arith.constant 0 : index
    %c0_26 = arith.constant 0 : index
    %21 = vector.load %arg2[%c3, %c0_25, %c0_26] : memref<9x128x128xbf16, #tpu.memory_space<vmem>>, vector<1x128x128xbf16>
    %22 = vector.shape_cast %21 : vector<1x128x128xbf16> to vector<128x128xbf16>
    %cst_27 = arith.constant dense<0.000000e+00> : vector<72x128xf32>
    %23 = tpu.matmul %20, %22, %cst_27 {dimension_numbers = #tpu.dot_dimension_numbers<[1], [0], [0], [1], [0, 0, 1, 1], [], []>} : vector<72x128xbf16>, vector<128x128xbf16>, vector<72x128xf32> -> vector<72x128xf32>
    %24 = arith.addf %18, %23 : vector<72x128xf32>
    %c3_28 = arith.constant 3 : index
    %c0_29 = arith.constant 0 : index
    %c0_30 = arith.constant 0 : index
    %c0_31 = arith.constant 0 : index
    %25 = vector.load %arg1[%c3_28, %c0_29, %c0_30, %c0_31] : memref<4x1x82x128xbf16, #tpu.memory_space<vmem>>, vector<1x1x72x128xbf16>
    %26 = vector.shape_cast %25 : vector<1x1x72x128xbf16> to vector<72x128xbf16>
    %c4 = arith.constant 4 : index
    %c0_32 = arith.constant 0 : index
    %c0_33 = arith.constant 0 : index
    %27 = vector.load %arg2[%c4, %c0_32, %c0_33] : memref<9x128x128xbf16, #tpu.memory_space<vmem>>, vector<1x128x128xbf16>
    %28 = vector.shape_cast %27 : vector<1x128x128xbf16> to vector<128x128xbf16>
    %cst_34 = arith.constant dense<0.000000e+00> : vector<72x128xf32>
    %29 = tpu.matmul %26, %28, %cst_34 {dimension_numbers = #tpu.dot_dimension_numbers<[1], [0], [0], [1], [0, 0, 1, 1], [], []>} : vector<72x128xbf16>, vector<128x128xbf16>, vector<72x128xf32> -> vector<72x128xf32>
    %30 = arith.addf %24, %29 : vector<72x128xf32>
    %c2_35 = arith.constant 2 : index
    %c0_36 = arith.constant 0 : index
    %c1_37 = arith.constant 1 : index
    %c0_38 = arith.constant 0 : index
    %31 = vector.load %arg1[%c2_35, %c0_36, %c1_37, %c0_38] : memref<4x1x82x128xbf16, #tpu.memory_space<vmem>>, vector<1x1x72x128xbf16>
    %32 = vector.shape_cast %31 : vector<1x1x72x128xbf16> to vector<72x128xbf16>
    %c5 = arith.constant 5 : index
    %c0_39 = arith.constant 0 : index
    %c0_40 = arith.constant 0 : index
    %33 = vector.load %arg2[%c5, %c0_39, %c0_40] : memref<9x128x128xbf16, #tpu.memory_space<vmem>>, vector<1x128x128xbf16>
    %34 = vector.shape_cast %33 : vector<1x128x128xbf16> to vector<128x128xbf16>
    %cst_41 = arith.constant dense<0.000000e+00> : vector<72x128xf32>
    %35 = tpu.matmul %32, %34, %cst_41 {dimension_numbers = #tpu.dot_dimension_numbers<[1], [0], [0], [1], [0, 0, 1, 1], [], []>} : vector<72x128xbf16>, vector<128x128xbf16>, vector<72x128xf32> -> vector<72x128xf32>
    %36 = arith.addf %30, %35 : vector<72x128xf32>
    %c0_42 = arith.constant 0 : index
    %c0_43 = arith.constant 0 : index
    %c9 = arith.constant 9 : index
    %c0_44 = arith.constant 0 : index
    %37 = vector.load %arg1[%c0_42, %c0_43, %c9, %c0_44] : memref<4x1x82x128xbf16, #tpu.memory_space<vmem>>, vector<1x1x72x128xbf16>
    %38 = vector.shape_cast %37 : vector<1x1x72x128xbf16> to vector<72x128xbf16>
    %c6 = arith.constant 6 : index
    %c0_45 = arith.constant 0 : index
    %c0_46 = arith.constant 0 : index
    %39 = vector.load %arg2[%c6, %c0_45, %c0_46] : memref<9x128x128xbf16, #tpu.memory_space<vmem>>, vector<1x128x128xbf16>
    %40 = vector.shape_cast %39 : vector<1x128x128xbf16> to vector<128x128xbf16>
    %cst_47 = arith.constant dense<0.000000e+00> : vector<72x128xf32>
    %41 = tpu.matmul %38, %40, %cst_47 {dimension_numbers = #tpu.dot_dimension_numbers<[1], [0], [0], [1], [0, 0, 1, 1], [], []>} : vector<72x128xbf16>, vector<128x128xbf16>, vector<72x128xf32> -> vector<72x128xf32>
    %42 = arith.addf %36, %41 : vector<72x128xf32>
    %c1_48 = arith.constant 1 : index
    %c0_49 = arith.constant 0 : index
    %c9_50 = arith.constant 9 : index
    %c0_51 = arith.constant 0 : index
    %43 = vector.load %arg1[%c1_48, %c0_49, %c9_50, %c0_51] : memref<4x1x82x128xbf16, #tpu.memory_space<vmem>>, vector<1x1x72x128xbf16>
    %44 = vector.shape_cast %43 : vector<1x1x72x128xbf16> to vector<72x128xbf16>
    %c7 = arith.constant 7 : index
    %c0_52 = arith.constant 0 : index
    %c0_53 = arith.constant 0 : index
    %45 = vector.load %arg2[%c7, %c0_52, %c0_53] : memref<9x128x128xbf16, #tpu.memory_space<vmem>>, vector<1x128x128xbf16>
    %46 = vector.shape_cast %45 : vector<1x128x128xbf16> to vector<128x128xbf16>
    %cst_54 = arith.constant dense<0.000000e+00> : vector<72x128xf32>
    %47 = tpu.matmul %44, %46, %cst_54 {dimension_numbers = #tpu.dot_dimension_numbers<[1], [0], [0], [1], [0, 0, 1, 1], [], []>} : vector<72x128xbf16>, vector<128x128xbf16>, vector<72x128xf32> -> vector<72x128xf32>
    %48 = arith.addf %42, %47 : vector<72x128xf32>
    %c0_55 = arith.constant 0 : index
    %c0_56 = arith.constant 0 : index
    %c10 = arith.constant 10 : index
    %c0_57 = arith.constant 0 : index
    %49 = vector.load %arg1[%c0_55, %c0_56, %c10, %c0_57] : memref<4x1x82x128xbf16, #tpu.memory_space<vmem>>, vector<1x1x72x128xbf16>
    %50 = vector.shape_cast %49 : vector<1x1x72x128xbf16> to vector<72x128xbf16>
    %c8 = arith.constant 8 : index
    %c0_58 = arith.constant 0 : index
    %c0_59 = arith.constant 0 : index
    %51 = vector.load %arg2[%c8, %c0_58, %c0_59] : memref<9x128x128xbf16, #tpu.memory_space<vmem>>, vector<1x128x128xbf16>
    %52 = vector.shape_cast %51 : vector<1x128x128xbf16> to vector<128x128xbf16>
    %cst_60 = arith.constant dense<0.000000e+00> : vector<72x128xf32>
    %53 = tpu.matmul %50, %52, %cst_60 {dimension_numbers = #tpu.dot_dimension_numbers<[1], [0], [0], [1], [0, 0, 1, 1], [], []>} : vector<72x128xbf16>, vector<128x128xbf16>, vector<72x128xf32> -> vector<72x128xf32>
    %54 = arith.addf %48, %53 : vector<72x128xf32>
    %c0_61 = arith.constant 0 : index
    %c0_62 = arith.constant 0 : index
    %55 = vector.load %arg3[%c0_61, %c0_62] : memref<1x128xf32, #tpu.memory_space<vmem>>, vector<1x128xf32>
    %56 = vector.broadcast %55 : vector<1x128xf32> to vector<72x128xf32>
    %57 = arith.mulf %54, %56 : vector<72x128xf32>
    %c0_63 = arith.constant 0 : index
    %c0_64 = arith.constant 0 : index
    %58 = vector.load %arg4[%c0_63, %c0_64] : memref<1x128xf32, #tpu.memory_space<vmem>>, vector<1x128xf32>
    %59 = vector.broadcast %58 : vector<1x128xf32> to vector<72x128xf32>
    %60 = arith.addf %57, %59 : vector<72x128xf32>
    %61 = arith.truncf %60 : vector<72x128xf32> to vector<72x128xbf16>
    %c0_65 = arith.constant 0 : index
    %c0_66 = arith.constant 0 : index
    %c0_67 = arith.constant 0 : index
    %62 = vector.load %arg5[%c0_65, %c0_66, %c0_67] : memref<1x72x128xbf16, #tpu.memory_space<vmem>>, vector<1x72x128xbf16>
    %63 = vector.shape_cast %62 : vector<1x72x128xbf16> to vector<72x128xbf16>
    %64 = vector.shape_cast %61 : vector<72x128xbf16> to vector<1x72x128xbf16>
    tpu.vector_store %arg5[%c0_65, %c0_66, %c0_67], %64 {strides = array<i32>} : memref<1x72x128xbf16, #tpu.memory_space<vmem>>, vector<1x72x128xbf16>,
    return
  }
  func.func @transform_0(%arg0: i32) -> (i32, i32, i32, i32) {
    %c0_i32 = arith.constant 0 : i32
    %c0_i32_0 = arith.constant 0 : i32
    %c0_i32_1 = arith.constant 0 : i32
    %c0_i32_2 = arith.constant 0 : i32
    return %c0_i32, %arg0, %c0_i32_0, %c0_i32_1 : i32, i32, i32, i32
  }
  func.func @transform_1(%arg0: i32) -> (i32, i32, i32) {
    %c0_i32 = arith.constant 0 : i32
    %c0_i32_0 = arith.constant 0 : i32
    %c0_i32_1 = arith.constant 0 : i32
    %c0_i32_2 = arith.constant 0 : i32
    return %c0_i32, %c0_i32_0, %c0_i32_1 : i32, i32, i32
  }
  func.func @transform_2(%arg0: i32) -> (i32, i32) {
    %c0_i32 = arith.constant 0 : i32
    %c0_i32_0 = arith.constant 0 : i32
    %c0_i32_1 = arith.constant 0 : i32
    return %c0_i32, %c0_i32_0 : i32, i32
  }
  func.func @transform_3(%arg0: i32) -> (i32, i32) {
    %c0_i32 = arith.constant 0 : i32
    %c0_i32_0 = arith.constant 0 : i32
    %c0_i32_1 = arith.constant 0 : i32
    return %c0_i32, %c0_i32_0 : i32, i32
  }
  func.func @transform_4(%arg0: i32) -> (i32, i32, i32) {
    %c0_i32 = arith.constant 0 : i32
    %c0_i32_0 = arith.constant 0 : i32
    %c0_i32_1 = arith.constant 0 : i32
    return %arg0, %c0_i32, %c0_i32_0 : i32, i32, i32
  }
}

module attributes {stable_mosaic.version = 11 : i64} {
  func.func @_mm_kernel(%arg0: i32, %arg1: memref<64x128xbf16, #tpu.memory_space<vmem>>, %arg2: memref<128x128xbf16, #tpu.memory_space<vmem>>, %arg3: memref<1x128xf32, #tpu.memory_space<vmem>>, %arg4: memref<1x128xf32, #tpu.memory_space<vmem>>, %arg5: memref<64x128xbf16, #tpu.memory_space<vmem>>) attributes {dimension_semantics = [#tpu.dimension_semantics<parallel>], iteration_bounds = array<i64: 2>, scalar_prefetch = 0 : i64, scratch_operands = 0 : i64, tpu.core_type = #tpu.core_type<tc>, window_params = [{transform_indices = @transform_0, window_bounds = array<i64: 64, 128>}, {pipeline_mode = #tpu.pipeline_mode<synchronous>, transform_indices = @transform_1, window_bounds = array<i64: 128, 128>}, {pipeline_mode = #tpu.pipeline_mode<synchronous>, transform_indices = @transform_2, window_bounds = array<i64: 1, 128>}, {pipeline_mode = #tpu.pipeline_mode<synchronous>, transform_indices = @transform_3, window_bounds = array<i64: 1, 128>}, {transform_indices = @transform_4, window_bounds = array<i64: 64, 128>}]} {
    %c0 = arith.constant 0 : index
    %c0_0 = arith.constant 0 : index
    %0 = vector.load %arg1[%c0, %c0_0] : memref<64x128xbf16, #tpu.memory_space<vmem>>, vector<64x128xbf16>
    %c0_1 = arith.constant 0 : index
    %c0_2 = arith.constant 0 : index
    %1 = vector.load %arg2[%c0_1, %c0_2] : memref<128x128xbf16, #tpu.memory_space<vmem>>, vector<128x128xbf16>
    %cst = arith.constant dense<0.000000e+00> : vector<64x128xf32>
    %2 = tpu.matmul %0, %1, %cst {dimension_numbers = #tpu.dot_dimension_numbers<[1], [0], [0], [1], [0, 0, 1, 1], [], []>} : vector<64x128xbf16>, vector<128x128xbf16>, vector<64x128xf32> -> vector<64x128xf32>
    %c0_3 = arith.constant 0 : index
    %c0_4 = arith.constant 0 : index
    %3 = vector.load %arg3[%c0_3, %c0_4] : memref<1x128xf32, #tpu.memory_space<vmem>>, vector<1x128xf32>
    %4 = vector.broadcast %3 : vector<1x128xf32> to vector<64x128xf32>
    %5 = arith.mulf %2, %4 : vector<64x128xf32>
    %c0_5 = arith.constant 0 : index
    %c0_6 = arith.constant 0 : index
    %6 = vector.load %arg4[%c0_5, %c0_6] : memref<1x128xf32, #tpu.memory_space<vmem>>, vector<1x128xf32>
    %7 = vector.broadcast %6 : vector<1x128xf32> to vector<64x128xf32>
    %8 = arith.addf %5, %7 : vector<64x128xf32>
    %cst_7 = arith.constant 0.000000e+00 : f32
    %9 = vector.broadcast %cst_7 : f32 to vector<64x128xf32>
    %10 = arith.maximumf %8, %9 : vector<64x128xf32>
    %11 = arith.truncf %10 : vector<64x128xf32> to vector<64x128xbf16>
    %c0_8 = arith.constant 0 : index
    %c0_9 = arith.constant 0 : index
    %12 = vector.load %arg5[%c0_8, %c0_9] : memref<64x128xbf16, #tpu.memory_space<vmem>>, vector<64x128xbf16>
    tpu.vector_store %arg5[%c0_8, %c0_9], %11 {strides = array<i32>} : memref<64x128xbf16, #tpu.memory_space<vmem>>, vector<64x128xbf16>,
    return
  }
  func.func @transform_0(%arg0: i32) -> (i32, i32) {
    %c0_i32 = arith.constant 0 : i32
    %c0_i32_0 = arith.constant 0 : i32
    return %arg0, %c0_i32 : i32, i32
  }
  func.func @transform_1(%arg0: i32) -> (i32, i32) {
    %c0_i32 = arith.constant 0 : i32
    %c0_i32_0 = arith.constant 0 : i32
    %c0_i32_1 = arith.constant 0 : i32
    return %c0_i32, %c0_i32_0 : i32, i32
  }
  func.func @transform_2(%arg0: i32) -> (i32, i32) {
    %c0_i32 = arith.constant 0 : i32
    %c0_i32_0 = arith.constant 0 : i32
    %c0_i32_1 = arith.constant 0 : i32
    return %c0_i32, %c0_i32_0 : i32, i32
  }
  func.func @transform_3(%arg0: i32) -> (i32, i32) {
    %c0_i32 = arith.constant 0 : i32
    %c0_i32_0 = arith.constant 0 : i32
    %c0_i32_1 = arith.constant 0 : i32
    return %c0_i32, %c0_i32_0 : i32, i32
  }
  func.func @transform_4(%arg0: i32) -> (i32, i32) {
    %c0_i32 = arith.constant 0 : i32
    %c0_i32_0 = arith.constant 0 : i32
    return %arg0, %c0_i32 : i32, i32
  }
}

module attributes {stable_mosaic.version = 11 : i64} {
  func.func @_conv3x3_kernel(%arg0: i32, %arg1: memref<1x1x102x128xbf16, #tpu.memory_space<vmem>>, %arg2: memref<9x128x128xbf16, #tpu.memory_space<vmem>>, %arg3: memref<1x128xf32, #tpu.memory_space<vmem>>, %arg4: memref<1x128xf32, #tpu.memory_space<vmem>>, %arg5: memref<1x80x128xbf16, #tpu.memory_space<vmem>>) attributes {dimension_semantics = [#tpu.dimension_semantics<parallel>], iteration_bounds = array<i64: 2>, scalar_prefetch = 0 : i64, scratch_operands = 0 : i64, tpu.core_type = #tpu.core_type<tc>, window_params = [{transform_indices = @transform_0, window_bounds = array<i64: 1, 1, 102, 128>}, {pipeline_mode = #tpu.pipeline_mode<synchronous>, transform_indices = @transform_1, window_bounds = array<i64: 9, 128, 128>}, {pipeline_mode = #tpu.pipeline_mode<synchronous>, transform_indices = @transform_2, window_bounds = array<i64: 1, 128>}, {pipeline_mode = #tpu.pipeline_mode<synchronous>, transform_indices = @transform_3, window_bounds = array<i64: 1, 128>}, {transform_indices = @transform_4, window_bounds = array<i64: 1, 80, 128>}]} {
    %cst = arith.constant 0.000000e+00 : f32
    %0 = vector.broadcast %cst : f32 to vector<80x128xf32>
    %c0 = arith.constant 0 : index
    %c0_0 = arith.constant 0 : index
    %c0_1 = arith.constant 0 : index
    %c0_2 = arith.constant 0 : index
    %1 = vector.load %arg1[%c0, %c0_0, %c0_1, %c0_2] : memref<1x1x102x128xbf16, #tpu.memory_space<vmem>>, vector<1x1x80x128xbf16>
    %2 = vector.shape_cast %1 : vector<1x1x80x128xbf16> to vector<80x128xbf16>
    %c0_3 = arith.constant 0 : index
    %c0_4 = arith.constant 0 : index
    %c0_5 = arith.constant 0 : index
    %3 = vector.load %arg2[%c0_3, %c0_4, %c0_5] : memref<9x128x128xbf16, #tpu.memory_space<vmem>>, vector<1x128x128xbf16>
    %4 = vector.shape_cast %3 : vector<1x128x128xbf16> to vector<128x128xbf16>
    %cst_6 = arith.constant dense<0.000000e+00> : vector<80x128xf32>
    %5 = tpu.matmul %2, %4, %cst_6 {dimension_numbers = #tpu.dot_dimension_numbers<[1], [0], [0], [1], [0, 0, 1, 1], [], []>} : vector<80x128xbf16>, vector<128x128xbf16>, vector<80x128xf32> -> vector<80x128xf32>
    %6 = arith.addf %0, %5 : vector<80x128xf32>
    %c0_7 = arith.constant 0 : index
    %c0_8 = arith.constant 0 : index
    %c1 = arith.constant 1 : index
    %c0_9 = arith.constant 0 : index
    %7 = vector.load %arg1[%c0_7, %c0_8, %c1, %c0_9] : memref<1x1x102x128xbf16, #tpu.memory_space<vmem>>, vector<1x1x80x128xbf16>
    %8 = vector.shape_cast %7 : vector<1x1x80x128xbf16> to vector<80x128xbf16>
    %c1_10 = arith.constant 1 : index
    %c0_11 = arith.constant 0 : index
    %c0_12 = arith.constant 0 : index
    %9 = vector.load %arg2[%c1_10, %c0_11, %c0_12] : memref<9x128x128xbf16, #tpu.memory_space<vmem>>, vector<1x128x128xbf16>
    %10 = vector.shape_cast %9 : vector<1x128x128xbf16> to vector<128x128xbf16>
    %cst_13 = arith.constant dense<0.000000e+00> : vector<80x128xf32>
    %11 = tpu.matmul %8, %10, %cst_13 {dimension_numbers = #tpu.dot_dimension_numbers<[1], [0], [0], [1], [0, 0, 1, 1], [], []>} : vector<80x128xbf16>, vector<128x128xbf16>, vector<80x128xf32> -> vector<80x128xf32>
    %12 = arith.addf %6, %11 : vector<80x128xf32>
    %c0_14 = arith.constant 0 : index
    %c0_15 = arith.constant 0 : index
    %c2 = arith.constant 2 : index
    %c0_16 = arith.constant 0 : index
    %13 = vector.load %arg1[%c0_14, %c0_15, %c2, %c0_16] : memref<1x1x102x128xbf16, #tpu.memory_space<vmem>>, vector<1x1x80x128xbf16>
    %14 = vector.shape_cast %13 : vector<1x1x80x128xbf16> to vector<80x128xbf16>
    %c2_17 = arith.constant 2 : index
    %c0_18 = arith.constant 0 : index
    %c0_19 = arith.constant 0 : index
    %15 = vector.load %arg2[%c2_17, %c0_18, %c0_19] : memref<9x128x128xbf16, #tpu.memory_space<vmem>>, vector<1x128x128xbf16>
    %16 = vector.shape_cast %15 : vector<1x128x128xbf16> to vector<128x128xbf16>
    %cst_20 = arith.constant dense<0.000000e+00> : vector<80x128xf32>
    %17 = tpu.matmul %14, %16, %cst_20 {dimension_numbers = #tpu.dot_dimension_numbers<[1], [0], [0], [1], [0, 0, 1, 1], [], []>} : vector<80x128xbf16>, vector<128x128xbf16>, vector<80x128xf32> -> vector<80x128xf32>
    %18 = arith.addf %12, %17 : vector<80x128xf32>
    %c0_21 = arith.constant 0 : index
    %c0_22 = arith.constant 0 : index
    %c10 = arith.constant 10 : index
    %c0_23 = arith.constant 0 : index
    %19 = vector.load %arg1[%c0_21, %c0_22, %c10, %c0_23] : memref<1x1x102x128xbf16, #tpu.memory_space<vmem>>, vector<1x1x80x128xbf16>
    %20 = vector.shape_cast %19 : vector<1x1x80x128xbf16> to vector<80x128xbf16>
    %c3 = arith.constant 3 : index
    %c0_24 = arith.constant 0 : index
    %c0_25 = arith.constant 0 : index
    %21 = vector.load %arg2[%c3, %c0_24, %c0_25] : memref<9x128x128xbf16, #tpu.memory_space<vmem>>, vector<1x128x128xbf16>
    %22 = vector.shape_cast %21 : vector<1x128x128xbf16> to vector<128x128xbf16>
    %cst_26 = arith.constant dense<0.000000e+00> : vector<80x128xf32>
    %23 = tpu.matmul %20, %22, %cst_26 {dimension_numbers = #tpu.dot_dimension_numbers<[1], [0], [0], [1], [0, 0, 1, 1], [], []>} : vector<80x128xbf16>, vector<128x128xbf16>, vector<80x128xf32> -> vector<80x128xf32>
    %24 = arith.addf %18, %23 : vector<80x128xf32>
    %c0_27 = arith.constant 0 : index
    %c0_28 = arith.constant 0 : index
    %c11 = arith.constant 11 : index
    %c0_29 = arith.constant 0 : index
    %25 = vector.load %arg1[%c0_27, %c0_28, %c11, %c0_29] : memref<1x1x102x128xbf16, #tpu.memory_space<vmem>>, vector<1x1x80x128xbf16>
    %26 = vector.shape_cast %25 : vector<1x1x80x128xbf16> to vector<80x128xbf16>
    %c4 = arith.constant 4 : index
    %c0_30 = arith.constant 0 : index
    %c0_31 = arith.constant 0 : index
    %27 = vector.load %arg2[%c4, %c0_30, %c0_31] : memref<9x128x128xbf16, #tpu.memory_space<vmem>>, vector<1x128x128xbf16>
    %28 = vector.shape_cast %27 : vector<1x128x128xbf16> to vector<128x128xbf16>
    %cst_32 = arith.constant dense<0.000000e+00> : vector<80x128xf32>
    %29 = tpu.matmul %26, %28, %cst_32 {dimension_numbers = #tpu.dot_dimension_numbers<[1], [0], [0], [1], [0, 0, 1, 1], [], []>} : vector<80x128xbf16>, vector<128x128xbf16>, vector<80x128xf32> -> vector<80x128xf32>
    %30 = arith.addf %24, %29 : vector<80x128xf32>
    %c0_33 = arith.constant 0 : index
    %c0_34 = arith.constant 0 : index
    %c12 = arith.constant 12 : index
    %c0_35 = arith.constant 0 : index
    %31 = vector.load %arg1[%c0_33, %c0_34, %c12, %c0_35] : memref<1x1x102x128xbf16, #tpu.memory_space<vmem>>, vector<1x1x80x128xbf16>
    %32 = vector.shape_cast %31 : vector<1x1x80x128xbf16> to vector<80x128xbf16>
    %c5 = arith.constant 5 : index
    %c0_36 = arith.constant 0 : index
    %c0_37 = arith.constant 0 : index
    %33 = vector.load %arg2[%c5, %c0_36, %c0_37] : memref<9x128x128xbf16, #tpu.memory_space<vmem>>, vector<1x128x128xbf16>
    %34 = vector.shape_cast %33 : vector<1x128x128xbf16> to vector<128x128xbf16>
    %cst_38 = arith.constant dense<0.000000e+00> : vector<80x128xf32>
    %35 = tpu.matmul %32, %34, %cst_38 {dimension_numbers = #tpu.dot_dimension_numbers<[1], [0], [0], [1], [0, 0, 1, 1], [], []>} : vector<80x128xbf16>, vector<128x128xbf16>, vector<80x128xf32> -> vector<80x128xf32>
    %36 = arith.addf %30, %35 : vector<80x128xf32>
    %c0_39 = arith.constant 0 : index
    %c0_40 = arith.constant 0 : index
    %c20 = arith.constant 20 : index
    %c0_41 = arith.constant 0 : index
    %37 = vector.load %arg1[%c0_39, %c0_40, %c20, %c0_41] : memref<1x1x102x128xbf16, #tpu.memory_space<vmem>>, vector<1x1x80x128xbf16>
    %38 = vector.shape_cast %37 : vector<1x1x80x128xbf16> to vector<80x128xbf16>
    %c6 = arith.constant 6 : index
    %c0_42 = arith.constant 0 : index
    %c0_43 = arith.constant 0 : index
    %39 = vector.load %arg2[%c6, %c0_42, %c0_43] : memref<9x128x128xbf16, #tpu.memory_space<vmem>>, vector<1x128x128xbf16>
    %40 = vector.shape_cast %39 : vector<1x128x128xbf16> to vector<128x128xbf16>
    %cst_44 = arith.constant dense<0.000000e+00> : vector<80x128xf32>
    %41 = tpu.matmul %38, %40, %cst_44 {dimension_numbers = #tpu.dot_dimension_numbers<[1], [0], [0], [1], [0, 0, 1, 1], [], []>} : vector<80x128xbf16>, vector<128x128xbf16>, vector<80x128xf32> -> vector<80x128xf32>
    %42 = arith.addf %36, %41 : vector<80x128xf32>
    %c0_45 = arith.constant 0 : index
    %c0_46 = arith.constant 0 : index
    %c21 = arith.constant 21 : index
    %c0_47 = arith.constant 0 : index
    %43 = vector.load %arg1[%c0_45, %c0_46, %c21, %c0_47] : memref<1x1x102x128xbf16, #tpu.memory_space<vmem>>, vector<1x1x80x128xbf16>
    %44 = vector.shape_cast %43 : vector<1x1x80x128xbf16> to vector<80x128xbf16>
    %c7 = arith.constant 7 : index
    %c0_48 = arith.constant 0 : index
    %c0_49 = arith.constant 0 : index
    %45 = vector.load %arg2[%c7, %c0_48, %c0_49] : memref<9x128x128xbf16, #tpu.memory_space<vmem>>, vector<1x128x128xbf16>
    %46 = vector.shape_cast %45 : vector<1x128x128xbf16> to vector<128x128xbf16>
    %cst_50 = arith.constant dense<0.000000e+00> : vector<80x128xf32>
    %47 = tpu.matmul %44, %46, %cst_50 {dimension_numbers = #tpu.dot_dimension_numbers<[1], [0], [0], [1], [0, 0, 1, 1], [], []>} : vector<80x128xbf16>, vector<128x128xbf16>, vector<80x128xf32> -> vector<80x128xf32>
    %48 = arith.addf %42, %47 : vector<80x128xf32>
    %c0_51 = arith.constant 0 : index
    %c0_52 = arith.constant 0 : index
    %c22 = arith.constant 22 : index
    %c0_53 = arith.constant 0 : index
    %49 = vector.load %arg1[%c0_51, %c0_52, %c22, %c0_53] : memref<1x1x102x128xbf16, #tpu.memory_space<vmem>>, vector<1x1x80x128xbf16>
    %50 = vector.shape_cast %49 : vector<1x1x80x128xbf16> to vector<80x128xbf16>
    %c8 = arith.constant 8 : index
    %c0_54 = arith.constant 0 : index
    %c0_55 = arith.constant 0 : index
    %51 = vector.load %arg2[%c8, %c0_54, %c0_55] : memref<9x128x128xbf16, #tpu.memory_space<vmem>>, vector<1x128x128xbf16>
    %52 = vector.shape_cast %51 : vector<1x128x128xbf16> to vector<128x128xbf16>
    %cst_56 = arith.constant dense<0.000000e+00> : vector<80x128xf32>
    %53 = tpu.matmul %50, %52, %cst_56 {dimension_numbers = #tpu.dot_dimension_numbers<[1], [0], [0], [1], [0, 0, 1, 1], [], []>} : vector<80x128xbf16>, vector<128x128xbf16>, vector<80x128xf32> -> vector<80x128xf32>
    %54 = arith.addf %48, %53 : vector<80x128xf32>
    %c0_57 = arith.constant 0 : index
    %c0_58 = arith.constant 0 : index
    %55 = vector.load %arg3[%c0_57, %c0_58] : memref<1x128xf32, #tpu.memory_space<vmem>>, vector<1x128xf32>
    %56 = vector.broadcast %55 : vector<1x128xf32> to vector<80x128xf32>
    %57 = arith.mulf %54, %56 : vector<80x128xf32>
    %c0_59 = arith.constant 0 : index
    %c0_60 = arith.constant 0 : index
    %58 = vector.load %arg4[%c0_59, %c0_60] : memref<1x128xf32, #tpu.memory_space<vmem>>, vector<1x128xf32>
    %59 = vector.broadcast %58 : vector<1x128xf32> to vector<80x128xf32>
    %60 = arith.addf %57, %59 : vector<80x128xf32>
    %cst_61 = arith.constant 0.000000e+00 : f32
    %61 = vector.broadcast %cst_61 : f32 to vector<80x128xf32>
    %62 = arith.maximumf %60, %61 : vector<80x128xf32>
    %63 = arith.truncf %62 : vector<80x128xf32> to vector<80x128xbf16>
    %c0_62 = arith.constant 0 : index
    %c0_63 = arith.constant 0 : index
    %c0_64 = arith.constant 0 : index
    %64 = vector.load %arg5[%c0_62, %c0_63, %c0_64] : memref<1x80x128xbf16, #tpu.memory_space<vmem>>, vector<1x80x128xbf16>
    %65 = vector.shape_cast %64 : vector<1x80x128xbf16> to vector<80x128xbf16>
    %66 = vector.shape_cast %63 : vector<80x128xbf16> to vector<1x80x128xbf16>
    tpu.vector_store %arg5[%c0_62, %c0_63, %c0_64], %66 {strides = array<i32>} : memref<1x80x128xbf16, #tpu.memory_space<vmem>>, vector<1x80x128xbf16>,
    return
  }
  func.func @transform_0(%arg0: i32) -> (i32, i32, i32, i32) {
    %c0_i32 = arith.constant 0 : i32
    %c0_i32_0 = arith.constant 0 : i32
    %c0_i32_1 = arith.constant 0 : i32
    %c0_i32_2 = arith.constant 0 : i32
    return %c0_i32, %arg0, %c0_i32_0, %c0_i32_1 : i32, i32, i32, i32
  }
  func.func @transform_1(%arg0: i32) -> (i32, i32, i32) {
    %c0_i32 = arith.constant 0 : i32
    %c0_i32_0 = arith.constant 0 : i32
    %c0_i32_1 = arith.constant 0 : i32
    %c0_i32_2 = arith.constant 0 : i32
    return %c0_i32, %c0_i32_0, %c0_i32_1 : i32, i32, i32
  }
  func.func @transform_2(%arg0: i32) -> (i32, i32) {
    %c0_i32 = arith.constant 0 : i32
    %c0_i32_0 = arith.constant 0 : i32
    %c0_i32_1 = arith.constant 0 : i32
    return %c0_i32, %c0_i32_0 : i32, i32
  }
  func.func @transform_3(%arg0: i32) -> (i32, i32) {
    %c0_i32 = arith.constant 0 : i32
    %c0_i32_0 = arith.constant 0 : i32
    %c0_i32_1 = arith.constant 0 : i32
    return %c0_i32, %c0_i32_0 : i32, i32
  }
  func.func @transform_4(%arg0: i32) -> (i32, i32, i32) {
    %c0_i32 = arith.constant 0 : i32
    %c0_i32_0 = arith.constant 0 : i32
    %c0_i32_1 = arith.constant 0 : i32
    return %arg0, %c0_i32, %c0_i32_0 : i32, i32, i32
  }
}

module attributes {stable_mosaic.version = 11 : i64} {
  func.func @_mm_res_kernel(%arg0: i32, %arg1: memref<64x128xbf16, #tpu.memory_space<vmem>>, %arg2: memref<128x128xbf16, #tpu.memory_space<vmem>>, %arg3: memref<1x128xf32, #tpu.memory_space<vmem>>, %arg4: memref<1x128xf32, #tpu.memory_space<vmem>>, %arg5: memref<64x128xbf16, #tpu.memory_space<vmem>>, %arg6: memref<64x128xbf16, #tpu.memory_space<vmem>>) attributes {dimension_semantics = [#tpu.dimension_semantics<parallel>], iteration_bounds = array<i64: 2>, scalar_prefetch = 0 : i64, scratch_operands = 0 : i64, tpu.core_type = #tpu.core_type<tc>, window_params = [{transform_indices = @transform_0, window_bounds = array<i64: 64, 128>}, {pipeline_mode = #tpu.pipeline_mode<synchronous>, transform_indices = @transform_1, window_bounds = array<i64: 128, 128>}, {pipeline_mode = #tpu.pipeline_mode<synchronous>, transform_indices = @transform_2, window_bounds = array<i64: 1, 128>}, {pipeline_mode = #tpu.pipeline_mode<synchronous>, transform_indices = @transform_3, window_bounds = array<i64: 1, 128>}, {transform_indices = @transform_4, window_bounds = array<i64: 64, 128>}, {transform_indices = @transform_5, window_bounds = array<i64: 64, 128>}]} {
    %c0 = arith.constant 0 : index
    %c0_0 = arith.constant 0 : index
    %0 = vector.load %arg1[%c0, %c0_0] : memref<64x128xbf16, #tpu.memory_space<vmem>>, vector<64x128xbf16>
    %c0_1 = arith.constant 0 : index
    %c0_2 = arith.constant 0 : index
    %1 = vector.load %arg2[%c0_1, %c0_2] : memref<128x128xbf16, #tpu.memory_space<vmem>>, vector<128x128xbf16>
    %cst = arith.constant dense<0.000000e+00> : vector<64x128xf32>
    %2 = tpu.matmul %0, %1, %cst {dimension_numbers = #tpu.dot_dimension_numbers<[1], [0], [0], [1], [0, 0, 1, 1], [], []>} : vector<64x128xbf16>, vector<128x128xbf16>, vector<64x128xf32> -> vector<64x128xf32>
    %c0_3 = arith.constant 0 : index
    %c0_4 = arith.constant 0 : index
    %3 = vector.load %arg3[%c0_3, %c0_4] : memref<1x128xf32, #tpu.memory_space<vmem>>, vector<1x128xf32>
    %4 = vector.broadcast %3 : vector<1x128xf32> to vector<64x128xf32>
    %5 = arith.mulf %2, %4 : vector<64x128xf32>
    %c0_5 = arith.constant 0 : index
    %c0_6 = arith.constant 0 : index
    %6 = vector.load %arg4[%c0_5, %c0_6] : memref<1x128xf32, #tpu.memory_space<vmem>>, vector<1x128xf32>
    %7 = vector.broadcast %6 : vector<1x128xf32> to vector<64x128xf32>
    %8 = arith.addf %5, %7 : vector<64x128xf32>
    %c0_7 = arith.constant 0 : index
    %c0_8 = arith.constant 0 : index
    %9 = vector.load %arg5[%c0_7, %c0_8] : memref<64x128xbf16, #tpu.memory_space<vmem>>, vector<64x128xbf16>
    %10 = arith.extf %9 : vector<64x128xbf16> to vector<64x128xf32>
    %11 = arith.addf %8, %10 : vector<64x128xf32>
    %cst_9 = arith.constant 0.000000e+00 : f32
    %12 = vector.broadcast %cst_9 : f32 to vector<64x128xf32>
    %13 = arith.maximumf %11, %12 : vector<64x128xf32>
    %14 = arith.truncf %13 : vector<64x128xf32> to vector<64x128xbf16>
    %c0_10 = arith.constant 0 : index
    %c0_11 = arith.constant 0 : index
    %15 = vector.load %arg6[%c0_10, %c0_11] : memref<64x128xbf16, #tpu.memory_space<vmem>>, vector<64x128xbf16>
    tpu.vector_store %arg6[%c0_10, %c0_11], %14 {strides = array<i32>} : memref<64x128xbf16, #tpu.memory_space<vmem>>, vector<64x128xbf16>,
    return
  }
  func.func @transform_0(%arg0: i32) -> (i32, i32) {
    %c0_i32 = arith.constant 0 : i32
    %c0_i32_0 = arith.constant 0 : i32
    return %arg0, %c0_i32 : i32, i32
  }
  func.func @transform_1(%arg0: i32) -> (i32, i32) {
    %c0_i32 = arith.constant 0 : i32
    %c0_i32_0 = arith.constant 0 : i32
    %c0_i32_1 = arith.constant 0 : i32
    return %c0_i32, %c0_i32_0 : i32, i32
  }
  func.func @transform_2(%arg0: i32) -> (i32, i32) {
    %c0_i32 = arith.constant 0 : i32
    %c0_i32_0 = arith.constant 0 : i32
    %c0_i32_1 = arith.constant 0 : i32
    return %c0_i32, %c0_i32_0 : i32, i32
  }
  func.func @transform_3(%arg0: i32) -> (i32, i32) {
    %c0_i32 = arith.constant 0 : i32
    %c0_i32_0 = arith.constant 0 : i32
    %c0_i32_1 = arith.constant 0 : i32
    return %c0_i32, %c0_i32_0 : i32, i32
  }
  func.func @transform_4(%arg0: i32) -> (i32, i32) {
    %c0_i32 = arith.constant 0 : i32
    %c0_i32_0 = arith.constant 0 : i32
    return %arg0, %c0_i32 : i32, i32
  }
  func.func @transform_5(%arg0: i32) -> (i32, i32) {
    %c0_i32 = arith.constant 0 : i32
    %c0_i32_0 = arith.constant 0 : i32
    return %arg0, %c0_i32 : i32, i32
  }
}

module attributes {stable_mosaic.version = 11 : i64} {
  func.func @_mm_kernel(%arg0: i32, %arg1: memref<64x128xbf16, #tpu.memory_space<vmem>>, %arg2: memref<128x128xbf16, #tpu.memory_space<vmem>>, %arg3: memref<1x128xf32, #tpu.memory_space<vmem>>, %arg4: memref<1x128xf32, #tpu.memory_space<vmem>>, %arg5: memref<64x128xbf16, #tpu.memory_space<vmem>>) attributes {dimension_semantics = [#tpu.dimension_semantics<parallel>], iteration_bounds = array<i64: 2>, scalar_prefetch = 0 : i64, scratch_operands = 0 : i64, tpu.core_type = #tpu.core_type<tc>, window_params = [{transform_indices = @transform_0, window_bounds = array<i64: 64, 128>}, {pipeline_mode = #tpu.pipeline_mode<synchronous>, transform_indices = @transform_1, window_bounds = array<i64: 128, 128>}, {pipeline_mode = #tpu.pipeline_mode<synchronous>, transform_indices = @transform_2, window_bounds = array<i64: 1, 128>}, {pipeline_mode = #tpu.pipeline_mode<synchronous>, transform_indices = @transform_3, window_bounds = array<i64: 1, 128>}, {transform_indices = @transform_4, window_bounds = array<i64: 64, 128>}]} {
    %c0 = arith.constant 0 : index
    %c0_0 = arith.constant 0 : index
    %0 = vector.load %arg1[%c0, %c0_0] : memref<64x128xbf16, #tpu.memory_space<vmem>>, vector<64x128xbf16>
    %c0_1 = arith.constant 0 : index
    %c0_2 = arith.constant 0 : index
    %1 = vector.load %arg2[%c0_1, %c0_2] : memref<128x128xbf16, #tpu.memory_space<vmem>>, vector<128x128xbf16>
    %cst = arith.constant dense<0.000000e+00> : vector<64x128xf32>
    %2 = tpu.matmul %0, %1, %cst {dimension_numbers = #tpu.dot_dimension_numbers<[1], [0], [0], [1], [0, 0, 1, 1], [], []>} : vector<64x128xbf16>, vector<128x128xbf16>, vector<64x128xf32> -> vector<64x128xf32>
    %c0_3 = arith.constant 0 : index
    %c0_4 = arith.constant 0 : index
    %3 = vector.load %arg3[%c0_3, %c0_4] : memref<1x128xf32, #tpu.memory_space<vmem>>, vector<1x128xf32>
    %4 = vector.broadcast %3 : vector<1x128xf32> to vector<64x128xf32>
    %5 = arith.mulf %2, %4 : vector<64x128xf32>
    %c0_5 = arith.constant 0 : index
    %c0_6 = arith.constant 0 : index
    %6 = vector.load %arg4[%c0_5, %c0_6] : memref<1x128xf32, #tpu.memory_space<vmem>>, vector<1x128xf32>
    %7 = vector.broadcast %6 : vector<1x128xf32> to vector<64x128xf32>
    %8 = arith.addf %5, %7 : vector<64x128xf32>
    %9 = arith.truncf %8 : vector<64x128xf32> to vector<64x128xbf16>
    %c0_7 = arith.constant 0 : index
    %c0_8 = arith.constant 0 : index
    %10 = vector.load %arg5[%c0_7, %c0_8] : memref<64x128xbf16, #tpu.memory_space<vmem>>, vector<64x128xbf16>
    tpu.vector_store %arg5[%c0_7, %c0_8], %9 {strides = array<i32>} : memref<64x128xbf16, #tpu.memory_space<vmem>>, vector<64x128xbf16>,
    return
  }
  func.func @transform_0(%arg0: i32) -> (i32, i32) {
    %c0_i32 = arith.constant 0 : i32
    %c0_i32_0 = arith.constant 0 : i32
    return %arg0, %c0_i32 : i32, i32
  }
  func.func @transform_1(%arg0: i32) -> (i32, i32) {
    %c0_i32 = arith.constant 0 : i32
    %c0_i32_0 = arith.constant 0 : i32
    %c0_i32_1 = arith.constant 0 : i32
    return %c0_i32, %c0_i32_0 : i32, i32
  }
  func.func @transform_2(%arg0: i32) -> (i32, i32) {
    %c0_i32 = arith.constant 0 : i32
    %c0_i32_0 = arith.constant 0 : i32
    %c0_i32_1 = arith.constant 0 : i32
    return %c0_i32, %c0_i32_0 : i32, i32
  }
  func.func @transform_3(%arg0: i32) -> (i32, i32) {
    %c0_i32 = arith.constant 0 : i32
    %c0_i32_0 = arith.constant 0 : i32
    %c0_i32_1 = arith.constant 0 : i32
    return %c0_i32, %c0_i32_0 : i32, i32
  }
  func.func @transform_4(%arg0: i32) -> (i32, i32) {
    %c0_i32 = arith.constant 0 : i32
    %c0_i32_0 = arith.constant 0 : i32
    return %arg0, %c0_i32 : i32, i32
  }
}

</mosaic_0001>

<bundles_post_ra>
// kernel: res_down_forward.12
= control target key start
LH: loop header
LB: loop body
LE: loop exit
PB: predicated region body
PF: predicated region fallthrough
CT: control target
= control target key end

     0   :  { %s591_s15 = smov 0   ;;  %s645_s0 = inlined_call_operand.vmem [shape: bf16[128,128], index: 0, kind: input, shape index: {}]   ;;  %s646_s1 = inlined_call_operand.vmem [shape: bf16[128,128], index: 1, kind: input, shape index: {}]   ;;  %s647_s2 = inlined_call_operand.vmem [shape: f32[1,128], index: 2, kind: input, shape index: {}]   ;;  %s648_s3 = inlined_call_operand.vmem [shape: f32[1,128], index: 3, kind: input, shape index: {}]   ;;  %s649_s4 = inlined_call_operand.vmem [shape: bf16[128,128], index: 4, kind: output, shape index: {}]  }
   0x1 LB: > { %s430_s16 = sadd.s32 4294967295, %s564_s15   ;;  %p434_p0 = scmp.ge.s32.totalorder %s564_s15, 1  ;;  %s564_s15 = sphi %s591_s15, %s14_s15  }
   0x2   : > { %p163_p1 = scmp.lt.s32.totalorder %s564_s15, 3 }
   0x4   : > { %p164_p2 = pnand %p434_p0, %p163_p1 }
   0x5   : > { %s435_s25 = sshll.u32 (!%p164_p2), %s430_s16, 3 }
   0x6   : > { %167 = sbr.rel (%p164_p2) target bundleno = 194 (0xc2), region = 36  ;;  %p190_p3 = scmp.lt.s32.totalorder (!%p164_p2), %s435_s25, 15 }
   0xb   : > { %v500_v0 = vld [vmem:[%s646_s1 + $0x38] sm:$0xff]  ;;  %v499_v1 = vld [vmem:[%s646_s1 + $0x30] sm:$0xff]  ;;  %v498_v2 = vld [vmem:[%s646_s1 + $0x28] sm:$0xff]  ;;  %s651_s25 = smov (!%p190_p3, %s435_s25), 15 }
   0xc   : > { %297 = vmatpush.bf16.msra.mxu0 %v500_v0  ;;  %524 = vmatpush.bf16.msra.mxu1 %v500_v0  ;;  %v497_v3 = vld [vmem:[%s646_s1 + $0x20] sm:$0xff]  ;;  %v496_v4 = vld [vmem:[%s646_s1 + $0x18] sm:$0xff]  ;;  %v495_v5 = vld [vmem:[%s646_s1 + $0x10] sm:$0xff]  ;;  %s436_s6 = sshll.u32 %s651_s25, 2 }
   0xd   : > { %525 = vmatpush.bf16.msra.mxu2 %v500_v0  ;;  %526 = vmatpush.bf16.msra.mxu3 %v500_v0  ;;  %v494_v6 = vld [vmem:[%s646_s1 + $0x8] sm:$0xff]  ;;  %v493_v7 = vld [vmem:[%s646_s1] sm:$0xff]  ;;  %s193_s11 = scalar_lea.vmem %s645_s0, %s436_s6  ;;  %s199_s19 = scalar_lea.vmem %s649_s4, %s436_s6 }
   0xe   : > { %v489_v8 = vld [vmem:[%s193_s11] sm:$0xff]  ;;  %v490_v9 = vld [vmem:[%s193_s11 + $0x8] sm:$0xff]  ;;  %v491_v10 = vld [vmem:[%s193_s11 + $0x10] sm:$0xff] }
   0xf   : > { %v492_v11 = vld [vmem:[%s193_s11 + $0x18] sm:$0xff]  ;;  %v556_v14 = vld [vmem:[%s647_s2] ss:$0 sm:$0xff] }
  0x10   : > { %298 = vmatpush.bf16.msra.mxu0 %v499_v1  ;;  %527 = vmatpush.bf16.msra.mxu1 %v499_v1  ;;  %v557_v16 = vld [vmem:[%s648_s3] ss:$0 sm:$0xff] }
  0x11   : > { %528 = vmatpush.bf16.msra.mxu2 %v499_v1  ;;  %529 = vmatpush.bf16.msra.mxu3 %v499_v1 }
  0x14   : > { %299 = vmatpush.bf16.msra.mxu0 %v498_v2  ;;  %530 = vmatpush.bf16.msra.mxu1 %v498_v2 }
  0x15   : > { %531 = vmatpush.bf16.msra.mxu2 %v498_v2  ;;  %532 = vmatpush.bf16.msra.mxu3 %v498_v2 }
  0x18   : > { %300 = vmatpush.bf16.msra.mxu0 %v497_v3  ;;  %533 = vmatpush.bf16.msra.mxu1 %v497_v3 }
  0x19   : > { %534 = vmatpush.bf16.msra.mxu2 %v497_v3  ;;  %535 = vmatpush.bf16.msra.mxu3 %v497_v3 }
  0x1c   : > { %301 = vmatpush.bf16.msra.mxu0 %v496_v4  ;;  %536 = vmatpush.bf16.msra.mxu1 %v496_v4 }
  0x1d   : > { %537 = vmatpush.bf16.msra.mxu2 %v496_v4  ;;  %538 = vmatpush.bf16.msra.mxu3 %v496_v4 }
  0x20   : > { %302 = vmatpush.bf16.msra.mxu0 %v495_v5  ;;  %539 = vmatpush.bf16.msra.mxu1 %v495_v5 }
  0x21   : > { %540 = vmatpush.bf16.msra.mxu2 %v495_v5  ;;  %541 = vmatpush.bf16.msra.mxu3 %v495_v5 }
  0x24   : > { %303 = vmatpush.bf16.msra.mxu0 %v494_v6  ;;  %542 = vmatpush.bf16.msra.mxu1 %v494_v6 }
  0x25   : > { %543 = vmatpush.bf16.msra.mxu2 %v494_v6  ;;  %544 = vmatpush.bf16.msra.mxu3 %v494_v6 }
  0x28   : > { %304 = vmatpush.bf16.msra.mxu0 %v493_v7  ;;  %545 = vmatpush.bf16.msra.mxu1 %v493_v7 }
  0x29   : > { %546 = vmatpush.bf16.msra.mxu2 %v493_v7  ;;  %547 = vmatpush.bf16.msra.mxu3 %v493_v7 }
  0x2b   : > { %305 = vmatmul.bf16.vlgmr.msra.gmra.mxu0 %v489_v8  ;;  %310 = vmatmul.bf16.vlgmr.msra.gmra.mxu1 %v490_v9 }
  0x2c   : > { %315 = vmatmul.bf16.vlgmr.msra.gmra.mxu2 %v491_v10  ;;  %320 = vmatmul.bf16.vlgmr.msra.gmra.mxu3 %v492_v11 }
  0xa8   : > { %v306_v12 = vpop.f32.mrf.mxu0  ;;  %v311_v13 = vpop.f32.mrf.mxu1 }
  0xa9   : > { %v330_v15 = vmul.f32 %v556_v14, %v306_v12  ;;  %v332_v17 = vmul.f32 %v556_v14, %v311_v13 }
  0xab   : > { %v342_v22 = vadd.f32 %v557_v16, %v330_v15  ;;  %v344_v23 = vadd.f32 %v557_v16, %v332_v17 }
  0xad   : > { %v350_v30 = vmax.f32 %v342_v22, 0.0  ;;  %v352_v31 = vmax.f32 %v344_v23, 0.0 }
  0xaf   : > { %v316_v18 = vpop.f32.mrf.mxu2  ;;  %v321_v19 = vpop.f32.mrf.mxu3 }
  0xb0   : > { %v308_v20 = vpop.f32.mrf.mxu0  ;;  %v313_v21 = vpop.f32.mrf.mxu1  ;;  %v334_v28 = vmul.f32 %v556_v14, %v316_v18  ;;  %v336_v29 = vmul.f32 %v556_v14, %v321_v19 }
  0xb1   : > { %v331_v24 = vmul.f32 %v556_v14, %v308_v20  ;;  %v333_v25 = vmul.f32 %v556_v14, %v313_v21 }
  0xb2   : > { %v346_v38 = vadd.f32 %v557_v16, %v334_v28  ;;  %v348_v39 = vadd.f32 %v557_v16, %v336_v29 }
  0xb3   : > { %v343_v26 = vadd.f32 %v557_v16, %v331_v24  ;;  %v345_v27 = vadd.f32 %v557_v16, %v333_v25 }
  0xb4   : > { %v354_v44 = vmax.f32 %v346_v38, 0.0  ;;  %v356_v45 = vmax.f32 %v348_v39, 0.0 }
  0xb5   : > { %v351_v32 = vmax.f32 %v343_v26, 0.0  ;;  %v353_v33 = vmax.f32 %v345_v27, 0.0 }
  0xb7   : > { %v504_v34 = vpack.c.bf16 %v351_v32, %v350_v30  ;;  %v509_v35 = vpack.c.bf16 %v353_v33, %v352_v31  ;;  %v318_v36 = vpop.f32.mrf.mxu2  ;;  %v323_v37 = vpop.f32.mrf.mxu3 }
  0xb8   : > { %v335_v40 = vmul.f32 %v556_v14, %v318_v36  ;;  %v337_v41 = vmul.f32 %v556_v14, %v323_v37 }
  0xb9   : > { %505 = vst [vmem:[%s199_s19] sm:$0xff] %v504_v34  }
  0xba   : > { %521 = vst [vmem:[%s199_s19 + $0x8] sm:$0xff] %v509_v35   ;;  %v347_v42 = vadd.f32 %v557_v16, %v335_v40  ;;  %v349_v43 = vadd.f32 %v557_v16, %v337_v41 }
  0xbc   : > { %v355_v46 = vmax.f32 %v347_v42, 0.0  ;;  %v357_v47 = vmax.f32 %v349_v43, 0.0 }
  0xbe   : > { %v514_v48 = vpack.c.bf16 %v355_v46, %v354_v44  ;;  %v519_v49 = vpack.c.bf16 %v357_v47, %v356_v45 }
  0xc0   : > { %522 = vst [vmem:[%s199_s19 + $0x10] sm:$0xff] %v514_v48  }
  0xc1   : > { %523 = vst [vmem:[%s199_s19 + $0x18] sm:$0xff] %v519_v49  }
  0xc2 PF: > { %s14_s15 = sadd.s32 1, %s564_s15  }
  0xc3   : > { %p11_p4 = scmp.ge.s32.totalorder %s14_s15, 4  }
  0xc5   :  { %13 = sbr.rel (!%p11_p4) target bundleno = 1 (0x1), region = 66 }

// kernel: res_down_forward.14
= control target key start
LH: loop header
LB: loop body
LE: loop exit
PB: predicated region body
PF: predicated region fallthrough
CT: control target
= control target key end

     0   :  { %s702_s18 = smov 0   ;;  %s757_s0 = inlined_call_operand.vmem [shape: bf16[128,128], index: 0, kind: input, shape index: {}]   ;;  %s758_s1 = inlined_call_operand.vmem [shape: bf16[128,128], index: 1, kind: input, shape index: {}]   ;;  %s759_s2 = inlined_call_operand.vmem [shape: f32[1,128], index: 2, kind: input, shape index: {}]   ;;  %s760_s3 = inlined_call_operand.vmem [shape: f32[1,128], index: 3, kind: input, shape index: {}]   ;;  %s761_s4 = inlined_call_operand.vmem [shape: bf16[128,128], index: 4, kind: input, shape index: {}]   ;;  %s762_s5 = inlined_call_operand.vmem [shape: bf16[128,128], index: 5, kind: output, shape index: {}]  }
   0x1 LB: > { %s515_s19 = sadd.s32 4294967295, %s670_s18   ;;  %p519_p0 = scmp.ge.s32.totalorder %s670_s18, 1  ;;  %s670_s18 = sphi %s702_s18, %s15_s18  }
   0x2   : > { %p199_p1 = scmp.lt.s32.totalorder %s670_s18, 3 }
   0x4   : > { %p200_p2 = pnand %p519_p0, %p199_p1 }
   0x5   : > { %s520_s28 = sshll.u32 (!%p200_p2), %s515_s19, 3 }
   0x6   : > { %203 = sbr.rel (%p200_p2) target bundleno = 196 (0xc4), region = 40  ;;  %p233_p3 = scmp.lt.s32.totalorder (!%p200_p2), %s520_s28, 15 }
   0xb   : > { %v587_v0 = vld [vmem:[%s758_s1 + $0x38] sm:$0xff]  ;;  %v586_v1 = vld [vmem:[%s758_s1 + $0x30] sm:$0xff]  ;;  %v585_v2 = vld [vmem:[%s758_s1 + $0x28] sm:$0xff]  ;;  %s764_s28 = smov (!%p233_p3, %s520_s28), 15 }
   0xc   : > { %346 = vmatpush.bf16.msra.mxu0 %v587_v0  ;;  %630 = vmatpush.bf16.msra.mxu1 %v587_v0  ;;  %v584_v3 = vld [vmem:[%s758_s1 + $0x20] sm:$0xff]  ;;  %v583_v4 = vld [vmem:[%s758_s1 + $0x18] sm:$0xff]  ;;  %v582_v5 = vld [vmem:[%s758_s1 + $0x10] sm:$0xff]  ;;  %s731_s10 = sshll.u32 %s764_s28, 2 }
   0xd   : > { %631 = vmatpush.bf16.msra.mxu2 %v587_v0  ;;  %632 = vmatpush.bf16.msra.mxu3 %v587_v0  ;;  %v581_v6 = vld [vmem:[%s758_s1 + $0x8] sm:$0xff]  ;;  %v580_v7 = vld [vmem:[%s758_s1] sm:$0xff]  ;;  %s236_s15 = scalar_lea.vmem %s757_s0, %s731_s10  ;;  %s242_s21 = scalar_lea.vmem %s761_s4, %s731_s10 }
   0xe   : > { %v576_v8 = vld [vmem:[%s236_s15] sm:$0xff]  ;;  %v577_v9 = vld [vmem:[%s236_s15 + $0x8] sm:$0xff]  ;;  %v578_v10 = vld [vmem:[%s236_s15 + $0x10] sm:$0xff]  ;;  %s248_s26 = scalar_lea.vmem %s762_s5, %s731_s10 }
   0xf   : > { %v579_v11 = vld [vmem:[%s236_s15 + $0x18] sm:$0xff]  ;;  %v662_v12 = vld [vmem:[%s759_s2] ss:$0 sm:$0xff]  ;;  %v624_v19 = vld [vmem:[%s242_s21 + $0x8] sm:$0xff]  }
  0x10   : > { %347 = vmatpush.bf16.msra.mxu0 %v586_v1  ;;  %633 = vmatpush.bf16.msra.mxu1 %v586_v1  ;;  %v663_v16 = vld [vmem:[%s760_s3] ss:$0 sm:$0xff]  ;;  %v594_v23 = vunpack.c.l.bf16 %v624_v19  ;;  %v595_v31 = vunpack.c.h.bf16 %v624_v19  ;;  %v625_v36 = vld [vmem:[%s242_s21 + $0x10] sm:$0xff]   ;;  %v626_v37 = vld [vmem:[%s242_s21 + $0x18] sm:$0xff]  }
  0x11   : > { %634 = vmatpush.bf16.msra.mxu2 %v586_v1  ;;  %635 = vmatpush.bf16.msra.mxu3 %v586_v1  ;;  %v589_v18 = vld [vmem:[%s242_s21] sm:$0xff]   ;;  %v598_v43 = vunpack.c.l.bf16 %v625_v36  ;;  %v602_v45 = vunpack.c.l.bf16 %v626_v37  ;;  %v599_v53 = vunpack.c.h.bf16 %v625_v36  ;;  %v603_v55 = vunpack.c.h.bf16 %v626_v37 }
  0x12   : > { %v590_v21 = vunpack.c.l.bf16 %v589_v18  ;;  %v591_v29 = vunpack.c.h.bf16 %v589_v18 }
  0x14   : > { %348 = vmatpush.bf16.msra.mxu0 %v585_v2  ;;  %636 = vmatpush.bf16.msra.mxu1 %v585_v2 }
  0x15   : > { %637 = vmatpush.bf16.msra.mxu2 %v585_v2  ;;  %638 = vmatpush.bf16.msra.mxu3 %v585_v2 }
  0x18   : > { %349 = vmatpush.bf16.msra.mxu0 %v584_v3  ;;  %639 = vmatpush.bf16.msra.mxu1 %v584_v3 }
  0x19   : > { %640 = vmatpush.bf16.msra.mxu2 %v584_v3  ;;  %641 = vmatpush.bf16.msra.mxu3 %v584_v3 }
  0x1c   : > { %350 = vmatpush.bf16.msra.mxu0 %v583_v4  ;;  %642 = vmatpush.bf16.msra.mxu1 %v583_v4 }
  0x1d   : > { %643 = vmatpush.bf16.msra.mxu2 %v583_v4  ;;  %644 = vmatpush.bf16.msra.mxu3 %v583_v4 }
  0x20   : > { %351 = vmatpush.bf16.msra.mxu0 %v582_v5  ;;  %645 = vmatpush.bf16.msra.mxu1 %v582_v5 }
  0x21   : > { %646 = vmatpush.bf16.msra.mxu2 %v582_v5  ;;  %647 = vmatpush.bf16.msra.mxu3 %v582_v5 }
  0x24   : > { %352 = vmatpush.bf16.msra.mxu0 %v581_v6  ;;  %648 = vmatpush.bf16.msra.mxu1 %v581_v6 }
  0x25   : > { %649 = vmatpush.bf16.msra.mxu2 %v581_v6  ;;  %650 = vmatpush.bf16.msra.mxu3 %v581_v6 }
  0x28   : > { %353 = vmatpush.bf16.msra.mxu0 %v580_v7  ;;  %651 = vmatpush.bf16.msra.mxu1 %v580_v7 }
  0x29   : > { %652 = vmatpush.bf16.msra.mxu2 %v580_v7  ;;  %653 = vmatpush.bf16.msra.mxu3 %v580_v7 }
  0x2b   : > { %354 = vmatmul.bf16.vlgmr.msra.gmra.mxu0 %v576_v8  ;;  %359 = vmatmul.bf16.vlgmr.msra.gmra.mxu1 %v577_v9 }
  0x2c   : > { %364 = vmatmul.bf16.vlgmr.msra.gmra.mxu2 %v578_v10  ;;  %369 = vmatmul.bf16.vlgmr.msra.gmra.mxu3 %v579_v11 }
  0xa8   : > { %v355_v13 = vpop.f32.mrf.mxu0  ;;  %v360_v14 = vpop.f32.mrf.mxu1 }
  0xa9   : > { %v379_v15 = vmul.f32 %v662_v12, %v355_v13  ;;  %v381_v17 = vmul.f32 %v662_v12, %v360_v14 }
  0xab   : > { %v391_v20 = vadd.f32 %v663_v16, %v379_v15  ;;  %v393_v22 = vadd.f32 %v663_v16, %v381_v17 }
  0xad   : > { %v415_v34 = vadd.f32 %v590_v21, %v391_v20  ;;  %v417_v35 = vadd.f32 %v594_v23, %v393_v22 }
  0xaf   : > { %v365_v24 = vpop.f32.mrf.mxu2  ;;  %v370_v25 = vpop.f32.mrf.mxu3  ;;  %v423_v46 = vmax.f32 %v415_v34, 0.0  ;;  %v425_v47 = vmax.f32 %v417_v35, 0.0 }
  0xb0   : > { %v357_v26 = vpop.f32.mrf.mxu0  ;;  %v362_v27 = vpop.f32.mrf.mxu1  ;;  %v383_v32 = vmul.f32 %v662_v12, %v365_v24  ;;  %v385_v33 = vmul.f32 %v662_v12, %v370_v25 }
  0xb1   : > { %v380_v28 = vmul.f32 %v662_v12, %v357_v26  ;;  %v382_v30 = vmul.f32 %v662_v12, %v362_v27 }
  0xb2   : > { %v395_v42 = vadd.f32 %v663_v16, %v383_v32  ;;  %v397_v44 = vadd.f32 %v663_v16, %v385_v33 }
  0xb3   : > { %v392_v38 = vadd.f32 %v663_v16, %v380_v28  ;;  %v394_v39 = vadd.f32 %v663_v16, %v382_v30 }
  0xb4   : > { %v419_v58 = vadd.f32 %v598_v43, %v395_v42  ;;  %v421_v59 = vadd.f32 %v602_v45, %v397_v44 }
  0xb5   : > { %v416_v40 = vadd.f32 %v591_v29, %v392_v38  ;;  %v418_v41 = vadd.f32 %v595_v31, %v394_v39 }
  0xb6   : > { %v427_v0 = vmax.f32 %v419_v58, 0.0  ;;  %v429_v1 = vmax.f32 %v421_v59, 0.0 }
  0xb7   : > { %v424_v48 = vmax.f32 %v416_v40, 0.0  ;;  %v426_v49 = vmax.f32 %v418_v41, 0.0  ;;  %v367_v50 = vpop.f32.mrf.mxu2  ;;  %v372_v51 = vpop.f32.mrf.mxu3 }
  0xb8   : > { %v384_v52 = vmul.f32 %v662_v12, %v367_v50  ;;  %v386_v54 = vmul.f32 %v662_v12, %v372_v51 }
  0xb9   : > { %v607_v56 = vpack.c.bf16 %v424_v48, %v423_v46  ;;  %v612_v57 = vpack.c.bf16 %v426_v49, %v425_v47 }
  0xba   : > { %v396_v60 = vadd.f32 %v663_v16, %v384_v52  ;;  %v398_v61 = vadd.f32 %v663_v16, %v386_v54 }
  0xbb   : > { %608 = vst [vmem:[%s248_s26] sm:$0xff] %v607_v56  }
  0xbc   : > { %627 = vst [vmem:[%s248_s26 + $0x8] sm:$0xff] %v612_v57   ;;  %v420_v62 = vadd.f32 %v599_v53, %v396_v60  ;;  %v422_v63 = vadd.f32 %v603_v55, %v398_v61 }
  0xbe   : > { %v428_v2 = vmax.f32 %v420_v62, 0.0  ;;  %v430_v3 = vmax.f32 %v422_v63, 0.0 }
  0xc0   : > { %v617_v4 = vpack.c.bf16 %v428_v2, %v427_v0  ;;  %v622_v5 = vpack.c.bf16 %v430_v3, %v429_v1 }
  0xc2   : > { %628 = vst [vmem:[%s248_s26 + $0x10] sm:$0xff] %v617_v4  }
  0xc3   : > { %629 = vst [vmem:[%s248_s26 + $0x18] sm:$0xff] %v622_v5  }
  0xc4 PF: > { %s15_s18 = sadd.s32 1, %s670_s18  }
  0xc5   : > { %p12_p4 = scmp.ge.s32.totalorder %s15_s18, 4  }
  0xc7   :  { %14 = sbr.rel (!%p12_p4) target bundleno = 1 (0x1), region = 73 }

// kernel: res_down_forward.11
= control target key start
LH: loop header
LB: loop body
LE: loop exit
PB: predicated region body
PF: predicated region fallthrough
CT: control target
= control target key end

     0   :  { %s2790_s15 = smov 0   ;;  %s2792_s16 = smov 0   ;;  %s3264_s0 = inlined_call_operand.vmem [shape: bf16[4,2,82,128], index: 0, kind: input, shape index: {}]   ;;  %s3265_s1 = inlined_call_operand.vmem [shape: bf16[9,128,128], index: 1, kind: input, shape index: {}]   ;;  %s3266_s2 = inlined_call_operand.vmem [shape: f32[1,128], index: 2, kind: input, shape index: {}]   ;;  %s3267_s3 = inlined_call_operand.vmem [shape: f32[1,128], index: 3, kind: input, shape index: {}]   ;;  %s3268_s4 = inlined_call_operand.vmem [shape: bf16[2,72,128], index: 4, kind: output, shape index: {}]  }
   0x1   :  { %s2794_s17 = smov 0  }
   0x2 LB: > { %s1950_s18 = sadd.s32 4294967295, %s2763_s17   ;;  %s2807_s19 = sadd.s32 1, %s2763_s17   ;;  %s2763_s17 = sphi %s2794_s17, %s3271_s17   ;;  %s2759_s16 = sphi %s2792_s16, %s3270_s16   ;;  %s2755_s15 = sphi %s2790_s15, %s3269_s15  }
   0x3   : > { %s18_s20 = ssub.s32 %s2763_s17, %s2807_s19  ;;  %s21_s21 = sadd.s32 1, %s2759_s16 }
   0x4   : > { %p19_p0 = scmp.eq.s32.totalorder %s18_s20, 0  ;;  %p28_p1 = scmp.ne.s32.totalorder %s2759_s16, %s2755_s15 }
   0x5   : > { %p29_p2 = scmp.eq.s32.totalorder %s2763_s17, 0  ;;  %p1953_p4 = scmp.ge.s32.totalorder %s2763_s17, 2 }
   0x6   : > { %s2816_s22 = scalar_select %p19_p0, %s2759_s16, %s21_s21  }
   0x7   : > { %p30_p3 = por %p29_p2, %p28_p1  ;;  %152 = sbr.rel (%p1953_p4) target bundleno = 41 (0x29), region = 28 }
   0xc   : > { %155 = sbr.rel (!%p30_p3) target bundleno = 41 (0x29), region = 32  ;;  %s157_s23 = sand.u32 (%p30_p3), 1, %s2759_s16  }
   0xd   : > { %s2709_s24 = smul.u32 (%p30_p3), 44, %s2763_s17 }
   0xe   : > { %s2708_s25 = smul.u32 (%p30_p3), 176, %s157_s23 }
   0xf   : > { %s2824_s28 = scalar_lea.vmem (%p30_p3), %s3264_s0, %s2709_s24 }
  0x10   : > { %v179_v0 = vld [vmem:[%s2824_s28] sm:$0xff] (%p30_p3)   ;;  %v183_v1 = vld [vmem:[%s2824_s28 + $0x8] sm:$0xff] (%p30_p3)   ;;  %v187_v2 = vld [vmem:[%s2824_s28 + $0x10] sm:$0xff] (%p30_p3)   ;;  %s2829_s29 = scalar_lea.vmem (%p30_p3), [#allocation2], %s2708_s25 }
  0x11   : > { %180 = vst [vmem:[%s2829_s29] sm:$0xff] %v179_v0   ;;  %v191_v3 = vld [vmem:[%s2824_s28 + $0x18] sm:$0xff]   ;;  %v195_v4 = vld [vmem:[%s2824_s28 + $0x20] sm:$0xff]   ;;  %v199_v5 = vld [vmem:[%s2824_s28 + $0x28] sm:$0xf] }
  0x12   : > { %184 = vst [vmem:[%s2829_s29 + $0x8] sm:$0xff] %v183_v1   ;;  %v201_v6 = vld [vmem:[%s2824_s28 + $0x58] sm:$0xff]   ;;  %v205_v7 = vld [vmem:[%s2824_s28 + $0x60] sm:$0xff]   ;;  %v209_v8 = vld [vmem:[%s2824_s28 + $0x68] sm:$0xff]  }
  0x13   : > { %188 = vst [vmem:[%s2829_s29 + $0x10] sm:$0xff] %v187_v2   ;;  %v213_v9 = vld [vmem:[%s2824_s28 + $0x70] sm:$0xff]   ;;  %v217_v10 = vld [vmem:[%s2824_s28 + $0x78] sm:$0xff]   ;;  %v221_v11 = vld [vmem:[%s2824_s28 + $0x80] sm:$0xf] }
  0x14   : > { %192 = vst [vmem:[%s2829_s29 + $0x18] sm:$0xff] %v191_v3   ;;  %v223_v12 = vld [vmem:[%s2824_s28 + $0xb0] sm:$0xff]   ;;  %v227_v13 = vld [vmem:[%s2824_s28 + $0xb8] sm:$0xff]   ;;  %v231_v14 = vld [vmem:[%s2824_s28 + $0xc0] sm:$0xff]  }
  0x15   : > { %196 = vst [vmem:[%s2829_s29 + $0x20] sm:$0xff] %v195_v4   ;;  %v235_v15 = vld [vmem:[%s2824_s28 + $0xc8] sm:$0xff]   ;;  %v239_v16 = vld [vmem:[%s2824_s28 + $0xd0] sm:$0xff]   ;;  %v243_v17 = vld [vmem:[%s2824_s28 + $0xd8] sm:$0xf] }
  0x16   : > { %200 = vst [vmem:[%s2829_s29 + $0x28] sm:$0xf] %v199_v5  ;;  %v245_v18 = vld [vmem:[%s2824_s28 + $0x108] sm:$0xff]   ;;  %v249_v19 = vld [vmem:[%s2824_s28 + $0x110] sm:$0xff]   ;;  %v253_v20 = vld [vmem:[%s2824_s28 + $0x118] sm:$0xff]  }
  0x17   : > { %202 = vst [vmem:[%s2829_s29 + $0x2c] sm:$0xff] %v201_v6   ;;  %v257_v21 = vld [vmem:[%s2824_s28 + $0x120] sm:$0xff]   ;;  %v261_v22 = vld [vmem:[%s2824_s28 + $0x128] sm:$0xff]   ;;  %v265_v23 = vld [vmem:[%s2824_s28 + $0x130] sm:$0xf] }
  0x18   : > { %206 = vst [vmem:[%s2829_s29 + $0x34] sm:$0xff] %v205_v7  }
  0x19   : > { %210 = vst [vmem:[%s2829_s29 + $0x3c] sm:$0xff] %v209_v8  }
  0x1a   : > { %214 = vst [vmem:[%s2829_s29 + $0x44] sm:$0xff] %v213_v9  }
  0x1b   : > { %218 = vst [vmem:[%s2829_s29 + $0x4c] sm:$0xff] %v217_v10  }
  0x1c   : > { %222 = vst [vmem:[%s2829_s29 + $0x54] sm:$0xf] %v221_v11 }
  0x1d   : > { %224 = vst [vmem:[%s2829_s29 + $0x58] sm:$0xff] %v223_v12  }
  0x1e   : > { %228 = vst [vmem:[%s2829_s29 + $0x60] sm:$0xff] %v227_v13  }
  0x1f   : > { %232 = vst [vmem:[%s2829_s29 + $0x68] sm:$0xff] %v231_v14  }
  0x20   : > { %236 = vst [vmem:[%s2829_s29 + $0x70] sm:$0xff] %v235_v15  }
  0x21   : > { %240 = vst [vmem:[%s2829_s29 + $0x78] sm:$0xff] %v239_v16  }
  0x22   : > { %244 = vst [vmem:[%s2829_s29 + $0x80] sm:$0xf] %v243_v17 }
  0x23   : > { %246 = vst [vmem:[%s2829_s29 + $0x84] sm:$0xff] %v245_v18  }
  0x24   : > { %250 = vst [vmem:[%s2829_s29 + $0x8c] sm:$0xff] %v249_v19  }
  0x25   : > { %254 = vst [vmem:[%s2829_s29 + $0x94] sm:$0xff] %v253_v20  }
  0x26   : > { %258 = vst [vmem:[%s2829_s29 + $0x9c] sm:$0xff] %v257_v21  }
  0x27   : > { %262 = vst [vmem:[%s2829_s29 + $0xa4] sm:$0xff] %v261_v22  }
  0x28   : > { %266 = vst [vmem:[%s2829_s29 + $0xac] sm:$0xf] %v265_v23 }
  0x29 PF: > { %p1955_p5 = scmp.ge.s32.totalorder %s2763_s17, 1  ;;  %p377_p6 = scmp.lt.s32.totalorder %s2763_s17, 3 }
  0x2b   : > { %p378_p7 = pnand %p1955_p5, %p377_p6 }
  0x2c   : > { %s384_s28 = sand.u32 (!%p378_p7), 1, %s2755_s15   ;;  %p409_p8 = scmp.lt.s32.totalorder (!%p378_p7), %s1950_s18, 1 }
  0x2d   : > { %381 = sbr.rel (%p378_p7) target bundleno = 406 (0x196), region = 73 }
  0x2e   : > { %s2710_s7 = smul.u32 (!%p378_p7), 176, %s384_s28 }
  0x30   : > { %s2918_s11 = scalar_lea.vmem (!%p378_p7), [#allocation2], %s2710_s7 }
  0x32   : > { %v2585_v24 = vld [vmem:[%s3265_s1 + $0x78] sm:$0xff]  ;;  %v2584_v25 = vld [vmem:[%s3265_s1 + $0x70] sm:$0xff]  ;;  %v2583_v28 = vld [vmem:[%s3265_s1 + $0x68] sm:$0xff]  ;;  %vm736_vm0 = vsmask.f32 7424  ;;  %vm1740_vm1 = vcmask 1046528  }
  0x33   : > { %542 = vmatpush.bf16.msra.mxu0 %v2585_v24  ;;  %2692 = vmatpush.bf16.msra.mxu1 %v2585_v24  ;;  %v2610_v26 = vld [vmem:[%s3265_s1 + $0xf8] sm:$0xff]  ;;  %v2609_v27 = vld [vmem:[%s3265_s1 + $0xf0] sm:$0xff]  ;;  %v2608_v29 = vld [vmem:[%s3265_s1 + $0xe8] sm:$0xff]  ;;  %s3273_s18 = smov (!%p409_p8, %s1950_s18), 1 }
  0x34   : > { %2693 = vmatpush.bf16.msra.mxu2 %v2585_v24  ;;  %974 = vmatpush.bf16.msra.mxu3 %v2610_v26  ;;  %v2582_v30 = vld [vmem:[%s3265_s1 + $0x60] sm:$0xff]  ;;  %v2581_v32 = vld [vmem:[%s3265_s1 + $0x58] sm:$0xff]  ;;  %v2580_v34 = vld [vmem:[%s3265_s1 + $0x50] sm:$0xff]  ;;  %s2711_s13 = smul.u32 36, %s3273_s18 }
  0x35   : > { %v2607_v31 = vld [vmem:[%s3265_s1 + $0xe0] sm:$0xff]  ;;  %v2606_v33 = vld [vmem:[%s3265_s1 + $0xd8] sm:$0xff]  ;;  %v2605_v35 = vld [vmem:[%s3265_s1 + $0xd0] sm:$0xff] }
  0x36   : > { %v2579_v36 = vld [vmem:[%s3265_s1 + $0x48] sm:$0xff]  ;;  %v2578_v39 = vld [vmem:[%s3265_s1 + $0x40] sm:$0xff]  ;;  %v2573_v41 = vld [vmem:[%s3265_s1 + $0x38] sm:$0xff]  ;;  %s3227_s20 = scalar_lea.vmem %s3268_s4, %s2711_s13 }
  0x37   : > { %543 = vmatpush.bf16.msra.mxu0 %v2584_v25  ;;  %2694 = vmatpush.bf16.msra.mxu1 %v2584_v25  ;;  %v1965_v37 = vld [vmem:[%s2918_s11 + $0x4c] sm:$0xf]  ;;  %v2576_v45 = vld [vmem:[%s2918_s11 + $0x3c] sm:$0xff]  ;;  %v2575_v0 = vld [vmem:[%s2918_s11 + $0x34] sm:$0xff] }
  0x38   : > { %2695 = vmatpush.bf16.msra.mxu2 %v2584_v25  ;;  %975 = vmatpush.bf16.msra.mxu3 %v2609_v27  ;;  %v2604_v38 = vld [vmem:[%s3265_s1 + $0xc8] sm:$0xff]  ;;  %v483_v40 = vunpack.c.l.b16 %v1965_v37  ;;  %v2598_v42 = vld [vmem:[%s3265_s1 + $0xb8] sm:$0xff]  ;;  %v2603_v47 = vld [vmem:[%s3265_s1 + $0xc0] sm:$0xff] }
  0x39   : > { %v2622_v43 = vld [vmem:[%s3265_s1 + $0x138] sm:$0xff]  ;;  %v2572_v48 = vld [vmem:[%s3265_s1 + $0x30] sm:$0xff]  ;;  %v2571_v53 = vld [vmem:[%s3265_s1 + $0x28] sm:$0xff] }
  0x3a   : > { %v2574_v44 = vld [vmem:[%s2918_s11 + $0x2c] sm:$0xff]  ;;  %v488_v46 = vpack.c.b16 %v483_v40, %v483_v40  ;;  %v2599_v52 = vld [vmem:[%s2918_s11 + $0x58] sm:$0xff]  ;;  %v2586_v63 = vld [vmem:[%s2918_s11] sm:$0xff] }
  0x3b   : > { %544 = vmatpush.bf16.msra.mxu0 %v2583_v28  ;;  %2696 = vmatpush.bf16.msra.mxu1 %v2583_v28  ;;  %v2660_v49 = vld [vmem:[%s3265_s1 + $0x1f8] sm:$0xff]  ;;  %v2597_v50 = vld [vmem:[%s3265_s1 + $0xb0] sm:$0xff]  ;;  %v2596_v55 = vld [vmem:[%s3265_s1 + $0xa8] sm:$0xff]  ;;  %v740_v6 = vshll.u32 %v2586_v63, 16  ;;  %v738_v12 = vshrl.u32 %v2586_v63, 16 }
  0x3c   : > { %2697 = vmatpush.bf16.msra.mxu2 %v2583_v28  ;;  %976 = vmatpush.bf16.msra.mxu3 %v2608_v29  ;;  %v2621_v51 = vld [vmem:[%s3265_s1 + $0x130] sm:$0xff]  ;;  %v2620_v56 = vld [vmem:[%s3265_s1 + $0x128] sm:$0xff]  ;;  %v2570_v57 = vld [vmem:[%s3265_s1 + $0x20] sm:$0xff] }
  0x3d   : > { %v2659_v54 = vld [vmem:[%s3265_s1 + $0x1f0] sm:$0xff]  ;;  %v2595_v58 = vld [vmem:[%s3265_s1 + $0xa0] sm:$0xff]  ;;  %v2569_v60 = vld [vmem:[%s3265_s1 + $0x18] sm:$0xff]  ;;  %v742_v13 = vrot.slane %v740_v6, 1 }
  0x3e   : > { %v2619_v59 = vld [vmem:[%s3265_s1 + $0x120] sm:$0xff]  ;;  %v2594_v61 = vld [vmem:[%s3265_s1 + $0x98] sm:$0xff]  ;;  %v2568_v2 = vld [vmem:[%s3265_s1 + $0x10] sm:$0xff] }
  0x3f   : > { %545 = vmatpush.bf16.msra.mxu0 %v2582_v30  ;;  %2698 = vmatpush.bf16.msra.mxu1 %v2582_v30  ;;  %v2618_v62 = vld [vmem:[%s3265_s1 + $0x118] sm:$0xff]  ;;  %v2593_v3 = vld [vmem:[%s3265_s1 + $0x90] sm:$0xff]  ;;  %v2658_v8 = vld [vmem:[%s3265_s1 + $0x1e8] sm:$0xff]  ;;  %v743_v17 = vor.u32 %v742_v13, %v738_v12 }
  0x40   : > { %2699 = vmatpush.bf16.msra.mxu2 %v2582_v30  ;;  %977 = vmatpush.bf16.msra.mxu3 %v2607_v31  ;;  %v2577_v1 = vld [vmem:[%s2918_s11 + $0x44] sm:$0xff]  ;;  %v2588_v30 = vld [vmem:[%s2918_s11 + $0x10] sm:$0xff] }
  0x41   : > { %v2617_v4 = vld [vmem:[%s3265_s1 + $0x110] sm:$0xff]  ;;  %v2997_v5 = vld [vmem:[%s2918_s11 + $0x8] sm:$0xff]  ;;  %v2566_v15 = vld [vmem:[%s3265_s1] sm:$0xff]  ;;  %v753_v37 = vshll.u32 %v2588_v30, 16 }
  0x42   : > { %v2600_v7 = vld [vmem:[%s2918_s11 + $0x60] sm:$0xff]  ;;  %v2567_v9 = vld [vmem:[%s3265_s1 + $0x8] sm:$0xff]  ;;  %v745_v14 = vshll.u32 %v2997_v5, 16  ;;  %v2647_v20 = vld [vmem:[%s3265_s1 + $0x1b8] sm:$0xff] }
  0x43   : > { %546 = vmatpush.bf16.msra.mxu0 %v2581_v32  ;;  %2700 = vmatpush.bf16.msra.mxu1 %v2581_v32  ;;  %v2592_v10 = vld [vmem:[%s3265_s1 + $0x88] sm:$0xff]  ;;  %v2591_v16 = vld [vmem:[%s3265_s1 + $0x80] sm:$0xff]  ;;  %v2635_v21 = vld [vmem:[%s3265_s1 + $0x178] sm:$0xff] }
  0x44   : > { %2701 = vmatpush.bf16.msra.mxu2 %v2581_v32  ;;  %978 = vmatpush.bf16.msra.mxu3 %v2606_v33  ;;  %v2616_v11 = vld [vmem:[%s3265_s1 + $0x108] sm:$0xff]  ;;  %v747_v18 = vrot.slane %v745_v14, 1  ;;  %v2615_v19 = vld [vmem:[%s3265_s1 + $0x100] sm:$0xff]  ;;  %v2668_v22 = vld [vmem:[%s3265_s1 + $0x238] sm:$0xff] }
  0x45   : > { %v2562_v24 = vld [vmem:[%s2918_s11] sm:$0xff]  ;;  %v2601_v31 = vld [vmem:[%s2918_s11 + $0x68] sm:$0xff]  ;;  %v2564_v63 = vld [vmem:[%s2918_s11 + $0x10] sm:$0xff] }
  0x46   : > { %v748_v23 = vsel %vm736_vm0, %v743_v17, %v747_v18  ;;  %v2611_v25 = vld [vmem:[%s2918_s11 + $0x84] sm:$0xff]  ;;  %v2649_v14 = vld [vmem:[%s2918_s11 + $0x38] sm:$0xff] }
  0x47   : > { %547 = vmatpush.bf16.msra.mxu0 %v2580_v34  ;;  %2702 = vmatpush.bf16.msra.mxu1 %v2580_v34  ;;  %v2646_v26 = vld [vmem:[%s3265_s1 + $0x1b0] sm:$0xff]  ;;  %v2657_v29 = vld [vmem:[%s3265_s1 + $0x1e0] sm:$0xff]  ;;  %v2645_v32 = vld [vmem:[%s3265_s1 + $0x1a8] sm:$0xff] }
  0x48   : > { %2703 = vmatpush.bf16.msra.mxu2 %v2580_v34  ;;  %979 = vmatpush.bf16.msra.mxu3 %v2605_v35  ;;  %v2634_v27 = vld [vmem:[%s3265_s1 + $0x170] sm:$0xff]  ;;  %v2633_v33 = vld [vmem:[%s3265_s1 + $0x168] sm:$0xff]  ;;  %v2656_v35 = vld [vmem:[%s3265_s1 + $0x1d8] sm:$0xff] }
  0x49   : > { %v2667_v28 = vld [vmem:[%s3265_s1 + $0x230] sm:$0xff]  ;;  %v2666_v34 = vld [vmem:[%s3265_s1 + $0x228] sm:$0xff]  ;;  %v2665_v40 = vld [vmem:[%s3265_s1 + $0x220] sm:$0xff] }
  0x4b   : > { %548 = vmatpush.bf16.msra.mxu0 %v2579_v36  ;;  %2704 = vmatpush.bf16.msra.mxu1 %v2579_v36 }
  0x4c   : > { %2705 = vmatpush.bf16.msra.mxu2 %v2579_v36  ;;  %980 = vmatpush.bf16.msra.mxu3 %v2604_v38  ;;  %v749_v36 = vshrl.u32 %v2997_v5, 16  ;;  %v2644_v38 = vld [vmem:[%s3265_s1 + $0x1a0] sm:$0xff] }
  0x4f   : > { %549 = vmatpush.bf16.msra.mxu0 %v2578_v39  ;;  %2706 = vmatpush.bf16.msra.mxu1 %v2578_v39 }
  0x50   : > { %2707 = vmatpush.bf16.msra.mxu2 %v2578_v39  ;;  %981 = vmatpush.bf16.msra.mxu3 %v2603_v47  ;;  %v2632_v39 = vld [vmem:[%s3265_s1 + $0x160] sm:$0xff] }
  0x51   : > { %v2612_v47 = vld [vmem:[%s2918_s11 + $0x8c] sm:$0xff] }
  0x52   : > { %550 = vmatmul.bf16.vlgmr.msra.gmra.mxu0 %v2574_v44  ;;  %560 = vmatmul.bf16.vlgmr.msra.gmra.mxu1 %v2576_v45  ;;  %v2631_v44 = vld [vmem:[%s3265_s1 + $0x158] sm:$0xff] }
  0x53   : > { %651 = vmatpush.bf16.msrb.mxu1 %v2573_v41  ;;  %1119 = vmatpush.bf16.msrb.mxu0 %v2622_v43  ;;  %v751_v41 = vor.u32 %v749_v36, %v747_v18  ;;  %v2643_v43 = vld [vmem:[%s3265_s1 + $0x198] sm:$0xff]  ;;  %v1597_v36 = vshrl.u32 %v2649_v14, 16 }
  0x54   : > { %829 = vmatpush.bf16.msrb.mxu2 %v2598_v42  ;;  %1677 = vmatpush.bf16.msrb.mxu3 %v2660_v49  ;;  %v755_v42 = vrot.slane %v753_v37, 1  ;;  %v2664_v49 = vld [vmem:[%s3265_s1 + $0x218] sm:$0xff] }
  0x55   : > { %570 = vmatmul.bf16.vlgmr.msra.gmra.mxu2 %v488_v46  ;;  %982 = vmatmul.bf16.vlgmr.msra.gmra.mxu3 %v2599_v52  ;;  %v2563_v46 = vld [vmem:[%s2918_s11 + $0x8] sm:$0xff]  ;;  %v2655_v52 = vld [vmem:[%s3265_s1 + $0x1d0] sm:$0xff] }
  0x56   : > { %v756_v45 = vsel %vm736_vm0, %v751_v41, %v755_v42  ;;  %v2623_v41 = vld [vmem:[%s2918_s11 + $0x58] sm:$0xff] }
  0x57   : > { %652 = vmatpush.bf16.msrb.mxu1 %v2572_v48  ;;  %1120 = vmatpush.bf16.msrb.mxu0 %v2621_v51  ;;  %v2642_v48 = vld [vmem:[%s3265_s1 + $0x190] sm:$0xff] }
  0x58   : > { %830 = vmatpush.bf16.msrb.mxu2 %v2597_v50  ;;  %1678 = vmatpush.bf16.msrb.mxu3 %v2659_v54  ;;  %v2589_v50 = vld [vmem:[%s2918_s11 + $0x18] sm:$0xff]  ;;  %v2602_v51 = vld [vmem:[%s2918_s11 + $0x70] sm:$0xff] }
  0x59   : > { %v2641_v54 = vld [vmem:[%s3265_s1 + $0x188] sm:$0xff]  ;;  %v765_v12 = vshrl.u32 %v2589_v50, 16 }
  0x5b   : > { %653 = vmatpush.bf16.msrb.mxu1 %v2571_v53  ;;  %1121 = vmatpush.bf16.msrb.mxu0 %v2620_v56  ;;  %v2630_v53 = vld [vmem:[%s3265_s1 + $0x150] sm:$0xff]  ;;  %v2654_v56 = vld [vmem:[%s3265_s1 + $0x1c8] sm:$0xff] }
  0x5c   : > { %831 = vmatpush.bf16.msrb.mxu2 %v2596_v55  ;;  %1679 = vmatpush.bf16.msrb.mxu3 %v2658_v8  ;;  %v2663_v55 = vld [vmem:[%s3265_s1 + $0x210] sm:$0xff]  ;;  %v2662_v8 = vld [vmem:[%s3265_s1 + $0x208] sm:$0xff] }
  0x5f   : > { %654 = vmatpush.bf16.msrb.mxu1 %v2570_v57  ;;  %1122 = vmatpush.bf16.msrb.mxu0 %v2619_v59  ;;  %v757_v57 = vshrl.u32 %v2588_v30, 16  ;;  %v422_v30 = vld [vmem:[%s2918_s11 + $0x20] sm:$0xf] }
  0x60   : > { %832 = vmatpush.bf16.msrb.mxu2 %v2595_v58  ;;  %1680 = vmatpush.bf16.msrb.mxu3 %v2657_v29  ;;  %v761_v58 = vshll.u32 %v2589_v50, 16  ;;  %v2738_v29 = vld [vmem:[%s2918_s11 + $0x4] sm:$0xf0] }
  0x61   : > { %v759_v59 = vor.u32 %v757_v57, %v755_v42  ;;  %v2651_v57 = vld [vmem:[%s2918_s11 + $0x48] sm:$0xff] }
  0x62   : > { %555 = vmatmul.bf16.gmra.mxu0 %v2575_v0  ;;  %565 = vmatmul.bf16.gmra.mxu1 %v2577_v1  ;;  %v2613_v0 = vld [vmem:[%s2918_s11 + $0x94] sm:$0xff]  ;;  %v2112_v1 = vld [vmem:[%s2918_s11 + $0x20] sm:$0xf] }
  0x63   : > { %655 = vmatpush.bf16.msrb.mxu1 %v2569_v60  ;;  %1123 = vmatpush.bf16.msrb.mxu0 %v2618_v62  ;;  %v763_v60 = vrot.slane %v761_v58, 1 }
  0x64   : > { %833 = vmatpush.bf16.msrb.mxu2 %v2594_v61  ;;  %1681 = vmatpush.bf16.msrb.mxu3 %v2656_v35  ;;  %v2154_v61 = vld [vmem:[%s2918_s11 + $0x78] sm:$0xf] }
  0x65   : > { %987 = vmatmul.bf16.gmra.mxu3 %v2600_v7  ;;  %v764_v62 = vsel %vm736_vm0, %v759_v59, %v763_v60  ;;  %v2640_v7 = vld [vmem:[%s3265_s1 + $0x180] sm:$0xff] }
  0x67   : > { %656 = vmatpush.bf16.msrb.mxu1 %v2568_v2  ;;  %1124 = vmatpush.bf16.msrb.mxu0 %v2617_v4  ;;  %v2590_v2 = vld [vmem:[%s2918_s11 + $0x20] sm:$0x10]  ;;  %v2629_v4 = vld [vmem:[%s3265_s1 + $0x148] sm:$0xff] }
  0x68   : > { %834 = vmatpush.bf16.msrb.mxu2 %v2593_v3  ;;  %1682 = vmatpush.bf16.msrb.mxu3 %v2655_v52  ;;  %v915_v3 = vunpack.c.l.b16 %v2154_v61  ;;  %v2113_v5 = vor.u32 %v2590_v2, %v2112_v1  ;;  %v1609_v1 = vshll.u32 %v2651_v57, 16 }
  0x6a   : > { %v920_v6 = vpack.c.b16 %v915_v3, %v915_v3  ;;  %v769_v13 = vshll.u32 %v2113_v5, 16 }
  0x6b   : > { %657 = vmatpush.bf16.msrb.mxu1 %v2567_v9  ;;  %1125 = vmatpush.bf16.msrb.mxu0 %v2616_v11  ;;  %v2653_v9 = vld [vmem:[%s3265_s1 + $0x1c0] sm:$0xff] }
  0x6c   : > { %835 = vmatpush.bf16.msrb.mxu2 %v2592_v10  ;;  %1683 = vmatpush.bf16.msrb.mxu3 %v2654_v56  ;;  %v2628_v10 = vld [vmem:[%s3265_s1 + $0x140] sm:$0xff]  ;;  %v771_v17 = vrot.slane %v769_v13, 1 }
  0x6d   : > { %v2648_v11 = vld [vmem:[%s2918_s11 + $0x30] sm:$0xff] }
  0x6e   : > { %v1586_v18 = vshrl.u32 %v2648_v11, 16 }
  0x6f   : > { %658 = vmatpush.bf16.msrb.mxu1 %v2566_v15  ;;  %1126 = vmatpush.bf16.msrb.mxu0 %v2615_v19  ;;  %v1588_v15 = vshll.u32 %v2648_v11, 16  ;;  %v2652_v11 = vld [vmem:[%s2918_s11 + $0x50] sm:$0x10] }
  0x70   : > { %836 = vmatpush.bf16.msrb.mxu2 %v2591_v16  ;;  %1684 = vmatpush.bf16.msrb.mxu3 %v2653_v9  ;;  %v767_v16 = vor.u32 %v765_v12, %v763_v60 }
  0x71   : > { %v1590_v19 = vrot.slane %v1588_v15, 1 }
  0x72   : > { %659 = vmatmul.bf16.vlgmr.msrb.gmra.mxu1 %v2562_v24  ;;  %1127 = vmatmul.bf16.vlgmr.msrb.gmra.mxu0 %v2611_v25  ;;  %v2661_v24 = vld [vmem:[%s3265_s1 + $0x200] sm:$0xff] }
  0x73   : > { %1305 = vmatpush.bf16.msra.mxu1 %v2635_v21  ;;  %1803 = vmatpush.bf16.msra.mxu0 %v2668_v22  ;;  %v772_v21 = vsel %vm736_vm0, %v767_v16, %v771_v17  ;;  %v2565_v22 = vld [vmem:[%s2918_s11 + $0x18] sm:$0xff]  ;;  %v1591_v25 = vor.u32 %v1590_v19, %v1586_v18 }
  0x74   : > { %1491 = vmatpush.bf16.msra.mxu2 %v2647_v20  ;;  %v1593_v20 = vshll.u32 %v2649_v14, 16 }
  0x75   : > { %837 = vmatmul.bf16.vlgmr.msrb.gmra.mxu2 %v748_v23  ;;  %992 = vmatmul.bf16.gmra.mxu3 %v2601_v31  ;;  %v2614_v23 = vld [vmem:[%s2918_s11 + $0x9c] sm:$0xff]  ;;  %v2227_v31 = vld [vmem:[%s2918_s11 + $0xa4] sm:$0xf] }
  0x76   : > { %v1060_v35 = vunpack.c.l.b16 %v2227_v31  ;;  %v2638_v31 = vld [vmem:[%s2918_s11 + $0x1c] sm:$0xff] }
  0x77   : > { %1306 = vmatpush.bf16.msra.mxu1 %v2634_v27  ;;  %1804 = vmatpush.bf16.msra.mxu0 %v2667_v28  ;;  %v1347_v28 = vld [vmem:[%s2918_s11 + $0x4] sm:$0xff]  }
  0x78   : > { %1492 = vmatpush.bf16.msra.mxu2 %v2646_v26  ;;  %v1595_v26 = vrot.slane %v1593_v20, 1  ;;  %v1400_v50 = vshrl.u32 %v1347_v28, 16 }
  0x7a   : > { %v1596_v27 = vsel %vm736_vm0, %v1591_v25, %v1595_v26  ;;  %v1599_v42 = vor.u32 %v1597_v36, %v1595_v26 }
  0x7b   : > { %1307 = vmatpush.bf16.msra.mxu1 %v2633_v33  ;;  %1805 = vmatpush.bf16.msra.mxu0 %v2666_v34  ;;  %v773_v33 = vshrl.u32 %v2113_v5, 16  ;;  %v592_v34 = vunpack.c.l.b16 %v422_v30 }
  0x7c   : > { %1493 = vmatpush.bf16.msra.mxu2 %v2645_v32  ;;  %v2650_v32 = vld [vmem:[%s2918_s11 + $0x40] sm:$0xff] }
  0x7d   : > { %v1601_v37 = vshll.u32 %v2650_v32, 16 }
  0x7f   : > { %1308 = vmatpush.bf16.msra.mxu1 %v2632_v39  ;;  %1806 = vmatpush.bf16.msra.mxu0 %v2665_v40  ;;  %v597_v39 = vpack.c.b16 %v592_v34, %v592_v34  ;;  %v1065_v40 = vpack.c.b16 %v1060_v35, %v1060_v35  ;;  %v1423_v35 = vshll.u32 %v2638_v31, 16 }
  0x80   : > { %1494 = vmatpush.bf16.msra.mxu2 %v2644_v38  ;;  %v775_v38 = vor.u32 %v773_v33, %v771_v17 }
  0x82   : > { %664 = vmatmul.bf16.gmra.mxu1 %v2563_v46  ;;  %1132 = vmatmul.bf16.gmra.mxu0 %v2612_v47  ;;  %v1402_v46 = vshll.u32 %v1347_v28, 16  ;;  %v2624_v47 = vld [vmem:[%s2918_s11 + $0x60] sm:$0xff] }
  0x83   : > { %1309 = vmatpush.bf16.msra.mxu1 %v2631_v44  ;;  %1807 = vmatpush.bf16.msra.mxu0 %v2664_v49  ;;  %v2739_v44 = vld [vmem:[%s2918_s11 + $0x4] sm:$0xe]  ;;  %v1225_v14 = vshrl.u32 %v2624_v47, 16 }
  0x84   : > { %1495 = vmatpush.bf16.msra.mxu2 %v2643_v43  ;;  %v1603_v43 = vrot.slane %v1601_v37, 1  ;;  %v2740_v56 = vor.u32 %v2739_v44, %v2738_v29 }
  0x85   : > { %842 = vmatmul.bf16.gmra.mxu2 %v756_v45  ;;  %997 = vmatmul.bf16.gmra.mxu3 %v2602_v51  ;;  %v2636_v45 = vld [vmem:[%s2918_s11 + $0xc] sm:$0xff]  ;;  %v1404_v51 = vrot.slane %v1402_v46, 1  ;;  %v1746_v46 = vrot.slane %v2638_v31, 1 }
  0x86   : > { %v1604_v49 = vsel %vm736_vm0, %v1599_v42, %v1603_v43  ;;  %v1407_v52 = vshll.u32 %v2636_v45, 16  ;;  %v1411_v12 = vshrl.u32 %v2636_v45, 16  ;;  %v1425_v42 = vrot.slane %v1423_v35, 1 }
  0x87   : > { %1310 = vmatpush.bf16.msra.mxu1 %v2630_v53  ;;  %1808 = vmatpush.bf16.msra.mxu0 %v2663_v55  ;;  %v1214_v53 = vshrl.u32 %v2623_v41, 16  ;;  %v1221_v55 = vshll.u32 %v2624_v47, 16  ;;  %v1405_v58 = vor.u32 %v1404_v51, %v1400_v50  ;;  %v2639_v50 = vld [vmem:[%s2918_s11 + $0x24] sm:$0x10] }
  0x88   : > { %1496 = vmatpush.bf16.msra.mxu2 %v2642_v48  ;;  %v1216_v48 = vshll.u32 %v2623_v41, 16  ;;  %v1409_v59 = vrot.slane %v1407_v52, 1 }
  0x89   : > { %v1223_v61 = vrot.slane %v1221_v55, 1 }
  0x8a   : > { %v1410_v2 = vsel %vm736_vm0, %v1405_v58, %v1409_v59  ;;  %v1413_v17 = vor.u32 %v1411_v12, %v1409_v59 }
  0x8b   : > { %1311 = vmatpush.bf16.msra.mxu1 %v2629_v4  ;;  %1809 = vmatpush.bf16.msra.mxu0 %v2662_v8  ;;  %v2625_v8 = vld [vmem:[%s2918_s11 + $0x68] sm:$0xff]  ;;  %v1227_v19 = vor.u32 %v1225_v14, %v1223_v61 }
  0x8c   : > { %1497 = vmatpush.bf16.msra.mxu2 %v2641_v54  ;;  %v1218_v54 = vrot.slane %v1216_v48, 1  ;;  %v1229_v15 = vshll.u32 %v2625_v8, 16 }
  0x8e   : > { %v1219_v60 = vor.u32 %v1218_v54, %v1214_v53  ;;  %v1231_v20 = vrot.slane %v1229_v15, 1 }
  0x8f   : > { %1312 = vmatpush.bf16.msra.mxu1 %v2628_v10  ;;  %1810 = vmatpush.bf16.msra.mxu0 %v2661_v24  ;;  %v2478_v10 = vld [vmem:[%s2918_s11 + $0x50] sm:$0xf] }
  0x90   : > { %1498 = vmatpush.bf16.msra.mxu2 %v2640_v7  ;;  %v1224_v3 = vsel %vm736_vm0, %v1219_v60, %v1223_v61  ;;  %v2637_v7 = vld [vmem:[%s2918_s11 + $0x14] sm:$0xff]  ;;  %v2479_v16 = vor.u32 %v2652_v11, %v2478_v10 }
  0x91   : > { %v1415_v13 = vshll.u32 %v2637_v7, 16  ;;  %v1419_v34 = vshrl.u32 %v2637_v7, 16 }
  0x92   : > { %669 = vmatmul.bf16.gmra.mxu1 %v2564_v63  ;;  %1137 = vmatmul.bf16.gmra.mxu0 %v2613_v0  ;;  %v1742_v63 = vrot.slane %v2636_v45, 1  ;;  %v1605_v0 = vshrl.u32 %v2650_v32, 16  ;;  %v2626_v32 = vld [vmem:[%s2918_s11 + $0x70] sm:$0xff]  ;;  %v1621_v51 = vshrl.u32 %v2479_v16, 16 }
  0x93   : > { %v1417_v18 = vrot.slane %v1415_v13, 1 }
  0x94   : > { %v1607_v5 = vor.u32 %v1605_v0, %v1603_v43 }
  0x95   : > { %847 = vmatmul.bf16.gmra.mxu2 %v764_v62  ;;  %1002 = vmatmul.bf16.gmra.mxu3 %v920_v6  ;;  %v1741_v62 = vrot.slane %v2740_v56, 1  ;;  %v1611_v6 = vrot.slane %v1609_v1, 1  ;;  %v1418_v24 = vsel %vm736_vm0, %v1413_v17, %v1417_v18  ;;  %v1421_v41 = vor.u32 %v1419_v34, %v1417_v18  ;;  %v2336_v56 = vld [vmem:[%s2918_s11 + $0x78] sm:$0xf] }
  0x97   : > { %v1743_v4 = vsel %vm1740_vm1, %v1741_v62, %v1742_v63  ;;  %v1612_v9 = vsel %vm736_vm0, %v1607_v5, %v1611_v6  ;;  %v1426_v47 = vsel %vm736_vm0, %v1421_v41, %v1425_v42  ;;  %v1427_v62 = vshrl.u32 %v2638_v31, 16 }
  0xa2   : > { %674 = vmatmul.bf16.gmra.mxu1 %v2565_v22  ;;  %1142 = vmatmul.bf16.gmra.mxu0 %v2614_v23  ;;  %v1613_v22 = vshrl.u32 %v2651_v57, 16  ;;  %v1617_v23 = vshll.u32 %v2479_v16, 16  ;;  %v2627_v57 = vld [vmem:[%s2918_s11 + $0x78] sm:$0x10] }
  0xa3   : > { %v2337_v61 = vor.u32 %v2627_v57, %v2336_v56 }
  0xa4   : > { %v1615_v29 = vor.u32 %v1613_v22, %v1611_v6  ;;  %v1619_v30 = vrot.slane %v1617_v23, 1 }
  0xa5   : > { %852 = vmatmul.bf16.gmra.mxu2 %v772_v21  ;;  %1685 = vmatmul.bf16.vlgmr.msrb.gmra.mxu3 %v1596_v27  ;;  %v1744_v21 = vrot.slane %v2637_v7, 1  ;;  %v1232_v27 = vsel %vm736_vm0, %v1227_v19, %v1231_v20 }
  0xa6   : > { %v1620_v33 = vsel %vm736_vm0, %v1615_v29, %v1619_v30  ;;  %v1623_v60 = vor.u32 %v1621_v51, %v1619_v30 }
  0xa7   : > { %v1745_v28 = vsel %vm1740_vm1, %v1742_v63, %v1744_v21  ;;  %v1747_v55 = vsel %vm1740_vm1, %v1744_v21, %v1746_v46 }
  0xb2   : > { %679 = vmatmul.bf16.gmra.mxu1 %v597_v39  ;;  %1147 = vmatmul.bf16.gmra.mxu0 %v1065_v40  ;;  %v1233_v39 = vshrl.u32 %v2625_v8, 16  ;;  %v1237_v40 = vshll.u32 %v2626_v32, 16 }
  0xb4   : > { %v1235_v44 = vor.u32 %v1233_v39, %v1231_v20  ;;  %v1239_v45 = vrot.slane %v1237_v40, 1 }
  0xb5   : > { %857 = vmatmul.bf16.gmra.mxu2 %v775_v38  ;;  %1690 = vmatmul.bf16.gmra.mxu3 %v1604_v49  ;;  %v2400_v49 = vld [vmem:[%s2918_s11 + $0x24] sm:$0xf] }
  0xb6   : > { %v1240_v54 = vsel %vm736_vm0, %v1235_v44, %v1239_v45  ;;  %v2401_v58 = vor.u32 %v2639_v50, %v2400_v49 }
  0xb8   : > { %v1431_v63 = vshll.u32 %v2401_v58, 16  ;;  %v1435_v23 = vshrl.u32 %v2401_v58, 16 }
  0xba   : > { %v1433_v5 = vrot.slane %v1431_v63, 1 }
  0xbc   : > { %v1437_v31 = vor.u32 %v1435_v23, %v1433_v5 }
  0xc2   : > { %1313 = vmatmul.bf16.vlgmr.msra.gmra.mxu1 %v1224_v3  ;;  %1811 = vmatmul.bf16.vlgmr.msra.gmra.mxu0 %v1743_v4  ;;  %v1245_v3 = vshll.u32 %v2337_v61, 16  ;;  %v1429_v4 = vor.u32 %v1427_v62, %v1425_v42 }
  0xc4   : > { %v1247_v8 = vrot.slane %v1245_v3, 1  ;;  %v1434_v10 = vsel %vm736_vm0, %v1429_v4, %v1433_v5 }
  0xc5   : > { %1499 = vmatmul.bf16.vlgmr.msra.gmra.mxu2 %v1410_v2  ;;  %1695 = vmatmul.bf16.gmra.mxu3 %v1612_v9  ;;  %v1241_v2 = vshrl.u32 %v2626_v32, 16  ;;  %v1748_v9 = vrot.slane %v2401_v58, 1 }
  0xc7   : > { %v1243_v7 = vor.u32 %v1241_v2, %v1239_v45  ;;  %v1749_v14 = vsel %vm1740_vm1, %v1746_v46, %v1748_v9 }
  0xc9   : > { %v1248_v13 = vsel %vm736_vm0, %v1243_v7, %v1247_v8 }
  0xcf   : > { %v3152_v25 = vpop.f32.mrf.mxu0  ;;  %v3154_v26 = vpop.f32.mrf.mxu1 }
  0xd2   : > { %1318 = vmatmul.bf16.gmra.mxu1 %v1232_v27  ;;  %1816 = vmatmul.bf16.gmra.mxu0 %v1745_v28  ;;  %v1249_v28 = vshrl.u32 %v2337_v61, 16 }
  0xd5   : > { %1504 = vmatmul.bf16.gmra.mxu2 %v1418_v24  ;;  %1700 = vmatmul.bf16.gmra.mxu3 %v1620_v33 }
  0xd7   : > { %v553_v37 = vpop.f32.mrf.mxu0  ;;  %v3163_v38 = vpop.f32.mrf.mxu1 }
  0xd8   : > { %v3161_v36 = vpop.f32.mrf.mxu2  ;;  %v983_v43 = vpop.f32.mrf.mxu3 }
  0xdf   : > { %v556_v52 = vpop.f32.mrf.mxu0  ;;  %v3168_v53 = vpop.f32.mrf.mxu1 }
  0xe0   : > { %v573_v48 = vpop.f32.mrf.mxu2  ;;  %v985_v59 = vpop.f32.mrf.mxu3 }
  0xe2   : > { %1323 = vmatmul.bf16.gmra.mxu1 %v1240_v54  ;;  %1821 = vmatmul.bf16.gmra.mxu0 %v1747_v55 }
  0xe5   : > { %1509 = vmatmul.bf16.gmra.mxu2 %v1426_v47  ;;  %1705 = vmatmul.bf16.gmra.mxu3 %v1623_v60 }
  0xe7   : > { %v558_v0 = vpop.f32.mrf.mxu0  ;;  %v3174_v1 = vpop.f32.mrf.mxu1 }
  0xe8   : > { %v988_v6 = vpop.f32.mrf.mxu3 }
  0xef   : > { %v660_v11 = vpop.f32.mrf.mxu1  ;;  %v1128_v12 = vpop.f32.mrf.mxu0 }
  0xf0   : > { %v661_v15 = vadd.f32 %v660_v11, %v3152_v25  ;;  %v990_v16 = vpop.f32.mrf.mxu3  ;;  %v1251_v25 = vor.u32 %v1249_v28, %v1247_v8 }
  0xf2   : > { %1328 = vmatmul.bf16.gmra.mxu1 %v1248_v13  ;;  %1826 = vmatmul.bf16.gmra.mxu0 %v1749_v14 }
  0xf5   : > { %1514 = vmatmul.bf16.gmra.mxu2 %v1434_v10 }
  0xf7   : > { %v662_v20 = vpop.f32.mrf.mxu1  ;;  %v1130_v21 = vpop.f32.mrf.mxu0 }
  0xf8   : > { %v838_v17 = vpop.f32.mrf.mxu2  ;;  %v663_v22 = vadd.f32 %v662_v20, %v553_v37  ;;  %v993_v27 = vpop.f32.mrf.mxu3 }
  0xf9   : > { %v862_v18 = vadd.f32 %v838_v17, %v661_v15 }
  0xfb   : > { %v1007_v19 = vadd.f32 %v983_v43, %v862_v18 }
  0xfd   : > { %v3180_v24 = vadd.f32 %v1128_v12, %v1007_v19 }
  0xff   : > { %v665_v33 = vpop.f32.mrf.mxu1  ;;  %v1133_v34 = vpop.f32.mrf.mxu0 }
 0x100   : > { %v840_v29 = vpop.f32.mrf.mxu2  ;;  %v666_v35 = vadd.f32 %v665_v33, %v556_v52  ;;  %v995_v40 = vpop.f32.mrf.mxu3 }
 0x101   : > { %v863_v30 = vadd.f32 %v840_v29, %v663_v22 }
 0x102   : > { %1333 = vmatmul.bf16.gmra.mxu1 %v1251_v25  ;;  %1831 = vmatmul.bf16.gmra.mxu0 %v1748_v9 }
 0x103   : > { %v1008_v32 = vadd.f32 %v985_v59, %v863_v30 }
 0x105   : > { %1519 = vmatmul.bf16.gmra.mxu2 %v1437_v31  ;;  %v3182_v39 = vadd.f32 %v1130_v21, %v1008_v32 }
 0x107   : > { %v667_v43 = vpop.f32.mrf.mxu1  ;;  %v1135_v44 = vpop.f32.mrf.mxu0 }
 0x108   : > { %v843_v37 = vpop.f32.mrf.mxu2  ;;  %v668_v45 = vadd.f32 %v667_v43, %v558_v0  ;;  %v998_v47 = vpop.f32.mrf.mxu3 }
 0x109   : > { %v864_v41 = vadd.f32 %v843_v37, %v666_v35 }
 0x10b   : > { %v1009_v42 = vadd.f32 %v988_v6, %v864_v41 }
 0x10d   : > { %v3184_v46 = vadd.f32 %v1133_v34, %v1009_v42 }
 0x10f   : > { %v670_v51 = vpop.f32.mrf.mxu1  ;;  %v1138_v52 = vpop.f32.mrf.mxu0 }
 0x110   : > { %v845_v48 = vpop.f32.mrf.mxu2  ;;  %v671_v54 = vadd.f32 %v670_v51, %v3154_v26  ;;  %v1000_v56 = vpop.f32.mrf.mxu3 }
 0x111   : > { %v865_v49 = vadd.f32 %v845_v48, %v668_v45  ;;  %v3210_v48 = vld [vmem:[%s3266_s2] ss:$0 sm:$0xff] }
 0x113   : > { %v1010_v50 = vadd.f32 %v990_v16, %v865_v49 }
 0x115   : > { %v3187_v55 = vadd.f32 %v1135_v44, %v1010_v50 }
 0x117   : > { %v672_v60 = vpop.f32.mrf.mxu1  ;;  %v1140_v61 = vpop.f32.mrf.mxu0 }
 0x118   : > { %v848_v57 = vpop.f32.mrf.mxu2  ;;  %v673_v62 = vadd.f32 %v672_v60, %v3163_v38  ;;  %v1003_v0 = vpop.f32.mrf.mxu3 }
 0x119   : > { %v866_v58 = vadd.f32 %v848_v57, %v671_v54 }
 0x11b   : > { %v1011_v59 = vadd.f32 %v993_v27, %v866_v58 }
 0x11d   : > { %v3190_v63 = vadd.f32 %v1138_v52, %v1011_v59 }
 0x11f   : > { %v675_v5 = vpop.f32.mrf.mxu1  ;;  %v1143_v6 = vpop.f32.mrf.mxu0 }
 0x120   : > { %v850_v2 = vpop.f32.mrf.mxu2  ;;  %v676_v26 = vadd.f32 %v675_v5, %v3168_v53  ;;  %v1005_v8 = vpop.f32.mrf.mxu3 }
 0x121   : > { %v867_v3 = vadd.f32 %v850_v2, %v673_v62 }
 0x123   : > { %v1012_v4 = vadd.f32 %v995_v40, %v867_v3 }
 0x125   : > { %v3193_v7 = vadd.f32 %v1140_v61, %v1012_v4 }
 0x127   : > { %v677_v12 = vpop.f32.mrf.mxu1  ;;  %v1145_v13 = vpop.f32.mrf.mxu0 }
 0x128   : > { %v853_v9 = vpop.f32.mrf.mxu2  ;;  %v678_v38 = vadd.f32 %v677_v12, %v3174_v1  ;;  %v1686_v15 = vpop.f32.mrf.mxu3 }
 0x129   : > { %v868_v10 = vadd.f32 %v853_v9, %v676_v26 }
 0x12b   : > { %v1013_v11 = vadd.f32 %v998_v47, %v868_v10 }
 0x12d   : > { %v3196_v14 = vadd.f32 %v1143_v6, %v1013_v11 }
 0x12f   : > { %v680_v19 = vpop.f32.mrf.mxu1  ;;  %v1148_v20 = vpop.f32.mrf.mxu0 }
 0x130   : > { %v855_v16 = vpop.f32.mrf.mxu2  ;;  %v681_v53 = vadd.f32 %v680_v19, %v3161_v36  ;;  %v1688_v22 = vpop.f32.mrf.mxu3 }
 0x131   : > { %v869_v17 = vadd.f32 %v855_v16, %v678_v38 }
 0x133   : > { %v1014_v18 = vadd.f32 %v1000_v56, %v869_v17 }
 0x135   : > { %v3199_v21 = vadd.f32 %v1145_v13, %v1014_v18 }
 0x137   : > { %v682_v29 = vpop.f32.mrf.mxu1  ;;  %v1150_v30 = vpop.f32.mrf.mxu0 }
 0x138   : > { %v858_v23 = vpop.f32.mrf.mxu2  ;;  %v1691_v31 = vpop.f32.mrf.mxu3 }
 0x139   : > { %v870_v27 = vadd.f32 %v858_v23, %v681_v53 }
 0x13b   : > { %v1015_v28 = vadd.f32 %v1003_v0, %v870_v27 }
 0x13d   : > { %v3201_v1 = vadd.f32 %v1148_v20, %v1015_v28 }
 0x13f   : > { %v1314_v25 = vpop.f32.mrf.mxu1  ;;  %v1812_v33 = vpop.f32.mrf.mxu0 }
 0x140   : > { %v860_v32 = vpop.f32.mrf.mxu2  ;;  %v1338_v34 = vadd.f32 %v1314_v25, %v3180_v24  ;;  %v1693_v35 = vpop.f32.mrf.mxu3 }
 0x147   : > { %v1316_v37 = vpop.f32.mrf.mxu1  ;;  %v1814_v41 = vpop.f32.mrf.mxu0 }
 0x148   : > { %v1500_v36 = vpop.f32.mrf.mxu2  ;;  %v1339_v43 = vadd.f32 %v1316_v37, %v3182_v39  ;;  %v1696_v44 = vpop.f32.mrf.mxu3  ;;  %v3218_v39 = vld [vmem:[%s3267_s3] ss:$0 sm:$0xff] }
 0x149   : > { %v1524_v40 = vadd.f32 %v1500_v36, %v1338_v34 }
 0x14b   : > { %v1710_v42 = vadd.f32 %v1686_v15, %v1524_v40 }
 0x14d   : > { %v1836_v47 = vadd.f32 %v1812_v33, %v1710_v42 }
 0x14f   : > { %v1319_v50 = vpop.f32.mrf.mxu1  ;;  %v1817_v51 = vpop.f32.mrf.mxu0  ;;  %v1849_v52 = vmul.f32 %v3210_v48, %v1836_v47 }
 0x150   : > { %v1502_v45 = vpop.f32.mrf.mxu2  ;;  %v1340_v56 = vadd.f32 %v1319_v50, %v3184_v46  ;;  %v1698_v57 = vpop.f32.mrf.mxu3 }
 0x151   : > { %v1525_v49 = vadd.f32 %v1502_v45, %v1339_v43  ;;  %v1862_v60 = vadd.f32 %v3218_v39, %v1849_v52 }
 0x153   : > { %v1711_v24 = vadd.f32 %v1688_v22, %v1525_v49 }
 0x155   : > { %v1837_v54 = vadd.f32 %v1814_v41, %v1711_v24 }
 0x157   : > { %v1850_v58 = vmul.f32 %v3210_v48, %v1837_v54  ;;  %v1321_v2 = vpop.f32.mrf.mxu1  ;;  %v1819_v3 = vpop.f32.mrf.mxu0 }
 0x158   : > { %v1505_v59 = vpop.f32.mrf.mxu2  ;;  %v1341_v4 = vadd.f32 %v1321_v2, %v3187_v55  ;;  %v1701_v5 = vpop.f32.mrf.mxu3 }
 0x159   : > { %v1863_v61 = vadd.f32 %v3218_v39, %v1850_v58  ;;  %v1526_v62 = vadd.f32 %v1505_v59, %v1340_v56 }
 0x15b   : > { %v2672_v0 = vpack.c.bf16 %v1863_v61, %v1862_v60  ;;  %v1712_v46 = vadd.f32 %v1691_v31, %v1526_v62 }
 0x15d   : > { %2673 = vst [vmem:[%s3227_s20] sm:$0xff] %v2672_v0   ;;  %v1838_v26 = vadd.f32 %v1817_v51, %v1712_v46 }
 0x15f   : > { %v1324_v10 = vpop.f32.mrf.mxu1  ;;  %v1822_v11 = vpop.f32.mrf.mxu0  ;;  %v1851_v12 = vmul.f32 %v3210_v48, %v1838_v26 }
 0x160   : > { %v1507_v6 = vpop.f32.mrf.mxu2  ;;  %v1342_v38 = vadd.f32 %v1324_v10, %v3190_v63  ;;  %v1703_v15 = vpop.f32.mrf.mxu3 }
 0x161   : > { %v1527_v8 = vadd.f32 %v1507_v6, %v1341_v4  ;;  %v1864_v18 = vadd.f32 %v3218_v39, %v1851_v12 }
 0x163   : > { %v1713_v9 = vadd.f32 %v1693_v35, %v1527_v8 }
 0x165   : > { %v1839_v13 = vadd.f32 %v1819_v3, %v1713_v9 }
 0x167   : > { %v1852_v16 = vmul.f32 %v3210_v48, %v1839_v13  ;;  %v1326_v53 = vpop.f32.mrf.mxu1  ;;  %v1824_v22 = vpop.f32.mrf.mxu0 }
 0x168   : > { %v1510_v17 = vpop.f32.mrf.mxu2  ;;  %v1343_v27 = vadd.f32 %v1326_v53, %v3193_v7  ;;  %v1706_v28 = vpop.f32.mrf.mxu3 }
 0x169   : > { %v1865_v55 = vadd.f32 %v3218_v39, %v1852_v16  ;;  %v1528_v19 = vadd.f32 %v1510_v17, %v1342_v38 }
 0x16b   : > { %v2677_v20 = vpack.c.bf16 %v1865_v55, %v1864_v18  ;;  %v1714_v23 = vadd.f32 %v1696_v44, %v1528_v19 }
 0x16d   : > { %2689 = vst [vmem:[%s3227_s20 + $0x8] sm:$0xff] %v2677_v20   ;;  %v1840_v30 = vadd.f32 %v1822_v11, %v1714_v23 }
 0x16f   : > { %v1329_v32 = vpop.f32.mrf.mxu1  ;;  %v1827_v25 = vpop.f32.mrf.mxu0  ;;  %v1853_v33 = vmul.f32 %v3210_v48, %v1840_v30 }
 0x170   : > { %v1512_v29 = vpop.f32.mrf.mxu2  ;;  %v1344_v35 = vadd.f32 %v1329_v32, %v3196_v14  ;;  %v1708_v36 = vpop.f32.mrf.mxu3 }
 0x171   : > { %v1529_v63 = vadd.f32 %v1512_v29, %v1343_v27  ;;  %v1866_v41 = vadd.f32 %v3218_v39, %v1853_v33 }
 0x173   : > { %v1715_v31 = vadd.f32 %v1698_v57, %v1529_v63 }
 0x175   : > { %v1841_v34 = vadd.f32 %v1824_v22, %v1715_v31 }
 0x177   : > { %v1854_v40 = vmul.f32 %v3210_v48, %v1841_v34  ;;  %v1331_v44 = vpop.f32.mrf.mxu1  ;;  %v1829_v45 = vpop.f32.mrf.mxu0 }
 0x178   : > { %v1515_v37 = vpop.f32.mrf.mxu2  ;;  %v1345_v49 = vadd.f32 %v1331_v44, %v3199_v21 }
 0x179   : > { %v1867_v7 = vadd.f32 %v3218_v39, %v1854_v40  ;;  %v1530_v42 = vadd.f32 %v1515_v37, %v1344_v35 }
 0x17b   : > { %v2682_v43 = vpack.c.bf16 %v1867_v7, %v1866_v41  ;;  %v1716_v47 = vadd.f32 %v1701_v5, %v1530_v42 }
 0x17d   : > { %2690 = vst [vmem:[%s3227_s20 + $0x10] sm:$0xff] %v2682_v43   ;;  %v1842_v50 = vadd.f32 %v1827_v25, %v1716_v47 }
 0x17f   : > { %v1334_v52 = vpop.f32.mrf.mxu1  ;;  %v1832_v54 = vpop.f32.mrf.mxu0  ;;  %v1855_v56 = vmul.f32 %v3210_v48, %v1842_v50 }
 0x180   : > { %v1517_v24 = vpop.f32.mrf.mxu2  ;;  %v1346_v58 = vadd.f32 %v1334_v52, %v3201_v1 }
 0x181   : > { %v1531_v51 = vadd.f32 %v1517_v24, %v1345_v49  ;;  %v1868_v61 = vadd.f32 %v3218_v39, %v1855_v56 }
 0x183   : > { %v1717_v14 = vadd.f32 %v1703_v15, %v1531_v51 }
 0x185   : > { %v1843_v57 = vadd.f32 %v1829_v45, %v1717_v14 }
 0x187   : > { %v1856_v59 = vmul.f32 %v3210_v48, %v1843_v57  ;;  %v1336_v3 = vpop.f32.mrf.mxu1  ;;  %v1834_v46 = vpop.f32.mrf.mxu0 }
 0x188   : > { %v1520_v60 = vpop.f32.mrf.mxu2 }
 0x189   : > { %v1869_v21 = vadd.f32 %v3218_v39, %v1856_v59  ;;  %v1532_v62 = vadd.f32 %v1520_v60, %v1346_v58 }
 0x18b   : > { %v2687_v0 = vpack.c.bf16 %v1869_v21, %v1868_v61  ;;  %v1718_v2 = vadd.f32 %v1706_v28, %v1532_v62 }
 0x18d   : > { %2691 = vst [vmem:[%s3227_s20 + $0x18] sm:$0xff] %v2687_v0   ;;  %v1844_v4 = vadd.f32 %v1832_v54, %v1718_v2 }
 0x18f   : > { %v1857_v5 = vmul.f32 %v3210_v48, %v1844_v4 }
 0x190   : > { %v1522_v6 = vpop.f32.mrf.mxu2 }
 0x191   : > { %v1870_v1 = vadd.f32 %v3218_v39, %v1857_v5 }
 0x193   : > { %v1879_v26 = vpack.c.bf16 %v1870_v1, %v1870_v1 }
 0x195   : > { %1888 = vst [vmem:[%s3227_s20 + $0x20] sm:$0xf] %v1879_v26 }
 0x196 PF: > { %p11_p9 = scmp.ge.s32.totalorder %s2807_s19, 4   ;;  %s3269_s15 = smov %s2759_s16 }
 0x197   : > { %s3270_s16 = smov %s2816_s22  ;;  %s3271_s17 = smov %s2807_s19 }
 0x198   :  { %13 = sbr.rel (!%p11_p9) target bundleno = 2 (0x2), region = 123 }

// kernel: res_down_forward.21
= control target key start
LH: loop header
LB: loop body
LE: loop exit
PB: predicated region body
PF: predicated region fallthrough
CT: control target
= control target key end

     0   :  { %s583_s15 = smov 0   ;;  %s637_s0 = inlined_call_operand.vmem [shape: bf16[128,128], index: 0, kind: input, shape index: {}]   ;;  %s638_s1 = inlined_call_operand.vmem [shape: bf16[128,128], index: 1, kind: input, shape index: {}]   ;;  %s639_s2 = inlined_call_operand.vmem [shape: f32[1,128], index: 2, kind: input, shape index: {}]   ;;  %s640_s3 = inlined_call_operand.vmem [shape: f32[1,128], index: 3, kind: input, shape index: {}]   ;;  %s641_s4 = inlined_call_operand.vmem [shape: bf16[128,128], index: 4, kind: output, shape index: {}]  }
   0x1 LB: > { %s422_s16 = sadd.s32 4294967295, %s556_s15   ;;  %p426_p0 = scmp.ge.s32.totalorder %s556_s15, 1  ;;  %s556_s15 = sphi %s583_s15, %s14_s15  }
   0x2   : > { %p163_p1 = scmp.lt.s32.totalorder %s556_s15, 3 }
   0x4   : > { %p164_p2 = pnand %p426_p0, %p163_p1 }
   0x5   : > { %s427_s25 = sshll.u32 (!%p164_p2), %s422_s16, 3 }
   0x6   : > { %167 = sbr.rel (%p164_p2) target bundleno = 192 (0xc0), region = 36  ;;  %p190_p3 = scmp.lt.s32.totalorder (!%p164_p2), %s427_s25, 15 }
   0xb   : > { %v492_v0 = vld [vmem:[%s638_s1 + $0x38] sm:$0xff]  ;;  %v491_v1 = vld [vmem:[%s638_s1 + $0x30] sm:$0xff]  ;;  %v490_v2 = vld [vmem:[%s638_s1 + $0x28] sm:$0xff]  ;;  %s643_s25 = smov (!%p190_p3, %s427_s25), 15 }
   0xc   : > { %297 = vmatpush.bf16.msra.mxu0 %v492_v0  ;;  %516 = vmatpush.bf16.msra.mxu1 %v492_v0  ;;  %v489_v3 = vld [vmem:[%s638_s1 + $0x20] sm:$0xff]  ;;  %v488_v4 = vld [vmem:[%s638_s1 + $0x18] sm:$0xff]  ;;  %v487_v5 = vld [vmem:[%s638_s1 + $0x10] sm:$0xff]  ;;  %s428_s6 = sshll.u32 %s643_s25, 2 }
   0xd   : > { %517 = vmatpush.bf16.msra.mxu2 %v492_v0  ;;  %518 = vmatpush.bf16.msra.mxu3 %v492_v0  ;;  %v486_v6 = vld [vmem:[%s638_s1 + $0x8] sm:$0xff]  ;;  %v485_v7 = vld [vmem:[%s638_s1] sm:$0xff]  ;;  %s193_s11 = scalar_lea.vmem %s637_s0, %s428_s6  ;;  %s199_s19 = scalar_lea.vmem %s641_s4, %s428_s6 }
   0xe   : > { %v481_v8 = vld [vmem:[%s193_s11] sm:$0xff]  ;;  %v482_v9 = vld [vmem:[%s193_s11 + $0x8] sm:$0xff]  ;;  %v483_v10 = vld [vmem:[%s193_s11 + $0x10] sm:$0xff] }
   0xf   : > { %v484_v11 = vld [vmem:[%s193_s11 + $0x18] sm:$0xff]  ;;  %v548_v14 = vld [vmem:[%s639_s2] ss:$0 sm:$0xff] }
  0x10   : > { %298 = vmatpush.bf16.msra.mxu0 %v491_v1  ;;  %519 = vmatpush.bf16.msra.mxu1 %v491_v1  ;;  %v549_v16 = vld [vmem:[%s640_s3] ss:$0 sm:$0xff] }
  0x11   : > { %520 = vmatpush.bf16.msra.mxu2 %v491_v1  ;;  %521 = vmatpush.bf16.msra.mxu3 %v491_v1 }
  0x14   : > { %299 = vmatpush.bf16.msra.mxu0 %v490_v2  ;;  %522 = vmatpush.bf16.msra.mxu1 %v490_v2 }
  0x15   : > { %523 = vmatpush.bf16.msra.mxu2 %v490_v2  ;;  %524 = vmatpush.bf16.msra.mxu3 %v490_v2 }
  0x18   : > { %300 = vmatpush.bf16.msra.mxu0 %v489_v3  ;;  %525 = vmatpush.bf16.msra.mxu1 %v489_v3 }
  0x19   : > { %526 = vmatpush.bf16.msra.mxu2 %v489_v3  ;;  %527 = vmatpush.bf16.msra.mxu3 %v489_v3 }
  0x1c   : > { %301 = vmatpush.bf16.msra.mxu0 %v488_v4  ;;  %528 = vmatpush.bf16.msra.mxu1 %v488_v4 }
  0x1d   : > { %529 = vmatpush.bf16.msra.mxu2 %v488_v4  ;;  %530 = vmatpush.bf16.msra.mxu3 %v488_v4 }
  0x20   : > { %302 = vmatpush.bf16.msra.mxu0 %v487_v5  ;;  %531 = vmatpush.bf16.msra.mxu1 %v487_v5 }
  0x21   : > { %532 = vmatpush.bf16.msra.mxu2 %v487_v5  ;;  %533 = vmatpush.bf16.msra.mxu3 %v487_v5 }
  0x24   : > { %303 = vmatpush.bf16.msra.mxu0 %v486_v6  ;;  %534 = vmatpush.bf16.msra.mxu1 %v486_v6 }
  0x25   : > { %535 = vmatpush.bf16.msra.mxu2 %v486_v6  ;;  %536 = vmatpush.bf16.msra.mxu3 %v486_v6 }
  0x28   : > { %304 = vmatpush.bf16.msra.mxu0 %v485_v7  ;;  %537 = vmatpush.bf16.msra.mxu1 %v485_v7 }
  0x29   : > { %538 = vmatpush.bf16.msra.mxu2 %v485_v7  ;;  %539 = vmatpush.bf16.msra.mxu3 %v485_v7 }
  0x2b   : > { %305 = vmatmul.bf16.vlgmr.msra.gmra.mxu0 %v481_v8  ;;  %310 = vmatmul.bf16.vlgmr.msra.gmra.mxu1 %v482_v9 }
  0x2c   : > { %315 = vmatmul.bf16.vlgmr.msra.gmra.mxu2 %v483_v10  ;;  %320 = vmatmul.bf16.vlgmr.msra.gmra.mxu3 %v484_v11 }
  0xa8   : > { %v306_v12 = vpop.f32.mrf.mxu0  ;;  %v311_v13 = vpop.f32.mrf.mxu1 }
  0xa9   : > { %v330_v15 = vmul.f32 %v548_v14, %v306_v12  ;;  %v332_v17 = vmul.f32 %v548_v14, %v311_v13 }
  0xab   : > { %v342_v24 = vadd.f32 %v549_v16, %v330_v15  ;;  %v344_v25 = vadd.f32 %v549_v16, %v332_v17 }
  0xaf   : > { %v316_v18 = vpop.f32.mrf.mxu2  ;;  %v321_v19 = vpop.f32.mrf.mxu3 }
  0xb0   : > { %v308_v20 = vpop.f32.mrf.mxu0  ;;  %v313_v21 = vpop.f32.mrf.mxu1  ;;  %v334_v30 = vmul.f32 %v548_v14, %v316_v18  ;;  %v336_v31 = vmul.f32 %v548_v14, %v321_v19 }
  0xb1   : > { %v331_v22 = vmul.f32 %v548_v14, %v308_v20  ;;  %v333_v23 = vmul.f32 %v548_v14, %v313_v21 }
  0xb2   : > { %v346_v36 = vadd.f32 %v549_v16, %v334_v30  ;;  %v348_v37 = vadd.f32 %v549_v16, %v336_v31 }
  0xb3   : > { %v343_v26 = vadd.f32 %v549_v16, %v331_v22  ;;  %v345_v27 = vadd.f32 %v549_v16, %v333_v23 }
  0xb5   : > { %v496_v28 = vpack.c.bf16 %v343_v26, %v342_v24  ;;  %v501_v29 = vpack.c.bf16 %v345_v27, %v344_v25 }
  0xb7   : > { %497 = vst [vmem:[%s199_s19] sm:$0xff] %v496_v28   ;;  %v318_v32 = vpop.f32.mrf.mxu2  ;;  %v323_v33 = vpop.f32.mrf.mxu3 }
  0xb8   : > { %513 = vst [vmem:[%s199_s19 + $0x8] sm:$0xff] %v501_v29   ;;  %v335_v34 = vmul.f32 %v548_v14, %v318_v32  ;;  %v337_v35 = vmul.f32 %v548_v14, %v323_v33 }
  0xba   : > { %v347_v38 = vadd.f32 %v549_v16, %v335_v34  ;;  %v349_v39 = vadd.f32 %v549_v16, %v337_v35 }
  0xbc   : > { %v506_v40 = vpack.c.bf16 %v347_v38, %v346_v36  ;;  %v511_v41 = vpack.c.bf16 %v349_v39, %v348_v37 }
  0xbe   : > { %514 = vst [vmem:[%s199_s19 + $0x10] sm:$0xff] %v506_v40  }
  0xbf   : > { %515 = vst [vmem:[%s199_s19 + $0x18] sm:$0xff] %v511_v41  }
  0xc0 PF: > { %s14_s15 = sadd.s32 1, %s556_s15  }
  0xc1   : > { %p11_p4 = scmp.ge.s32.totalorder %s14_s15, 4  }
  0xc3   :  { %13 = sbr.rel (!%p11_p4) target bundleno = 1 (0x1), region = 66 }

// kernel: res_down_forward.13
= control target key start
LH: loop header
LB: loop body
LE: loop exit
PB: predicated region body
PF: predicated region fallthrough
CT: control target
= control target key end

     0   :  { %s2318_s15 = smov 0   ;;  %s2832_s0 = inlined_call_operand.vmem [shape: bf16[1,2,102,128], index: 0, kind: input, shape index: {}]   ;;  %s2833_s1 = inlined_call_operand.vmem [shape: bf16[9,128,128], index: 1, kind: input, shape index: {}]   ;;  %s2834_s2 = inlined_call_operand.vmem [shape: f32[1,128], index: 2, kind: input, shape index: {}]   ;;  %s2835_s3 = inlined_call_operand.vmem [shape: f32[1,128], index: 3, kind: input, shape index: {}]   ;;  %s2836_s4 = inlined_call_operand.vmem [shape: bf16[2,80,128], index: 4, kind: output, shape index: {}]  }
   0x1 LB: > { %s1664_s16 = sadd.s32 4294967295, %s2291_s15   ;;  %p1668_p0 = scmp.ge.s32.totalorder %s2291_s15, 1  ;;  %s2291_s15 = sphi %s2318_s15, %s14_s15  }
   0x2   : > { %p162_p1 = scmp.lt.s32.totalorder %s2291_s15, 3 }
   0x4   : > { %p163_p2 = pnand %p1668_p0, %p162_p1 }
   0x5   : > { %p188_p3 = scmp.lt.s32.totalorder (!%p163_p2), %s1664_s16, 1 }
   0x6   : > { %166 = sbr.rel (%p163_p2) target bundleno = 377 (0x179), region = 36 }
   0xb   : > { %v2156_v0 = vld [vmem:[%s2833_s1 + $0x78] sm:$0xff]  ;;  %v2155_v1 = vld [vmem:[%s2833_s1 + $0x70] sm:$0xff]  ;;  %s2838_s16 = smov (!%p188_p3, %s1664_s16), 1  ;;  %v2154_v4 = vld [vmem:[%s2833_s1 + $0x68] sm:$0xff]  ;;  %vm270_vm0 = vsmask.f32 7424 }
   0xc   : > { %368 = vmatpush.bf16.msra.mxu0 %v2156_v0  ;;  %2257 = vmatpush.bf16.msra.mxu1 %v2156_v0  ;;  %v2176_v2 = vld [vmem:[%s2833_s1 + $0xf8] sm:$0xff]  ;;  %v2175_v3 = vld [vmem:[%s2833_s1 + $0xf0] sm:$0xff]  ;;  %s2273_s27 = smul.u32 52, %s2838_s16  ;;  %v2174_v5 = vld [vmem:[%s2833_s1 + $0xe8] sm:$0xff]  ;;  %vm510_vm1 = vcmask 1046528   ;;  %vm976_vm4 = vcmask 1045504  }
   0xd   : > { %2258 = vmatpush.bf16.msra.mxu2 %v2156_v0  ;;  %739 = vmatpush.bf16.msra.mxu3 %v2176_v2  ;;  %v2153_v6 = vld [vmem:[%s2833_s1 + $0x60] sm:$0xff]  ;;  %v2152_v9 = vld [vmem:[%s2833_s1 + $0x58] sm:$0xff]  ;;  %v2151_v17 = vld [vmem:[%s2833_s1 + $0x50] sm:$0xff]  ;;  %vm804_vm2 = vsmask.f32 6400  ;;  %vm1442_vm5 = vcmask 1044480  }
   0xe   : > { %s2353_s8 = scalar_lea.vmem %s2832_s0, %s2273_s27  ;;  %v2173_v7 = vld [vmem:[%s2833_s1 + $0xe0] sm:$0xff]  ;;  %v2172_v14 = vld [vmem:[%s2833_s1 + $0xd8] sm:$0xff]  ;;  %v2171_v24 = vld [vmem:[%s2833_s1 + $0xd0] sm:$0xff]  ;;  %vm1270_vm3 = vsmask.f32 5376  ;;  %s2274_s29 = smul.u32 40, %s2838_s16 }
   0xf   : > { %v224_v8 = vld [vmem:[%s2353_s8 + $0x28] sm:$0x1]  ;;  %v2363_v10 = vld [vmem:[%s2353_s8] sm:$0xff]   ;;  %v2366_v11 = vld [vmem:[%s2353_s8 + $0x10] sm:$0xff] }
  0x10   : > { %369 = vmatpush.bf16.msra.mxu0 %v2155_v1  ;;  %2259 = vmatpush.bf16.msra.mxu1 %v2155_v1  ;;  %v2369_v12 = vld [vmem:[%s2353_s8 + $0x20] sm:$0xff]  ;;  %v263_v13 = vunpack.c.l.b16 %v224_v8  ;;  %v2375_v15 = vld [vmem:[%s2353_s8 + $0x8] sm:$0xff]  ;;  %v274_v16 = vshll.u32 %v2363_v10, 16  ;;  %v2382_v18 = vld [vmem:[%s2353_s8 + $0x18] sm:$0xff]  ;;  %v287_v19 = vshll.u32 %v2366_v11, 16  ;;  %v272_v25 = vshrl.u32 %v2363_v10, 16  ;;  %s2799_s6 = scalar_lea.vmem %s2836_s4, %s2274_s29 }
  0x11   : > { %2260 = vmatpush.bf16.msra.mxu2 %v2155_v1  ;;  %740 = vmatpush.bf16.msra.mxu3 %v2175_v3  ;;  %v303_v21 = vshll.u32 %v2369_v12, 16  ;;  %v619_v22 = vld [vmem:[%s2353_s8 + $0x4] sm:$0xe]  ;;  %v2390_v23 = vld [vmem:[%s2353_s8 + $0x8] sm:$0xff]   ;;  %v279_v27 = vshll.u32 %v2375_v15, 16  ;;  %v291_v28 = vshrl.u32 %v2366_v11, 16 }
  0x12   : > { %v2385_v20 = vpack.c.b16 %v263_v13, %v263_v13  ;;  %v276_v26 = vrot.slane %v274_v16, 1  ;;  %v2150_v29 = vld [vmem:[%s2833_s1 + $0x48] sm:$0xff]  ;;  %v2401_v30 = vrot.slane %v287_v19, 1  ;;  %v295_v31 = vshll.u32 %v2382_v18, 16  ;;  %v2149_v39 = vld [vmem:[%s2833_s1 + $0x40] sm:$0xff]  ;;  %v2148_v45 = vld [vmem:[%s2833_s1 + $0x38] sm:$0xff] }
  0x13   : > { %v658_v32 = vunpack.c.l.b16 %v619_v22  ;;  %v659_v33 = vunpack.c.l.b16 %v2390_v23  ;;  %v2405_v34 = vrot.slane %v303_v21, 1  ;;  %v307_v35 = vshrl.u32 %v2369_v12, 16  ;;  %v2170_v37 = vld [vmem:[%s2833_s1 + $0xc8] sm:$0xff]  ;;  %v2164_v48 = vld [vmem:[%s2833_s1 + $0xb8] sm:$0xff]  ;;  %v2169_v52 = vld [vmem:[%s2833_s1 + $0xc0] sm:$0xff] }
  0x14   : > { %370 = vmatpush.bf16.msra.mxu0 %v2154_v4  ;;  %2261 = vmatpush.bf16.msra.mxu1 %v2154_v4  ;;  %v311_v36 = vshll.u32 %v2385_v20, 16  ;;  %v281_v38 = vrot.slane %v279_v27, 1  ;;  %v277_v40 = vor.u32 %v276_v26, %v272_v25  ;;  %v293_v41 = vor.u32 %v291_v28, %v2401_v30  ;;  %v2417_v43 = vld [vmem:[%s2353_s8 + $0xc] sm:$0xff]  ;;  %v2184_v49 = vld [vmem:[%s2833_s1 + $0x138] sm:$0xff]  ;;  %v2145_v3 = vld [vmem:[%s2833_s1 + $0x20] sm:$0xff] }
  0x15   : > { %2262 = vmatpush.bf16.msra.mxu2 %v2154_v4  ;;  %741 = vmatpush.bf16.msra.mxu3 %v2174_v5  ;;  %v297_v42 = vrot.slane %v295_v31, 1  ;;  %v2421_v44 = vpack.c.b16 %v659_v33, %v658_v32  ;;  %v309_v46 = vor.u32 %v307_v35, %v2405_v34  ;;  %v676_v54 = vrot.slane %v2417_v43, 1  ;;  %v2147_v56 = vld [vmem:[%s2833_s1 + $0x30] sm:$0xff]  ;;  %v2212_v57 = vld [vmem:[%s2833_s1 + $0x1f8] sm:$0xff]  ;;  %v2146_v61 = vld [vmem:[%s2833_s1 + $0x28] sm:$0xff] }
  0x16   : > { %v313_v47 = vrot.slane %v311_v36, 1  ;;  %v282_v50 = vsel %vm270_vm0, %v277_v40, %v281_v38  ;;  %v2163_v58 = vld [vmem:[%s2833_s1 + $0xb0] sm:$0xff]  ;;  %v2162_v63 = vld [vmem:[%s2833_s1 + $0xa8] sm:$0xff]  ;;  %v283_v1 = vshrl.u32 %v2375_v15, 16  ;;  %v299_v2 = vshrl.u32 %v2382_v18, 16  ;;  %v2161_v4 = vld [vmem:[%s2833_s1 + $0xa0] sm:$0xff] }
  0x17   : > { %v298_v51 = vsel %vm270_vm0, %v293_v41, %v297_v42  ;;  %v675_v53 = vrot.slane %v2421_v44, 1  ;;  %v2183_v59 = vld [vmem:[%s2833_s1 + $0x130] sm:$0xff]  ;;  %v2182_v0 = vld [vmem:[%s2833_s1 + $0x128] sm:$0xff]  ;;  %v2181_v5 = vld [vmem:[%s2833_s1 + $0x120] sm:$0xff]  ;;  %v806_v27 = vshrl.u32 %v2421_v44, 16  ;;  %v817_v31 = vshll.u32 %v2417_v43, 16 }
  0x18   : > { %371 = vmatpush.bf16.msra.mxu0 %v2153_v6  ;;  %2263 = vmatpush.bf16.msra.mxu1 %v2153_v6  ;;  %v314_v55 = vsel %vm270_vm0, %v309_v46, %v313_v47  ;;  %v2211_v62 = vld [vmem:[%s2833_s1 + $0x1f0] sm:$0xff]  ;;  %v2160_v13 = vld [vmem:[%s2833_s1 + $0x98] sm:$0xff]  ;;  %v2250_v25 = vld [vmem:[%s2353_s8] sm:$0xf0]  ;;  %v512_v46 = vrot.slane %v2375_v15, 1 }
  0x19   : > { %2264 = vmatpush.bf16.msra.mxu2 %v2153_v6  ;;  %742 = vmatpush.bf16.msra.mxu3 %v2173_v7  ;;  %v677_v60 = vsel %vm510_vm1, %v675_v53, %v676_v54  ;;  %v285_v6 = vor.u32 %v283_v1, %v281_v38  ;;  %v301_v7 = vor.u32 %v299_v2, %v297_v42  ;;  %v2478_v8 = vld [vmem:[%s2353_s8 + $0x14] sm:$0xff]  ;;  %v2251_v26 = vld [vmem:[%s2353_s8] sm:$0xe]  ;;  %v2210_v28 = vld [vmem:[%s2833_s1 + $0x1e8] sm:$0xff]  ;;  %v808_v38 = vrot.slane %v806_v27, 1 }
  0x1a   : > { %v678_v19 = vrot.slane %v2478_v8, 1  ;;  %v2143_v21 = vld [vmem:[%s2833_s1 + $0x10] sm:$0xff]  ;;  %v2158_v35 = vld [vmem:[%s2833_s1 + $0x88] sm:$0xff]  ;;  %v819_v41 = vrot.slane %v817_v31, 2  ;;  %v2141_v42 = vld [vmem:[%s2833_s1] sm:$0xff] }
  0x1b   : > { %v290_v16 = vsel %vm270_vm0, %v285_v6, %v2401_v30  ;;  %v2159_v22 = vld [vmem:[%s2833_s1 + $0x90] sm:$0xff]  ;;  %v814_v30 = vshrl.u32 %v2417_v43, 16  ;;  %v2178_v36 = vld [vmem:[%s2833_s1 + $0x108] sm:$0xff]  ;;  %v2177_v47 = vld [vmem:[%s2833_s1 + $0x100] sm:$0xff] }
  0x1c   : > { %372 = vmatpush.bf16.msra.mxu0 %v2152_v9  ;;  %2265 = vmatpush.bf16.msra.mxu1 %v2152_v9  ;;  %v679_v32 = vsel %vm510_vm1, %v676_v54, %v678_v19  ;;  %v2544_v53 = vld [vmem:[%s2353_s8 + $0x1c] sm:$0xff]  ;;  %v2187_v27 = vld [vmem:[%s2833_s1 + $0x150] sm:$0xff] }
  0x1d   : > { %2266 = vmatpush.bf16.msra.mxu2 %v2152_v9  ;;  %743 = vmatpush.bf16.msra.mxu3 %v2172_v14  ;;  %v2144_v9 = vld [vmem:[%s2833_s1 + $0x18] sm:$0xff]  ;;  %v816_v40 = vrot.slane %v814_v30, 1  ;;  %v2189_v6 = vld [vmem:[%s2833_s1 + $0x160] sm:$0xff]  ;;  %v2215_v31 = vld [vmem:[%s2833_s1 + $0x210] sm:$0xff] }
  0x1e   : > { %v2180_v14 = vld [vmem:[%s2833_s1 + $0x118] sm:$0xff] }
  0x1f   : > { %v2208_v2 = vld [vmem:[%s2833_s1 + $0x1d8] sm:$0xff] }
  0x20   : > { %373 = vmatpush.bf16.msra.mxu0 %v2151_v17  ;;  %2267 = vmatpush.bf16.msra.mxu1 %v2151_v17 }
  0x21   : > { %2268 = vmatpush.bf16.msra.mxu2 %v2151_v17  ;;  %744 = vmatpush.bf16.msra.mxu3 %v2171_v24  ;;  %v306_v17 = vsel %vm270_vm0, %v301_v7, %v2405_v34  ;;  %v2179_v24 = vld [vmem:[%s2833_s1 + $0x110] sm:$0xff]  ;;  %v2142_v34 = vld [vmem:[%s2833_s1 + $0x8] sm:$0xff]  ;;  %v2217_v7 = vld [vmem:[%s2833_s1 + $0x220] sm:$0xff] }
  0x24   : > { %374 = vmatpush.bf16.msra.mxu0 %v2150_v29  ;;  %2269 = vmatpush.bf16.msra.mxu1 %v2150_v29 }
  0x25   : > { %2270 = vmatpush.bf16.msra.mxu2 %v2150_v29  ;;  %745 = vmatpush.bf16.msra.mxu3 %v2170_v37  ;;  %v809_v29 = vshll.u32 %v2421_v44, 16  ;;  %v2252_v37 = vor.u32 %v2251_v26, %v2250_v25  ;;  %v2157_v44 = vld [vmem:[%s2833_s1 + $0x80] sm:$0xff]  ;;  %v2216_v25 = vld [vmem:[%s2833_s1 + $0x218] sm:$0xff]  ;;  %v2207_v26 = vld [vmem:[%s2833_s1 + $0x1d0] sm:$0xff] }
  0x28   : > { %375 = vmatpush.bf16.msra.mxu0 %v2149_v39  ;;  %2271 = vmatpush.bf16.msra.mxu1 %v2149_v39 }
  0x29   : > { %2272 = vmatpush.bf16.msra.mxu2 %v2149_v39  ;;  %746 = vmatpush.bf16.msra.mxu3 %v2169_v52  ;;  %v811_v39 = vrot.slane %v809_v29, 2  ;;  %v2220_v52 = vld [vmem:[%s2833_s1 + $0x238] sm:$0xff]  ;;  %v835_v29 = vshll.u32 %v2544_v53, 16 }
  0x2b   : > { %376 = vmatmul.bf16.vlgmr.msra.gmra.mxu0 %v282_v50  ;;  %386 = vmatmul.bf16.vlgmr.msra.gmra.mxu1 %v298_v51  ;;  %v812_v50 = vor.u32 %v811_v39, %v808_v38  ;;  %v820_v51 = vor.u32 %v819_v41, %v816_v40  ;;  %v516_v38 = vrot.slane %v2382_v18, 1 }
  0x2c   : > { %455 = vmatpush.bf16.msrb.mxu1 %v2148_v45  ;;  %911 = vmatpush.bf16.msrb.mxu0 %v2184_v49  ;;  %v511_v45 = vrot.slane %v2252_v37, 1  ;;  %v2192_v49 = vld [vmem:[%s2833_s1 + $0x178] sm:$0xff] }
  0x2d   : > { %575 = vmatpush.bf16.msrb.mxu2 %v2164_v48  ;;  %1377 = vmatpush.bf16.msrb.mxu3 %v2212_v57  ;;  %v2204_v48 = vld [vmem:[%s2833_s1 + $0x1b8] sm:$0xff]  ;;  %v2191_v57 = vld [vmem:[%s2833_s1 + $0x170] sm:$0xff] }
  0x2e   : > { %396 = vmatmul.bf16.vlgmr.msra.gmra.mxu2 %v314_v55  ;;  %747 = vmatmul.bf16.vlgmr.msra.gmra.mxu3 %v677_v60  ;;  %v513_v54 = vsel %vm510_vm1, %v511_v45, %v512_v46  ;;  %v821_v55 = vsel %vm804_vm2, %v812_v50, %v820_v51  ;;  %v2209_v60 = vld [vmem:[%s2833_s1 + $0x1e0] sm:$0xff] }
  0x30   : > { %456 = vmatpush.bf16.msrb.mxu1 %v2147_v56  ;;  %912 = vmatpush.bf16.msrb.mxu0 %v2183_v59  ;;  %v2203_v56 = vld [vmem:[%s2833_s1 + $0x1b0] sm:$0xff] }
  0x31   : > { %576 = vmatpush.bf16.msrb.mxu2 %v2163_v58  ;;  %1378 = vmatpush.bf16.msrb.mxu3 %v2211_v62  ;;  %v680_v58 = vrot.slane %v2544_v53, 1  ;;  %v2219_v59 = vld [vmem:[%s2833_s1 + $0x230] sm:$0xff]  ;;  %v826_v62 = vshll.u32 %v2478_v8, 16 }
  0x33   : > { %v681_v1 = vsel %vm510_vm1, %v678_v19, %v680_v58 }
  0x34   : > { %457 = vmatpush.bf16.msrb.mxu1 %v2146_v61  ;;  %913 = vmatpush.bf16.msrb.mxu0 %v2182_v0  ;;  %v823_v61 = vshrl.u32 %v2478_v8, 16  ;;  %v2190_v0 = vld [vmem:[%s2833_s1 + $0x168] sm:$0xff] }
  0x35   : > { %577 = vmatpush.bf16.msrb.mxu2 %v2162_v63  ;;  %1379 = vmatpush.bf16.msrb.mxu3 %v2210_v28  ;;  %v2202_v63 = vld [vmem:[%s2833_s1 + $0x1a8] sm:$0xff]  ;;  %v832_v28 = vshrl.u32 %v2544_v53, 16 }
  0x38   : > { %458 = vmatpush.bf16.msrb.mxu1 %v2145_v3  ;;  %914 = vmatpush.bf16.msrb.mxu0 %v2181_v5  ;;  %v825_v3 = vrot.slane %v823_v61, 1  ;;  %v2201_v5 = vld [vmem:[%s2833_s1 + $0x1a0] sm:$0xff] }
  0x39   : > { %578 = vmatpush.bf16.msrb.mxu2 %v2161_v4  ;;  %1380 = vmatpush.bf16.msrb.mxu3 %v2209_v60  ;;  %v828_v4 = vrot.slane %v826_v62, 2  ;;  %v783_v60 = vld [vmem:[%s2353_s8 + $0x2c] sm:$0x3] }
  0x3b   : > { %381 = vmatmul.bf16.gmra.mxu0 %v290_v16  ;;  %391 = vmatmul.bf16.gmra.mxu1 %v306_v17  ;;  %v2593_v16 = vld [vmem:[%s2353_s8 + $0x24] sm:$0xff]  ;;  %v2188_v17 = vld [vmem:[%s2833_s1 + $0x158] sm:$0xff] }
  0x3c   : > { %459 = vmatpush.bf16.msrb.mxu1 %v2144_v9  ;;  %915 = vmatpush.bf16.msrb.mxu0 %v2180_v14  ;;  %v514_v9 = vrot.slane %v2366_v11, 1  ;;  %v2200_v14 = vld [vmem:[%s2833_s1 + $0x198] sm:$0xff]  ;;  %v844_v50 = vshll.u32 %v2593_v16, 16 }
  0x3d   : > { %579 = vmatpush.bf16.msrb.mxu2 %v2160_v13  ;;  %1381 = vmatpush.bf16.msrb.mxu3 %v2208_v2  ;;  %v829_v13 = vor.u32 %v828_v4, %v825_v3  ;;  %v802_v2 = vunpack.c.l.b16 %v783_v60 }
  0x3e   : > { %752 = vmatmul.bf16.gmra.mxu3 %v679_v32  ;;  %v515_v19 = vsel %vm510_vm1, %v512_v46, %v514_v9  ;;  %v629_v32 = vld [vmem:[%s2353_s8 + $0x2c] sm:$0x1]  ;;  %v517_v41 = vsel %vm510_vm1, %v514_v9, %v516_v38  ;;  %v2213_v9 = vld [vmem:[%s2833_s1 + $0x200] sm:$0xff] }
  0x3f   : > { %v668_v37 = vunpack.c.l.b16 %v629_v32 }
  0x40   : > { %460 = vmatpush.bf16.msrb.mxu1 %v2143_v21  ;;  %916 = vmatpush.bf16.msrb.mxu0 %v2179_v24  ;;  %v830_v21 = vsel %vm804_vm2, %v820_v51, %v829_v13  ;;  %v2199_v24 = vld [vmem:[%s2833_s1 + $0x190] sm:$0xff]  ;;  %v2197_v51 = vld [vmem:[%s2833_s1 + $0x180] sm:$0xff] }
  0x41   : > { %580 = vmatpush.bf16.msrb.mxu2 %v2159_v22  ;;  %v682_v22 = vrot.slane %v2593_v16, 1  ;;  %1382 = vmatpush.bf16.msrb.mxu3 %v2207_v26  ;;  %v674_v40 = vpack.c.b16 %v668_v37, %v668_v37  ;;  %v1421_v37 = vld [vmem:[%s2353_s8 + $0x8] sm:$0x8] }
  0x43   : > { %v683_v30 = vsel %vm510_vm1, %v680_v58, %v682_v22  ;;  %v684_v45 = vrot.slane %v674_v40, 1 }
  0x44   : > { %461 = vmatpush.bf16.msrb.mxu1 %v2142_v34  ;;  %917 = vmatpush.bf16.msrb.mxu0 %v2178_v36  ;;  %v2206_v34 = vld [vmem:[%s2833_s1 + $0x1c8] sm:$0xff]  ;;  %v837_v36 = vrot.slane %v835_v29, 2 }
  0x45   : > { %581 = vmatpush.bf16.msrb.mxu2 %v2158_v35  ;;  %v834_v35 = vrot.slane %v832_v28, 1  ;;  %1383 = vmatpush.bf16.msrb.mxu3 %v2206_v34 }
  0x47   : > { %v838_v39 = vor.u32 %v837_v36, %v834_v35  ;;  %v955_v35 = vld [vmem:[%s2353_s8 + $0x4] sm:$0xc] }
  0x48   : > { %462 = vmatpush.bf16.msrb.mxu1 %v2141_v42  ;;  %918 = vmatpush.bf16.msrb.mxu0 %v2177_v47  ;;  %v1085_v42 = vld [vmem:[%s2353_s8 + $0x8] sm:$0xc]  ;;  %v1125_v47 = vunpack.c.h.b16 %v2390_v23 }
  0x49   : > { %582 = vmatpush.bf16.msrb.mxu2 %v2157_v44  ;;  %v839_v44 = vsel %vm804_vm2, %v829_v13, %v838_v39  ;;  %v1124_v46 = vunpack.c.l.b16 %v1085_v42 }
  0x4b   : > { %463 = vmatmul.bf16.vlgmr.msrb.gmra.mxu1 %v2363_v10  ;;  %919 = vmatmul.bf16.vlgmr.msrb.gmra.mxu0 %v821_v55  ;;  %v2218_v10 = vld [vmem:[%s2833_s1 + $0x228] sm:$0xff]  ;;  %v2185_v55 = vld [vmem:[%s2833_s1 + $0x140] sm:$0xff] }
  0x4c   : > { %1041 = vmatpush.bf16.msra.mxu1 %v2192_v49  ;;  %1507 = vmatpush.bf16.msra.mxu0 %v2220_v52  ;;  %v841_v49 = vshrl.u32 %v2593_v16, 16  ;;  %v2214_v52 = vld [vmem:[%s2833_s1 + $0x208] sm:$0xff] }
  0x4d   : > { %1205 = vmatpush.bf16.msra.mxu2 %v2204_v48  ;;  %v2186_v48 = vld [vmem:[%s2833_s1 + $0x148] sm:$0xff] }
  0x4e   : > { %583 = vmatmul.bf16.vlgmr.msrb.gmra.mxu2 %v513_v54  ;;  %757 = vmatmul.bf16.gmra.mxu3 %v681_v1  ;;  %v2205_v54 = vld [vmem:[%s2833_s1 + $0x1c0] sm:$0xff]  ;;  %v843_v58 = vrot.slane %v841_v49, 1  ;;  %v518_v1 = vrot.slane %v2369_v12, 1  ;;  %v978_v49 = vrot.slane %v2417_v43, 2  ;;  %v2705_v43 = vld [vmem:[%s2353_s8 + $0x28] sm:$0xff] }
  0x4f   : > { %1384 = vmatpush.bf16.msrb.mxu3 %v2205_v54 }
  0x50   : > { %1042 = vmatpush.bf16.msra.mxu1 %v2191_v57  ;;  %1508 = vmatpush.bf16.msra.mxu0 %v2219_v59  ;;  %v2656_v57 = vpack.c.b16 %v1125_v47, %v1124_v46  ;;  %v846_v59 = vrot.slane %v844_v50, 2 }
  0x51   : > { %1206 = vmatpush.bf16.msra.mxu2 %v2203_v56  ;;  %v2652_v56 = vld [vmem:[%s2353_s8 + $0x10] sm:$0xff] }
  0x52   : > { %v1272_v61 = vshrl.u32 %v2656_v57, 16  ;;  %v1275_v62 = vshll.u32 %v2656_v57, 16  ;;  %v1142_v46 = vrot.slane %v2652_v56, 2 }
  0x54   : > { %1043 = vmatpush.bf16.msra.mxu1 %v2190_v0  ;;  %1509 = vmatpush.bf16.msra.mxu0 %v2218_v10  ;;  %v1283_v0 = vshll.u32 %v2652_v56, 16  ;;  %v847_v10 = vor.u32 %v846_v59, %v843_v58  ;;  %v1274_v3 = vrot.slane %v1272_v61, 2  ;;  %v1277_v4 = vrot.slane %v1275_v62, 3 }
  0x55   : > { %1207 = vmatpush.bf16.msra.mxu2 %v2202_v63  ;;  %v1280_v63 = vshrl.u32 %v2652_v56, 16  ;;  %v980_v59 = vrot.slane %v2478_v8, 2 }
  0x56   : > { %v848_v13 = vsel %vm804_vm2, %v838_v39, %v847_v10  ;;  %v1440_v39 = vunpack.c.l.b16 %v1421_v37 }
  0x58   : > { %1044 = vmatpush.bf16.msra.mxu1 %v2189_v6  ;;  %1510 = vmatpush.bf16.msra.mxu0 %v2217_v7  ;;  %v1285_v6 = vrot.slane %v1283_v0, 3  ;;  %v519_v7 = vsel %vm510_vm1, %v516_v38, %v518_v1  ;;  %v974_v38 = vunpack.c.l.b16 %v955_v35  ;;  %v1441_v42 = vpack.c.b16 %v1125_v47, %v1440_v39  ;;  %v1249_v0 = vld [vmem:[%s2353_s8 + $0x30] sm:$0x7] }
  0x59   : > { %1208 = vmatpush.bf16.msra.mxu2 %v2201_v5  ;;  %v1282_v5 = vrot.slane %v1280_v63, 2  ;;  %v984_v39 = vrot.slane %v2593_v16, 2 }
  0x5a   : > { %v1443_v50 = vrot.slane %v1441_v42, 3 }
  0x5b   : > { %468 = vmatmul.bf16.gmra.mxu1 %v2375_v15  ;;  %924 = vmatmul.bf16.gmra.mxu0 %v830_v21  ;;  %v2198_v15 = vld [vmem:[%s2833_s1 + $0x188] sm:$0xff] }
  0x5c   : > { %1045 = vmatpush.bf16.msra.mxu1 %v2188_v17  ;;  %1511 = vmatpush.bf16.msra.mxu0 %v2216_v25  ;;  %v1278_v17 = vor.u32 %v1277_v4, %v1274_v3  ;;  %v2676_v25 = vld [vmem:[%s2353_s8 + $0x18] sm:$0xff] }
  0x5d   : > { %1209 = vmatpush.bf16.msra.mxu2 %v2200_v14  ;;  %v2669_v14 = vpack.c.b16 %v802_v2, %v802_v2  ;;  %v1289_v28 = vshrl.u32 %v2676_v25, 16  ;;  %v1292_v29 = vshll.u32 %v2676_v25, 16  ;;  %v1144_v58 = vrot.slane %v2676_v25, 2 }
  0x5e   : > { %588 = vmatmul.bf16.gmra.mxu2 %v515_v19  ;;  %762 = vmatmul.bf16.gmra.mxu3 %v683_v30  ;;  %v1286_v19 = vor.u32 %v1285_v6, %v1282_v5  ;;  %v1446_v60 = vrot.slane %v2676_v25, 3  ;;  %v981_v2 = vsel %vm976_vm4, %v978_v49, %v980_v59  ;;  %v1268_v5 = vunpack.c.l.b16 %v1249_v0 }
  0x5f   : > { %v850_v21 = vshrl.u32 %v2669_v14, 16  ;;  %v1145_v63 = vsel %vm976_vm4, %v1142_v46, %v1144_v58 }
  0x60   : > { %1046 = vmatpush.bf16.msra.mxu1 %v2187_v27  ;;  %1512 = vmatpush.bf16.msra.mxu0 %v2215_v31  ;;  %v1294_v31 = vrot.slane %v1292_v29, 3  ;;  %v2719_v6 = vpack.c.b16 %v1268_v5, %v1268_v5 }
  0x61   : > { %1210 = vmatpush.bf16.msra.mxu2 %v2199_v24  ;;  %v1287_v24 = vsel %vm1270_vm3, %v1278_v17, %v1286_v19  ;;  %v852_v26 = vrot.slane %v850_v21, 1 }
  0x62   : > { %v1319_v17 = vshll.u32 %v2719_v6, 16 }
  0x64   : > { %1047 = vmatpush.bf16.msra.mxu1 %v2186_v48  ;;  %1513 = vmatpush.bf16.msra.mxu0 %v2214_v52 }
  0x65   : > { %1211 = vmatpush.bf16.msra.mxu2 %v2198_v15  ;;  %v1291_v15 = vrot.slane %v1289_v28, 2 }
  0x67   : > { %v1295_v36 = vor.u32 %v1294_v31, %v1291_v15 }
  0x68   : > { %1048 = vmatpush.bf16.msra.mxu1 %v2185_v55  ;;  %1514 = vmatpush.bf16.msra.mxu0 %v2213_v9 }
  0x69   : > { %1212 = vmatpush.bf16.msra.mxu2 %v2197_v51  ;;  %v1296_v40 = vsel %vm1270_vm3, %v1286_v19, %v1295_v36 }
  0x6b   : > { %473 = vmatmul.bf16.gmra.mxu1 %v2366_v11  ;;  %929 = vmatmul.bf16.gmra.mxu0 %v839_v44  ;;  %v685_v11 = vsel %vm510_vm1, %v682_v22, %v684_v45  ;;  %v853_v22 = vshll.u32 %v2669_v14, 16 }
  0x6d   : > { %v855_v27 = vrot.slane %v853_v22, 2  ;;  %v982_v22 = vrot.slane %v2544_v53, 2 }
  0x6e   : > { %593 = vmatmul.bf16.gmra.mxu2 %v517_v41  ;;  %767 = vmatmul.bf16.gmra.mxu3 %v685_v11  ;;  %v2688_v41 = vld [vmem:[%s2353_s8 + $0x20] sm:$0xff] }
  0x6f   : > { %v856_v30 = vor.u32 %v855_v27, %v852_v26  ;;  %v1298_v44 = vshrl.u32 %v2688_v41, 16  ;;  %v1301_v45 = vshll.u32 %v2688_v41, 16  ;;  %v1146_v19 = vrot.slane %v2688_v41, 2 }
  0x70   : > { %v1321_v26 = vrot.slane %v1319_v17, 3 }
  0x71   : > { %v857_v34 = vsel %vm804_vm2, %v847_v10, %v856_v30  ;;  %v1300_v51 = vrot.slane %v1298_v44, 2  ;;  %v1303_v52 = vrot.slane %v1301_v45, 3  ;;  %v1147_v27 = vsel %vm976_vm4, %v1144_v58, %v1146_v19 }
  0x72   : > { %v985_v45 = vsel %vm976_vm4, %v982_v22, %v984_v39 }
  0x73   : > { %v1304_v11 = vor.u32 %v1303_v52, %v1300_v51 }
  0x75   : > { %v1305_v55 = vsel %vm1270_vm3, %v1295_v36, %v1304_v11  ;;  %v1148_v36 = vrot.slane %v2705_v43, 2 }
  0x7b   : > { %478 = vmatmul.bf16.gmra.mxu1 %v2382_v18  ;;  %934 = vmatmul.bf16.gmra.mxu0 %v848_v13  ;;  %v520_v18 = vrot.slane %v2385_v20, 1  ;;  %v975_v20 = vpack.c.b16 %v659_v33, %v974_v38  ;;  %v1444_v33 = vrot.slane %v2652_v56, 3  ;;  %v1307_v56 = vshrl.u32 %v2705_v43, 16 }
  0x7c   : > { %v1316_v13 = vshrl.u32 %v2719_v6, 16 }
  0x7d   : > { %v521_v32 = vsel %vm510_vm1, %v518_v1, %v520_v18  ;;  %v977_v48 = vrot.slane %v975_v20, 2  ;;  %v1445_v54 = vsel %vm1442_vm5, %v1443_v50, %v1444_v33  ;;  %v1309_v61 = vrot.slane %v1307_v56, 2  ;;  %v1095_v20 = vld [vmem:[%s2353_s8 + $0x30] sm:$0x3] }
  0x7e   : > { %598 = vmatmul.bf16.gmra.mxu2 %v519_v7  ;;  %1385 = vmatmul.bf16.vlgmr.msrb.gmra.mxu3 %v1287_v24  ;;  %v1447_v3 = vsel %vm1442_vm5, %v1444_v33, %v1446_v60  ;;  %v1448_v24 = vrot.slane %v2688_v41, 3  ;;  %v1318_v25 = vrot.slane %v1316_v13, 2  ;;  %v983_v18 = vsel %vm976_vm4, %v980_v59, %v982_v22 }
  0x7f   : > { %v979_v47 = vsel %vm976_vm4, %v977_v48, %v978_v49  ;;  %v1149_v41 = vsel %vm976_vm4, %v1146_v19, %v1148_v36  ;;  %v1134_v48 = vunpack.c.l.b16 %v1095_v20  ;;  %v986_v56 = vrot.slane %v2669_v14, 2 }
  0x80   : > { %v1449_v30 = vsel %vm1442_vm5, %v1446_v60, %v1448_v24  ;;  %v1322_v15 = vor.u32 %v1321_v26, %v1318_v25 }
  0x81   : > { %v1140_v16 = vpack.c.b16 %v1134_v48, %v1134_v48 }
  0x8b   : > { %483 = vmatmul.bf16.gmra.mxu1 %v2369_v12  ;;  %939 = vmatmul.bf16.gmra.mxu0 %v857_v34  ;;  %v1141_v12 = vrot.slane %v2656_v57, 2  ;;  %v1310_v57 = vshll.u32 %v2705_v43, 16 }
  0x8d   : > { %v1143_v23 = vsel %vm976_vm4, %v1141_v12, %v1142_v46  ;;  %v1312_v62 = vrot.slane %v1310_v57, 3  ;;  %v1452_v57 = vrot.slane %v2719_v6, 3 }
  0x8e   : > { %603 = vmatmul.bf16.gmra.mxu2 %v521_v32  ;;  %1390 = vmatmul.bf16.gmra.mxu3 %v1296_v40  ;;  %v1450_v40 = vrot.slane %v2705_v43, 3 }
  0x8f   : > { %v1313_v4 = vor.u32 %v1312_v62, %v1309_v61 }
  0x90   : > { %v1451_v12 = vsel %vm1442_vm5, %v1448_v24, %v1450_v40  ;;  %v1453_v0 = vsel %vm1442_vm5, %v1450_v40, %v1452_v57 }
  0x91   : > { %v1314_v8 = vsel %vm1270_vm3, %v1304_v11, %v1313_v4  ;;  %v1323_v53 = vsel %vm1270_vm3, %v1313_v4, %v1322_v15  ;;  %v1150_v11 = vrot.slane %v1140_v16, 2 }
  0x93   : > { %v1151_v59 = vsel %vm976_vm4, %v1148_v36, %v1150_v11 }
  0x9b   : > { %1049 = vmatmul.bf16.vlgmr.msra.gmra.mxu1 %v979_v47  ;;  %1515 = vmatmul.bf16.vlgmr.msra.gmra.mxu0 %v1445_v54 }
  0x9e   : > { %1213 = vmatmul.bf16.vlgmr.msra.gmra.mxu2 %v1143_v23  ;;  %1395 = vmatmul.bf16.gmra.mxu3 %v1305_v55 }
  0xa8   : > { %v377_v1 = vpop.f32.mrf.mxu0  ;;  %v2714_v10 = vpop.f32.mrf.mxu1 }
  0xab   : > { %1054 = vmatmul.bf16.gmra.mxu1 %v981_v2  ;;  %1520 = vmatmul.bf16.gmra.mxu0 %v1447_v3 }
  0xae   : > { %1218 = vmatmul.bf16.gmra.mxu2 %v1145_v63  ;;  %1400 = vmatmul.bf16.gmra.mxu3 %v1314_v8  ;;  %v987_v63 = vsel %vm976_vm4, %v984_v39, %v986_v56 }
  0xb0   : > { %v379_v7 = vpop.f32.mrf.mxu0  ;;  %v2721_v9 = vpop.f32.mrf.mxu1 }
  0xb1   : > { %v748_v21 = vpop.f32.mrf.mxu3  ;;  %v2733_v31 = vpop.f32.mrf.mxu2 }
  0xb8   : > { %v382_v28 = vpop.f32.mrf.mxu0  ;;  %v2729_v29 = vpop.f32.mrf.mxu1 }
  0xb9   : > { %v750_v32 = vpop.f32.mrf.mxu3  ;;  %v2739_v38 = vpop.f32.mrf.mxu2 }
  0xbb   : > { %1059 = vmatmul.bf16.gmra.mxu1 %v983_v18  ;;  %1525 = vmatmul.bf16.gmra.mxu0 %v1449_v30 }
  0xbe   : > { %1223 = vmatmul.bf16.gmra.mxu2 %v1147_v27  ;;  %1405 = vmatmul.bf16.gmra.mxu3 %v1323_v53 }
  0xc0   : > { %v384_v34 = vpop.f32.mrf.mxu0  ;;  %v2736_v35 = vpop.f32.mrf.mxu1 }
  0xc1   : > { %v753_v37 = vpop.f32.mrf.mxu3 }
  0xc8   : > { %v464_v42 = vpop.f32.mrf.mxu1  ;;  %v920_v44 = vpop.f32.mrf.mxu0 }
  0xc9   : > { %v465_v46 = vadd.f32 %v464_v42, %v377_v1  ;;  %v755_v49 = vpop.f32.mrf.mxu3 }
  0xcb   : > { %1064 = vmatmul.bf16.gmra.mxu1 %v985_v45  ;;  %1530 = vmatmul.bf16.gmra.mxu0 %v1451_v12 }
  0xce   : > { %1228 = vmatmul.bf16.gmra.mxu2 %v1149_v41 }
  0xd0   : > { %v466_v52 = vpop.f32.mrf.mxu1  ;;  %v922_v23 = vpop.f32.mrf.mxu0 }
  0xd1   : > { %v584_v50 = vpop.f32.mrf.mxu2  ;;  %v467_v47 = vadd.f32 %v466_v52, %v379_v7  ;;  %v758_v55 = vpop.f32.mrf.mxu3 }
  0xd2   : > { %v609_v33 = vadd.f32 %v584_v50, %v465_v46 }
  0xd4   : > { %v773_v51 = vadd.f32 %v748_v21, %v609_v33 }
  0xd6   : > { %v2747_v54 = vadd.f32 %v920_v44, %v773_v51 }
  0xd8   : > { %v469_v61 = vpop.f32.mrf.mxu1  ;;  %v925_v62 = vpop.f32.mrf.mxu0 }
  0xd9   : > { %v586_v43 = vpop.f32.mrf.mxu2  ;;  %v470_v1 = vadd.f32 %v469_v61, %v382_v28  ;;  %v760_v3 = vpop.f32.mrf.mxu3 }
  0xda   : > { %v610_v58 = vadd.f32 %v586_v43, %v467_v47 }
  0xdb   : > { %1069 = vmatmul.bf16.gmra.mxu1 %v987_v63  ;;  %1535 = vmatmul.bf16.gmra.mxu0 %v1453_v0 }
  0xdc   : > { %v774_v60 = vadd.f32 %v750_v32, %v610_v58 }
  0xde   : > { %1233 = vmatmul.bf16.gmra.mxu2 %v1151_v59  ;;  %v2754_v2 = vadd.f32 %v922_v23, %v774_v60 }
  0xe0   : > { %v471_v8 = vpop.f32.mrf.mxu1  ;;  %v927_v6 = vpop.f32.mrf.mxu0 }
  0xe1   : > { %v589_v14 = vpop.f32.mrf.mxu2  ;;  %v472_v7 = vadd.f32 %v471_v8, %v384_v34  ;;  %v763_v17 = vpop.f32.mrf.mxu3 }
  0xe2   : > { %v611_v4 = vadd.f32 %v589_v14, %v470_v1 }
  0xe4   : > { %v775_v5 = vadd.f32 %v753_v37, %v611_v4 }
  0xe6   : > { %v2756_v13 = vadd.f32 %v925_v62, %v775_v5 }
  0xe8   : > { %v474_v24 = vpop.f32.mrf.mxu1  ;;  %v930_v25 = vpop.f32.mrf.mxu0 }
  0xe9   : > { %v591_v19 = vpop.f32.mrf.mxu2  ;;  %v475_v26 = vadd.f32 %v474_v24, %v2714_v10  ;;  %v765_v30 = vpop.f32.mrf.mxu3 }
  0xea   : > { %v612_v21 = vadd.f32 %v591_v19, %v472_v7 }
  0xec   : > { %v776_v22 = vadd.f32 %v755_v49, %v612_v21  ;;  %v2783_v21 = vld [vmem:[%s2834_s2] ss:$0 sm:$0xff] }
  0xee   : > { %v2759_v27 = vadd.f32 %v927_v6, %v776_v22 }
  0xf0   : > { %v476_v32 = vpop.f32.mrf.mxu1  ;;  %v932_v53 = vpop.f32.mrf.mxu0 }
  0xf1   : > { %v594_v28 = vpop.f32.mrf.mxu2  ;;  %v477_v34 = vadd.f32 %v476_v32, %v2721_v9  ;;  %v768_v41 = vpop.f32.mrf.mxu3 }
  0xf2   : > { %v613_v18 = vadd.f32 %v594_v28, %v475_v26 }
  0xf4   : > { %v777_v15 = vadd.f32 %v758_v55, %v613_v18 }
  0xf6   : > { %v2762_v36 = vadd.f32 %v930_v25, %v777_v15  ;;  %v2789_v25 = vld [vmem:[%s2835_s3] ss:$0 sm:$0xff] }
  0xf8   : > { %v479_v20 = vpop.f32.mrf.mxu1  ;;  %v935_v42 = vpop.f32.mrf.mxu0 }
  0xf9   : > { %v596_v37 = vpop.f32.mrf.mxu2  ;;  %v480_v10 = vadd.f32 %v479_v20, %v2729_v29  ;;  %v770_v9 = vpop.f32.mrf.mxu3 }
  0xfa   : > { %v614_v39 = vadd.f32 %v596_v37, %v477_v34 }
  0xfc   : > { %v778_v40 = vadd.f32 %v760_v3, %v614_v39 }
  0xfe   : > { %v2765_v44 = vadd.f32 %v932_v53, %v778_v40 }
 0x100   : > { %v481_v48 = vpop.f32.mrf.mxu1  ;;  %v937_v49 = vpop.f32.mrf.mxu0 }
 0x101   : > { %v599_v45 = vpop.f32.mrf.mxu2  ;;  %v482_v50 = vadd.f32 %v481_v48, %v2736_v35  ;;  %v1386_v55 = vpop.f32.mrf.mxu3 }
 0x102   : > { %v615_v12 = vadd.f32 %v599_v45, %v480_v10 }
 0x104   : > { %v779_v46 = vadd.f32 %v763_v17, %v615_v12 }
 0x106   : > { %v2768_v33 = vadd.f32 %v935_v42, %v779_v46 }
 0x108   : > { %v484_v23 = vpop.f32.mrf.mxu1  ;;  %v940_v47 = vpop.f32.mrf.mxu0 }
 0x109   : > { %v601_v16 = vpop.f32.mrf.mxu2  ;;  %v485_v11 = vadd.f32 %v484_v23, %v2733_v31  ;;  %v1388_v63 = vpop.f32.mrf.mxu3 }
 0x10a   : > { %v616_v51 = vadd.f32 %v601_v16, %v482_v50 }
 0x10c   : > { %v780_v52 = vadd.f32 %v765_v30, %v616_v51 }
 0x10e   : > { %v2771_v29 = vadd.f32 %v937_v49, %v780_v52 }
 0x110   : > { %v486_v58 = vpop.f32.mrf.mxu1  ;;  %v942_v59 = vpop.f32.mrf.mxu0 }
 0x111   : > { %v604_v43 = vpop.f32.mrf.mxu2  ;;  %v487_v35 = vadd.f32 %v486_v58, %v2739_v38  ;;  %v1391_v6 = vpop.f32.mrf.mxu3 }
 0x112   : > { %v617_v56 = vadd.f32 %v604_v43, %v485_v11 }
 0x114   : > { %v781_v57 = vadd.f32 %v768_v41, %v617_v56 }
 0x116   : > { %v2774_v60 = vadd.f32 %v940_v47, %v781_v57 }
 0x118   : > { %v1050_v1 = vpop.f32.mrf.mxu1  ;;  %v1516_v3 = vpop.f32.mrf.mxu0 }
 0x119   : > { %v606_v61 = vpop.f32.mrf.mxu2  ;;  %v1075_v31 = vadd.f32 %v1050_v1, %v2747_v54  ;;  %v1393_v15 = vpop.f32.mrf.mxu3 }
 0x11a   : > { %v618_v62 = vadd.f32 %v606_v61, %v487_v35 }
 0x11c   : > { %v782_v0 = vadd.f32 %v770_v9, %v618_v62 }
 0x11e   : > { %v2777_v14 = vadd.f32 %v942_v59, %v782_v0 }
 0x120   : > { %v1052_v7 = vpop.f32.mrf.mxu1  ;;  %v1518_v17 = vpop.f32.mrf.mxu0 }
 0x121   : > { %v1214_v4 = vpop.f32.mrf.mxu2  ;;  %v1076_v38 = vadd.f32 %v1052_v7, %v2754_v2  ;;  %v1396_v48 = vpop.f32.mrf.mxu3 }
 0x122   : > { %v1239_v5 = vadd.f32 %v1214_v4, %v1075_v31 }
 0x124   : > { %v1411_v8 = vadd.f32 %v1386_v55, %v1239_v5 }
 0x126   : > { %v1541_v19 = vadd.f32 %v1516_v3, %v1411_v8 }
 0x128   : > { %v1555_v54 = vmul.f32 %v2783_v21, %v1541_v19  ;;  %v1055_v28 = vpop.f32.mrf.mxu1  ;;  %v1521_v18 = vpop.f32.mrf.mxu0 }
 0x129   : > { %v1216_v22 = vpop.f32.mrf.mxu2  ;;  %v1077_v2 = vadd.f32 %v1055_v28, %v2756_v13  ;;  %v1398_v56 = vpop.f32.mrf.mxu3 }
 0x12a   : > { %v1240_v24 = vadd.f32 %v1216_v22, %v1076_v38  ;;  %v1569_v32 = vadd.f32 %v2789_v25, %v1555_v54 }
 0x12c   : > { %v1412_v26 = vadd.f32 %v1388_v63, %v1240_v24  ;;  %v1579_v40 = vmax.f32 %v1569_v32, 0.0 }
 0x12e   : > { %v1542_v30 = vadd.f32 %v1518_v17, %v1412_v26 }
 0x130   : > { %v1556_v53 = vmul.f32 %v2783_v21, %v1542_v30  ;;  %v1057_v13 = vpop.f32.mrf.mxu1  ;;  %v1523_v42 = vpop.f32.mrf.mxu0 }
 0x131   : > { %v1219_v34 = vpop.f32.mrf.mxu2  ;;  %v1078_v45 = vadd.f32 %v1057_v13, %v2759_v27  ;;  %v1401_v4 = vpop.f32.mrf.mxu3 }
 0x132   : > { %v1570_v37 = vadd.f32 %v2789_v25, %v1556_v53  ;;  %v1241_v39 = vadd.f32 %v1219_v34, %v1077_v2 }
 0x134   : > { %v1580_v41 = vmax.f32 %v1570_v37, 0.0  ;;  %v1413_v20 = vadd.f32 %v1391_v6, %v1241_v39 }
 0x136   : > { %v2228_v10 = vpack.c.bf16 %v1580_v41, %v1579_v40  ;;  %v1543_v12 = vadd.f32 %v1521_v18, %v1413_v20 }
 0x138   : > { %2229 = vst [vmem:[%s2799_s6] sm:$0xff] %v2228_v10   ;;  %v1557_v50 = vmul.f32 %v2783_v21, %v1543_v12  ;;  %v1060_v16 = vpop.f32.mrf.mxu1  ;;  %v1526_v51 = vpop.f32.mrf.mxu0 }
 0x139   : > { %v1221_v46 = vpop.f32.mrf.mxu2  ;;  %v1079_v23 = vadd.f32 %v1060_v16, %v2762_v36  ;;  %v1403_v2 = vpop.f32.mrf.mxu3 }
 0x13a   : > { %v1242_v49 = vadd.f32 %v1221_v46, %v1078_v45  ;;  %v1571_v47 = vadd.f32 %v2789_v25, %v1557_v50 }
 0x13c   : > { %v1414_v9 = vadd.f32 %v1393_v15, %v1242_v49  ;;  %v1581_v57 = vmax.f32 %v1571_v47, 0.0 }
 0x13e   : > { %v1544_v52 = vadd.f32 %v1523_v42, %v1414_v9 }
 0x140   : > { %v1558_v11 = vmul.f32 %v2783_v21, %v1544_v52  ;;  %v1062_v35 = vpop.f32.mrf.mxu1  ;;  %v1528_v61 = vpop.f32.mrf.mxu0 }
 0x141   : > { %v1224_v55 = vpop.f32.mrf.mxu2  ;;  %v1080_v63 = vadd.f32 %v1062_v35, %v2765_v44  ;;  %v1406_v42 = vpop.f32.mrf.mxu3 }
 0x142   : > { %v1572_v27 = vadd.f32 %v2789_v25, %v1558_v11  ;;  %v1243_v43 = vadd.f32 %v1224_v55, %v1079_v23 }
 0x144   : > { %v1582_v58 = vmax.f32 %v1572_v27, 0.0  ;;  %v1415_v59 = vadd.f32 %v1396_v48, %v1243_v43 }
 0x146   : > { %v2233_v62 = vpack.c.bf16 %v1582_v58, %v1581_v57  ;;  %v1545_v0 = vadd.f32 %v1526_v51, %v1415_v59 }
 0x148   : > { %2253 = vst [vmem:[%s2799_s6 + $0x8] sm:$0xff] %v2233_v62   ;;  %v1559_v3 = vmul.f32 %v2783_v21, %v1545_v0  ;;  %v1065_v5 = vpop.f32.mrf.mxu1  ;;  %v1531_v7 = vpop.f32.mrf.mxu0 }
 0x149   : > { %v1226_v36 = vpop.f32.mrf.mxu2  ;;  %v1081_v6 = vadd.f32 %v1065_v5, %v2768_v33  ;;  %v1408_v11 = vpop.f32.mrf.mxu3 }
 0x14a   : > { %v1244_v1 = vadd.f32 %v1226_v36, %v1080_v63  ;;  %v1573_v17 = vadd.f32 %v2789_v25, %v1559_v3 }
 0x14c   : > { %v1416_v31 = vadd.f32 %v1398_v56, %v1244_v1  ;;  %v1583_v24 = vmax.f32 %v1573_v17, 0.0 }
 0x14e   : > { %v1546_v8 = vadd.f32 %v1528_v61, %v1416_v31 }
 0x150   : > { %v1560_v38 = vmul.f32 %v2783_v21, %v1546_v8  ;;  %v1067_v28 = vpop.f32.mrf.mxu1  ;;  %v1533_v33 = vpop.f32.mrf.mxu0 }
 0x151   : > { %v1229_v19 = vpop.f32.mrf.mxu2  ;;  %v1082_v30 = vadd.f32 %v1067_v28, %v2771_v29 }
 0x152   : > { %v1574_v44 = vadd.f32 %v2789_v25, %v1560_v38  ;;  %v1245_v22 = vadd.f32 %v1229_v19, %v1081_v6 }
 0x154   : > { %v1584_v54 = vmax.f32 %v1574_v44, 0.0  ;;  %v1417_v26 = vadd.f32 %v1401_v4, %v1245_v22 }
 0x156   : > { %v2238_v18 = vpack.c.bf16 %v1584_v54, %v1583_v24  ;;  %v1547_v15 = vadd.f32 %v1531_v7, %v1417_v26 }
 0x158   : > { %2254 = vst [vmem:[%s2799_s6 + $0x10] sm:$0xff] %v2238_v18   ;;  %v1561_v34 = vmul.f32 %v2783_v21, %v1547_v15  ;;  %v1070_v39 = vpop.f32.mrf.mxu1  ;;  %v1536_v12 = vpop.f32.mrf.mxu0 }
 0x159   : > { %v1231_v32 = vpop.f32.mrf.mxu2  ;;  %v1083_v41 = vadd.f32 %v1070_v39, %v2774_v60 }
 0x15a   : > { %v1246_v53 = vadd.f32 %v1231_v32, %v1082_v30  ;;  %v1575_v20 = vadd.f32 %v2789_v25, %v1561_v34 }
 0x15c   : > { %v1418_v37 = vadd.f32 %v1403_v2, %v1246_v53  ;;  %v1585_v46 = vmax.f32 %v1575_v20, 0.0 }
 0x15e   : > { %v1548_v40 = vadd.f32 %v1533_v33, %v1418_v37 }
 0x160   : > { %v1562_v13 = vmul.f32 %v2783_v21, %v1548_v40  ;;  %v1072_v50 = vpop.f32.mrf.mxu1  ;;  %v1538_v27 = vpop.f32.mrf.mxu0 }
 0x161   : > { %v1234_v29 = vpop.f32.mrf.mxu2  ;;  %v1084_v51 = vadd.f32 %v1072_v50, %v2777_v14 }
 0x162   : > { %v1576_v10 = vadd.f32 %v2789_v25, %v1562_v13  ;;  %v1247_v45 = vadd.f32 %v1234_v29, %v1083_v41 }
 0x164   : > { %v1586_v48 = vmax.f32 %v1576_v10, 0.0  ;;  %v1419_v49 = vadd.f32 %v1406_v42, %v1247_v45 }
 0x166   : > { %v2243_v9 = vpack.c.bf16 %v1586_v48, %v1585_v46  ;;  %v1549_v16 = vadd.f32 %v1536_v12, %v1419_v49 }
 0x168   : > { %2255 = vst [vmem:[%s2799_s6 + $0x18] sm:$0xff] %v2243_v9   ;;  %v1563_v60 = vmul.f32 %v2783_v21, %v1549_v16 }
 0x169   : > { %v1236_v52 = vpop.f32.mrf.mxu2 }
 0x16a   : > { %v1577_v23 = vadd.f32 %v2789_v25, %v1563_v60  ;;  %v1248_v47 = vadd.f32 %v1236_v52, %v1084_v51 }
 0x16c   : > { %v1420_v55 = vadd.f32 %v1408_v11, %v1248_v47  ;;  %v1587_v58 = vmax.f32 %v1577_v23, 0.0 }
 0x16e   : > { %v1550_v43 = vadd.f32 %v1538_v27, %v1420_v55 }
 0x170   : > { %v1564_v56 = vmul.f32 %v2783_v21, %v1550_v43 }
 0x172   : > { %v1578_v57 = vadd.f32 %v2789_v25, %v1564_v56 }
 0x174   : > { %v1588_v59 = vmax.f32 %v1578_v57, 0.0 }
 0x176   : > { %v2248_v35 = vpack.c.bf16 %v1588_v59, %v1587_v58 }
 0x178   : > { %2256 = vst [vmem:[%s2799_s6 + $0x20] sm:$0xff] %v2248_v35  }
 0x179 PF: > { %s14_s15 = sadd.s32 1, %s2291_s15  }
 0x17a   : > { %p11_p4 = scmp.ge.s32.totalorder %s14_s15, 4  }
 0x17c   :  { %13 = sbr.rel (!%p11_p4) target bundleno = 1 (0x1), region = 74 }

</bundles_post_ra>
